<compile_context>
chip_gen: v7x
topology: tpu7x:2x2x1
jax: 0.10.0
libtpu: 0.0.40
codegen_flags: <defaults>
</compile_context>

<pallas_src>
import functools

import jax
import jax.numpy as jnp
from jax.experimental import pallas as pl
from jax.experimental.pallas import tpu as pltpu

LANE = 128


def _vmem_limit_bytes():
    # Generation-aware VMEM budget (~75% of capacity): v5e/v6e 128 MiB, v7x 64 MiB.
    try:
        cap = getattr(pltpu.get_tpu_info(), "vmem_capacity_bytes", None)
        if cap:
            return int(cap) * 3 // 4
    except Exception:
        pass
    return 48 * 1024 * 1024


def _compiler_params(n_axes):
    return pltpu.CompilerParams(
        dimension_semantics=("parallel",) * n_axes,
        vmem_limit_bytes=_vmem_limit_bytes(),
    )


# ----------------------------------------------------------------------------
# Fused backbone body (runs once per image / grid step):
#   stem conv (im2col built in wrapper, one K=128 dot) + folded BN + ReLU
#   -> halo-padded VMEM scratch
#   -> in-VMEM im2col -> single deep dot for the SplAtConv2d 3x3 conv
#   -> BN + ReLU -> rSoftMax radix attention -> reweight -> GAP
# Returns feat (1, C) f32.
# ----------------------------------------------------------------------------
def _backbone(x_ref, sw_ref, ssc_ref, ssh_ref, pw_ref, psc_ref, psh_ref,
              aw1_ref, ab1_ref, aw2_ref, ab2_ref, h_scr, lhs_scr, *, H, W, C):
    HW = H * W

    # Halo re-zeroed every step: with a "parallel" grid a zero-once-at-step-0
    # guard could be skipped by a core that never executes step 0.  (~83 KB vst)
    h_scr[...] = jnp.zeros_like(h_scr)

    # ---- stem: 3x3 conv as one K=128 dot (9 taps * cin packed, zero-padded) ----
    h = jnp.dot(x_ref[0], sw_ref[...], preferred_element_type=jnp.float32)
    h = jnp.maximum(h * ssc_ref[...] + ssh_ref[...], 0.0).astype(jnp.bfloat16)
    h_scr[1:1 + H, 1:1 + W, :] = h.reshape(H, W, C)      # interior; halo stays 0

    # ---- split-attention conv: in-VMEM im2col -> single K=9*C dot ----
    # TODO(synk): the per-tap sublane-offset reads below could be replaced by
    # pltpu.roll-based shifting to save the 9 small VMEM copies per image.
    for t in range(9):
        di, dj = t // 3, t % 3
        lhs_scr[:, t * C:(t + 1) * C] = (
            h_scr[di:di + H, dj:dj + W, :].reshape(HW, C))
    u = jnp.dot(lhs_scr[...], pw_ref[...], preferred_element_type=jnp.float32)
    u = jnp.maximum(u * psc_ref[...] + psh_ref[...], 0.0).astype(jnp.bfloat16)
    u0 = u[:, :C]                                  # radix split 0 (128-lane slab)
    u1 = u[:, C:]                                  # radix split 1

    # ---- rSoftMax attention (radix=2) with fused global average pool ----
    gap = jnp.mean(u0.astype(jnp.float32) + u1.astype(jnp.float32),
                   axis=0, keepdims=True)                         # (1, C) f32
    hid = jnp.dot(gap.astype(jnp.bfloat16), aw1_ref[...],
                  preferred_element_type=jnp.float32) + ab1_ref[...]
    hid = jnp.maximum(hid, 0.0)
    logits = jnp.dot(hid.astype(jnp.bfloat16), aw2_ref[...],
                     preferred_element_type=jnp.float32) + ab2_ref[...]
    a0 = logits[:, :C]
    a1 = logits[:, C:]
    m = jnp.maximum(a0, a1)
    e0 = jnp.exp(a0 - m)
    e1 = jnp.exp(a1 - m)
    inv = pl.reciprocal(e0 + e1, approx=True)                     # EUP slot
    att0 = (e0 * inv).astype(jnp.bfloat16)
    att1 = (e1 * inv).astype(jnp.bfloat16)
    v = u0 * att0 + u1 * att1                                     # bf16 reweight
    return jnp.mean(v.astype(jnp.float32), axis=0, keepdims=True)  # fused GAP


def _fused_classify_kernel(x_ref, sw_ref, ssc_ref, ssh_ref,
                           pw_ref, psc_ref, psh_ref,
                           aw1_ref, ab1_ref, aw2_ref, ab2_ref,
                           cw_ref, cb_ref,
                           o_ref, h_scr, lhs_scr, *, H, W, C):
    feat = _backbone(x_ref, sw_ref, ssc_ref, ssh_ref, pw_ref, psc_ref, psh_ref,
                     aw1_ref, ab1_ref, aw2_ref, ab2_ref, h_scr, lhs_scr,
                     H=H, W=W, C=C)
    out = jnp.dot(feat.astype(jnp.bfloat16), cw_ref[...],
                  preferred_element_type=jnp.float32) + cb_ref[...]
    o_ref[0] = out


def _fused_metric_kernel(x_ref, sw_ref, ssc_ref, ssh_ref,
                         pw_ref, psc_ref, psh_ref,
                         aw1_ref, ab1_ref, aw2_ref, ab2_ref,
                         fw_ref, fb_ref, arc_ref,
                         o_ref, h_scr, lhs_scr, *, H, W, C, out_p):
    feat = _backbone(x_ref, sw_ref, ssc_ref, ssh_ref, pw_ref, psc_ref, psh_ref,
                     aw1_ref, ab1_ref, aw2_ref, ab2_ref, h_scr, lhs_scr,
                     H=H, W=W, C=C)
    y = jnp.dot(feat.astype(jnp.bfloat16), fw_ref[...],
                preferred_element_type=jnp.float32) + fb_ref[...]
    sig = pl.reciprocal(1.0 + jnp.exp(-y), approx=True)           # Swish (EUP)
    s = y * sig
    sn = (s * jax.lax.rsqrt(jnp.sum(s * s, axis=1, keepdims=True) + 1e-12)
          ).astype(jnp.bfloat16)
    # Single wide subcenter dot (fc_dim x k_sub*out_p), then max over lane slabs.
    cos = jnp.dot(sn, arc_ref[...], preferred_element_type=jnp.float32)
    k_sub = arc_ref.shape[1] // out_p
    best = cos[:, :out_p]
    for k in range(1, k_sub):
        best = jnp.maximum(best, cos[:, k * out_p:(k + 1) * out_p])
    o_ref[0] = best


# ----------------------------------------------------------------------------
# pallas_call wrapper: one fused launch over a "parallel" batch grid.
# ----------------------------------------------------------------------------
def resnest_fused(x_col, params, *, H, W, metric):
    B, HW, k_stem = x_col.shape
    C = params["stem_w"].shape[1]
    Hp, Wp = H + 2, W + 2
    out_p = params["cls_b"].shape[1]

    def const2(arr):
        # TODO(synk): grid-invariant weights could use pipeline_mode=pl.Buffered(1)
        # to avoid double-buffering constants (matters on v7x's 64 MiB VMEM).
        return pl.BlockSpec(tuple(arr.shape), lambda b: (0, 0))

    common = (params["stem_w"], params["stem_scale"], params["stem_shift"],
              params["splat_w"], params["splat_scale"], params["splat_shift"],
              params["att_w1"], params["att_b1"],
              params["att_w2"], params["att_b2"])
    if metric:
        kern = functools.partial(_fused_metric_kernel, H=H, W=W, C=C, out_p=out_p)
        head = (params["fc_w"], params["fc_b"], params["arc_w"])
    else:
        kern = functools.partial(_fused_classify_kernel, H=H, W=W, C=C)
        head = (params["cls_w"], params["cls_b"])

    in_specs = ([pl.BlockSpec((1, HW, k_stem), lambda b: (b, 0, 0))]
                + [const2(a) for a in common] + [const2(a) for a in head])

    # TODO(synk): at real ResNeSt spatial sizes add an "arbitrary" HW row-tile
    # grid axis (two-pass u scratch + halo recompute) so each TensorCore
    # pipelines >=4 steps; at 16x16 one image per step fits VMEM easily.
    out = pl.pallas_call(
        kern,
        out_shape=jax.ShapeDtypeStruct((B, 1, out_p), jnp.float32),
        grid=(B,),
        in_specs=in_specs,
        out_specs=pl.BlockSpec((1, 1, out_p), lambda b: (b, 0, 0)),
        scratch_shapes=[
            pltpu.VMEM((Hp, Wp, C), jnp.bfloat16),    # halo-padded stem output
            pltpu.VMEM((HW, 9 * C), jnp.bfloat16),    # in-VMEM im2col for splat conv
        ],
        compiler_params=_compiler_params(1),
    )(x_col, *common, *head)
    return out[:, 0, :]                               # (B, out_p)


# ----------------------------------------------------------------------------
# Parameters (deterministic, synthetic).  Real channels (cstem=32, out_dim=5)
# are embedded into zero-padded 128-lane slabs so every kernel output is
# lane-dense; padded weight/scale/shift entries are zero so padded lanes are 0.
# ----------------------------------------------------------------------------
def init_params(key, cin=3, cstem=32, inter=16, fc_dim=512, out_dim=5, k_sub=3):
    ks = jax.random.split(key, 8)

    def rnd(k, shape, s):
        return jax.random.normal(k, shape, jnp.float32) * s

    c_p = LANE
    out_p = LANE
    inter_p = LANE
    k_stem = LANE                                   # 9*cin (=27) padded to 128

    # stem conv (folded BN + ReLU), im2col weight layout (9*cin -> k_stem rows)
    w = rnd(ks[0], (9 * cin, cstem), 0.1)
    stem_w = jnp.zeros((k_stem, c_p), jnp.float32).at[:9 * cin, :cstem].set(w)
    stem_scale = jnp.zeros((1, c_p), jnp.float32).at[:, :cstem].set(1.0)
    stem_shift = jnp.zeros((1, c_p), jnp.float32).at[:, :cstem].set(0.01)

    # split-attention 3x3 conv (radix=2, groups=1), im2col weight (9*C, 2*C);
    # split r occupies lanes [r*c_p, r*c_p + cstem).
    # TODO(synk): with cstem=32 each radix split is zero-padded to a 128-lane
    # slab (extra MXU columns); real ResNeSt channel counts are >=128 so the
    # padding overhead vanishes at production sizes.
    sw = rnd(ks[1], (9, cstem, 2 * cstem), 0.05)
    splat_w = jnp.zeros((9, c_p, 2 * c_p), jnp.float32)
    splat_w = splat_w.at[:, :cstem, :cstem].set(sw[..., :cstem])
    splat_w = splat_w.at[:, :cstem, c_p:c_p + cstem].set(sw[..., cstem:])
    splat_w = splat_w.reshape(9 * c_p, 2 * c_p)
    splat_scale = jnp.zeros((1, 2 * c_p), jnp.float32)
    splat_scale = splat_scale.at[:, :cstem].set(1.0)
    splat_scale = splat_scale.at[:, c_p:c_p + cstem].set(1.0)
    splat_shift = jnp.zeros((1, 2 * c_p), jnp.float32)

    # rSoftMax attention MLP (inter padded to 128 lanes; padded rows/cols zero)
    att_w1 = jnp.zeros((c_p, inter_p), jnp.float32)
    att_w1 = att_w1.at[:cstem, :inter].set(rnd(ks[2], (cstem, inter), 0.1))
    att_b1 = jnp.zeros((1, inter_p), jnp.float32)
    aw2 = rnd(ks[3], (inter, 2 * cstem), 0.1)
    att_w2 = jnp.zeros((inter_p, 2 * c_p), jnp.float32)
    att_w2 = att_w2.at[:inter, :cstem].set(aw2[:, :cstem])
    att_w2 = att_w2.at[:inter, c_p:c_p + cstem].set(aw2[:, cstem:])
    att_b2 = jnp.zeros((1, 2 * c_p), jnp.float32)

    # heads
    fc_w = jnp.zeros((c_p, fc_dim), jnp.float32)
    fc_w = fc_w.at[:cstem, :].set(rnd(ks[4], (cstem, fc_dim), 0.05))
    fc_b = jnp.zeros((1, fc_dim), jnp.float32)

    arc = rnd(ks[5], (k_sub, fc_dim, out_dim), 0.05)
    arc = arc / jnp.maximum(                        # L2-normalize once (hoisted)
        jnp.sqrt(jnp.sum(arc * arc, axis=1, keepdims=True)), 1e-12)
    arc_w = jnp.zeros((fc_dim, k_sub * out_p), jnp.float32)
    for k in range(k_sub):                          # subcenter k in lane slab k
        arc_w = arc_w.at[:, k * out_p:k * out_p + out_dim].set(arc[k])

    cls_w = jnp.zeros((c_p, out_p), jnp.float32)
    cls_w = cls_w.at[:cstem, :out_dim].set(rnd(ks[6], (cstem, out_dim), 0.05))
    cls_b = jnp.zeros((1, out_p), jnp.float32)

    bf = jnp.bfloat16
    return dict(
        stem_w=stem_w.astype(bf), stem_scale=stem_scale, stem_shift=stem_shift,
        splat_w=splat_w.astype(bf), splat_scale=splat_scale, splat_shift=splat_shift,
        att_w1=att_w1.astype(bf), att_b1=att_b1,
        att_w2=att_w2.astype(bf), att_b2=att_b2,
        fc_w=fc_w.astype(bf), fc_b=fc_b, arc_w=arc_w.astype(bf),
        cls_w=cls_w.astype(bf), cls_b=cls_b,
    )


# ----------------------------------------------------------------------------
# Full forward (mirrors Resnest.forward)
# ----------------------------------------------------------------------------
@functools.partial(jax.jit, static_argnames=("out_dim", "drop_nums", "metric_strategy"))
def resnest_forward(x_nchw, params, out_dim=5, drop_nums=1, metric_strategy=False):
    x = jnp.transpose(x_nchw, (0, 2, 3, 1)).astype(jnp.float32)   # NCHW -> NHWC
    B, H, W, cin = x.shape

    # ---- enet (reduced ResNeSt stage) ----
    # TODO(synk): the full resnest50 backbone (deep stem + 16 bottleneck blocks
    # with running BN statistics / strides) is not reproduced; this reduced
    # stage (3x3 stem + one SplAtConv2d block + GAP) stands in.
    # Stem im2col is built here (input is tiny: B*HW*128 bf16); everything
    # downstream runs in ONE fused Pallas kernel, so the stem output never
    # round-trips through HBM and no XLA pad op sits between the convs.
    xp = jnp.pad(x, ((0, 0), (1, 1), (1, 1), (0, 0)))
    taps = [xp[:, di:di + H, dj:dj + W, :] for di in range(3) for dj in range(3)]
    x_col = jnp.concatenate(taps, axis=-1).reshape(B, H * W, 9 * cin)
    k_stem = params["stem_w"].shape[0]
    x_col = jnp.pad(x_col,
                    ((0, 0), (0, 0), (0, k_stem - 9 * cin))).astype(jnp.bfloat16)

    # ---- fused stem + SplAtConv2d + rSoftMax + GAP + head ----
    # .squeeze(-1).squeeze(-1) is a no-op: features are already 2-D in the kernel.
    # TODO(synk): training-mode nn.Dropout(0.5) not modeled; eval dropout is
    # identity, so the mean over drop_nums identical classify terms equals one call.
    out = resnest_fused(x_col, params, H=H, W=W, metric=metric_strategy)
    return out[:, :out_dim]


if __name__ == "__main__":
    key = jax.random.PRNGKey(0)
    k_params, k_x = jax.random.split(key)

    B, Cin, H, W = 2, 3, 16, 16
    out_dim = 5
    params = init_params(k_params, cin=Cin, cstem=32, inter=16,
                         fc_dim=512, out_dim=out_dim, k_sub=3)
    x = jax.random.normal(k_x, (B, Cin, H, W), jnp.float32)       # NCHW, like PyTorch

    out = resnest_forward(x, params, out_dim=out_dim, drop_nums=1,
                          metric_strategy=False)
    out = jax.block_until_ready(out)
    assert out.shape == (B, out_dim)

    out_metric = resnest_forward(x, params, out_dim=out_dim, metric_strategy=True)
    out_metric = jax.block_until_ready(out_metric)
    assert out_metric.shape == (B, out_dim)

    assert bool(jnp.all(jnp.isfinite(out))) and bool(jnp.all(jnp.isfinite(out_metric)))
    print("KERNEL_OK")
</pallas_src>

<mosaic_0001>
module attributes {stable_mosaic.version = 11 : i64} {
  func.func @_fused_classify_kernel(%arg0: i32, %arg1: memref<1x256x128xbf16, #tpu.memory_space<vmem>>, %arg2: memref<128x128xbf16, #tpu.memory_space<vmem>>, %arg3: memref<1x128xf32, #tpu.memory_space<vmem>>, %arg4: memref<1x128xf32, #tpu.memory_space<vmem>>, %arg5: memref<1152x256xbf16, #tpu.memory_space<vmem>>, %arg6: memref<1x256xf32, #tpu.memory_space<vmem>>, %arg7: memref<1x256xf32, #tpu.memory_space<vmem>>, %arg8: memref<128x128xbf16, #tpu.memory_space<vmem>>, %arg9: memref<1x128xf32, #tpu.memory_space<vmem>>, %arg10: memref<128x256xbf16, #tpu.memory_space<vmem>>, %arg11: memref<1x256xf32, #tpu.memory_space<vmem>>, %arg12: memref<128x128xbf16, #tpu.memory_space<vmem>>, %arg13: memref<1x128xf32, #tpu.memory_space<vmem>>, %arg14: memref<1x1x128xf32, #tpu.memory_space<vmem>>, %arg15: memref<18x18x128xbf16, #tpu.memory_space<vmem>>, %arg16: memref<256x1152xbf16, #tpu.memory_space<vmem>>) attributes {dimension_semantics = [#tpu.dimension_semantics<parallel>], iteration_bounds = array<i64: 2>, scalar_prefetch = 0 : i64, scratch_operands = 2 : i64, tpu.core_type = #tpu.core_type<tc>, window_params = [{transform_indices = @transform_0, window_bounds = array<i64: 1, 256, 128>}, {pipeline_mode = #tpu.pipeline_mode<synchronous>, transform_indices = @transform_1, window_bounds = array<i64: 128, 128>}, {pipeline_mode = #tpu.pipeline_mode<synchronous>, transform_indices = @transform_2, window_bounds = array<i64: 1, 128>}, {pipeline_mode = #tpu.pipeline_mode<synchronous>, transform_indices = @transform_3, window_bounds = array<i64: 1, 128>}, {pipeline_mode = #tpu.pipeline_mode<synchronous>, transform_indices = @transform_4, window_bounds = array<i64: 1152, 256>}, {pipeline_mode = #tpu.pipeline_mode<synchronous>, transform_indices = @transform_5, window_bounds = array<i64: 1, 256>}, {pipeline_mode = #tpu.pipeline_mode<synchronous>, transform_indices = @transform_6, window_bounds = array<i64: 1, 256>}, {pipeline_mode = #tpu.pipeline_mode<synchronous>, transform_indices = @transform_7, window_bounds = array<i64: 128, 128>}, {pipeline_mode = #tpu.pipeline_mode<synchronous>, transform_indices = @transform_8, window_bounds = array<i64: 1, 128>}, {pipeline_mode = #tpu.pipeline_mode<synchronous>, transform_indices = @transform_9, window_bounds = array<i64: 128, 256>}, {pipeline_mode = #tpu.pipeline_mode<synchronous>, transform_indices = @transform_10, window_bounds = array<i64: 1, 256>}, {pipeline_mode = #tpu.pipeline_mode<synchronous>, transform_indices = @transform_11, window_bounds = array<i64: 128, 128>}, {pipeline_mode = #tpu.pipeline_mode<synchronous>, transform_indices = @transform_12, window_bounds = array<i64: 1, 128>}, {transform_indices = @transform_13, window_bounds = array<i64: 1, 1, 128>}]} {
    %cst = arith.constant 0.000000e+00 : bf16
    %0 = vector.broadcast %cst : bf16 to vector<18x18x128xbf16>
    %c0 = arith.constant 0 : index
    %c0_0 = arith.constant 0 : index
    %c0_1 = arith.constant 0 : index
    %1 = vector.load %arg15[%c0, %c0_0, %c0_1] : memref<18x18x128xbf16, #tpu.memory_space<vmem>>, vector<18x18x128xbf16>
    tpu.vector_store %arg15[%c0, %c0_0, %c0_1], %0 {strides = array<i32>} : memref<18x18x128xbf16, #tpu.memory_space<vmem>>, vector<18x18x128xbf16>,
    %c0_2 = arith.constant 0 : index
    %c0_3 = arith.constant 0 : index
    %c0_4 = arith.constant 0 : index
    %2 = vector.load %arg1[%c0_2, %c0_3, %c0_4] : memref<1x256x128xbf16, #tpu.memory_space<vmem>>, vector<1x256x128xbf16>
    %3 = vector.shape_cast %2 : vector<1x256x128xbf16> to vector<256x128xbf16>
    %c0_5 = arith.constant 0 : index
    %c0_6 = arith.constant 0 : index
    %4 = vector.load %arg2[%c0_5, %c0_6] : memref<128x128xbf16, #tpu.memory_space<vmem>>, vector<128x128xbf16>
    %cst_7 = arith.constant dense<0.000000e+00> : vector<256x128xf32>
    %5 = tpu.matmul %3, %4, %cst_7 {dimension_numbers = #tpu.dot_dimension_numbers<[1], [0], [0], [1], [0, 0, 1, 1], [], []>} : vector<256x128xbf16>, vector<128x128xbf16>, vector<256x128xf32> -> vector<256x128xf32>
    %c0_8 = arith.constant 0 : index
    %c0_9 = arith.constant 0 : index
    %6 = vector.load %arg3[%c0_8, %c0_9] : memref<1x128xf32, #tpu.memory_space<vmem>>, vector<1x128xf32>
    %7 = vector.broadcast %6 : vector<1x128xf32> to vector<256x128xf32>
    %8 = arith.mulf %5, %7 : vector<256x128xf32>
    %c0_10 = arith.constant 0 : index
    %c0_11 = arith.constant 0 : index
    %9 = vector.load %arg4[%c0_10, %c0_11] : memref<1x128xf32, #tpu.memory_space<vmem>>, vector<1x128xf32>
    %10 = vector.broadcast %9 : vector<1x128xf32> to vector<256x128xf32>
    %11 = arith.addf %8, %10 : vector<256x128xf32>
    %cst_12 = arith.constant 0.000000e+00 : f32
    %12 = vector.broadcast %cst_12 : f32 to vector<256x128xf32>
    %13 = arith.maximumf %11, %12 : vector<256x128xf32>
    %14 = arith.truncf %13 : vector<256x128xf32> to vector<256x128xbf16>
    %15 = vector.shape_cast %14 : vector<256x128xbf16> to vector<16x16x128xbf16>
    %c1 = arith.constant 1 : index
    %c1_13 = arith.constant 1 : index
    %c0_14 = arith.constant 0 : index
    %16 = vector.load %arg15[%c1, %c1_13, %c0_14] : memref<18x18x128xbf16, #tpu.memory_space<vmem>>, vector<16x16x128xbf16>
    tpu.vector_store %arg15[%c1, %c1_13, %c0_14], %15 {strides = array<i32>} : memref<18x18x128xbf16, #tpu.memory_space<vmem>>, vector<16x16x128xbf16>,
    %c0_15 = arith.constant 0 : index
    %c0_16 = arith.constant 0 : index
    %c0_17 = arith.constant 0 : index
    %17 = vector.load %arg15[%c0_15, %c0_16, %c0_17] : memref<18x18x128xbf16, #tpu.memory_space<vmem>>, vector<16x16x128xbf16>
    %18 = vector.shape_cast %17 : vector<16x16x128xbf16> to vector<256x128xbf16>
    %c0_18 = arith.constant 0 : index
    %c0_19 = arith.constant 0 : index
    %19 = vector.load %arg16[%c0_18, %c0_19] : memref<256x1152xbf16, #tpu.memory_space<vmem>>, vector<256x128xbf16>
    tpu.vector_store %arg16[%c0_18, %c0_19], %18 {strides = array<i32>} : memref<256x1152xbf16, #tpu.memory_space<vmem>>, vector<256x128xbf16>,
    %c0_20 = arith.constant 0 : index
    %c1_21 = arith.constant 1 : index
    %c0_22 = arith.constant 0 : index
    %20 = vector.load %arg15[%c0_20, %c1_21, %c0_22] : memref<18x18x128xbf16, #tpu.memory_space<vmem>>, vector<16x16x128xbf16>
    %21 = vector.shape_cast %20 : vector<16x16x128xbf16> to vector<256x128xbf16>
    %c0_23 = arith.constant 0 : index
    %c128 = arith.constant 128 : index
    %22 = vector.load %arg16[%c0_23, %c128] : memref<256x1152xbf16, #tpu.memory_space<vmem>>, vector<256x128xbf16>
    tpu.vector_store %arg16[%c0_23, %c128], %21 {strides = array<i32>} : memref<256x1152xbf16, #tpu.memory_space<vmem>>, vector<256x128xbf16>,
    %c0_24 = arith.constant 0 : index
    %c2 = arith.constant 2 : index
    %c0_25 = arith.constant 0 : index
    %23 = vector.load %arg15[%c0_24, %c2, %c0_25] : memref<18x18x128xbf16, #tpu.memory_space<vmem>>, vector<16x16x128xbf16>
    %24 = vector.shape_cast %23 : vector<16x16x128xbf16> to vector<256x128xbf16>
    %c0_26 = arith.constant 0 : index
    %c256 = arith.constant 256 : index
    %25 = vector.load %arg16[%c0_26, %c256] : memref<256x1152xbf16, #tpu.memory_space<vmem>>, vector<256x128xbf16>
    tpu.vector_store %arg16[%c0_26, %c256], %24 {strides = array<i32>} : memref<256x1152xbf16, #tpu.memory_space<vmem>>, vector<256x128xbf16>,
    %c1_27 = arith.constant 1 : index
    %c0_28 = arith.constant 0 : index
    %c0_29 = arith.constant 0 : index
    %26 = vector.load %arg15[%c1_27, %c0_28, %c0_29] : memref<18x18x128xbf16, #tpu.memory_space<vmem>>, vector<16x16x128xbf16>
    %27 = vector.shape_cast %26 : vector<16x16x128xbf16> to vector<256x128xbf16>
    %c0_30 = arith.constant 0 : index
    %c384 = arith.constant 384 : index
    %28 = vector.load %arg16[%c0_30, %c384] : memref<256x1152xbf16, #tpu.memory_space<vmem>>, vector<256x128xbf16>
    tpu.vector_store %arg16[%c0_30, %c384], %27 {strides = array<i32>} : memref<256x1152xbf16, #tpu.memory_space<vmem>>, vector<256x128xbf16>,
    %c1_31 = arith.constant 1 : index
    %c1_32 = arith.constant 1 : index
    %c0_33 = arith.constant 0 : index
    %29 = vector.load %arg15[%c1_31, %c1_32, %c0_33] : memref<18x18x128xbf16, #tpu.memory_space<vmem>>, vector<16x16x128xbf16>
    %30 = vector.shape_cast %29 : vector<16x16x128xbf16> to vector<256x128xbf16>
    %c0_34 = arith.constant 0 : index
    %c512 = arith.constant 512 : index
    %31 = vector.load %arg16[%c0_34, %c512] : memref<256x1152xbf16, #tpu.memory_space<vmem>>, vector<256x128xbf16>
    tpu.vector_store %arg16[%c0_34, %c512], %30 {strides = array<i32>} : memref<256x1152xbf16, #tpu.memory_space<vmem>>, vector<256x128xbf16>,
    %c1_35 = arith.constant 1 : index
    %c2_36 = arith.constant 2 : index
    %c0_37 = arith.constant 0 : index
    %32 = vector.load %arg15[%c1_35, %c2_36, %c0_37] : memref<18x18x128xbf16, #tpu.memory_space<vmem>>, vector<16x16x128xbf16>
    %33 = vector.shape_cast %32 : vector<16x16x128xbf16> to vector<256x128xbf16>
    %c0_38 = arith.constant 0 : index
    %c640 = arith.constant 640 : index
    %34 = vector.load %arg16[%c0_38, %c640] : memref<256x1152xbf16, #tpu.memory_space<vmem>>, vector<256x128xbf16>
    tpu.vector_store %arg16[%c0_38, %c640], %33 {strides = array<i32>} : memref<256x1152xbf16, #tpu.memory_space<vmem>>, vector<256x128xbf16>,
    %c2_39 = arith.constant 2 : index
    %c0_40 = arith.constant 0 : index
    %c0_41 = arith.constant 0 : index
    %35 = vector.load %arg15[%c2_39, %c0_40, %c0_41] : memref<18x18x128xbf16, #tpu.memory_space<vmem>>, vector<16x16x128xbf16>
    %36 = vector.shape_cast %35 : vector<16x16x128xbf16> to vector<256x128xbf16>
    %c0_42 = arith.constant 0 : index
    %c768 = arith.constant 768 : index
    %37 = vector.load %arg16[%c0_42, %c768] : memref<256x1152xbf16, #tpu.memory_space<vmem>>, vector<256x128xbf16>
    tpu.vector_store %arg16[%c0_42, %c768], %36 {strides = array<i32>} : memref<256x1152xbf16, #tpu.memory_space<vmem>>, vector<256x128xbf16>,
    %c2_43 = arith.constant 2 : index
    %c1_44 = arith.constant 1 : index
    %c0_45 = arith.constant 0 : index
    %38 = vector.load %arg15[%c2_43, %c1_44, %c0_45] : memref<18x18x128xbf16, #tpu.memory_space<vmem>>, vector<16x16x128xbf16>
    %39 = vector.shape_cast %38 : vector<16x16x128xbf16> to vector<256x128xbf16>
    %c0_46 = arith.constant 0 : index
    %c896 = arith.constant 896 : index
    %40 = vector.load %arg16[%c0_46, %c896] : memref<256x1152xbf16, #tpu.memory_space<vmem>>, vector<256x128xbf16>
    tpu.vector_store %arg16[%c0_46, %c896], %39 {strides = array<i32>} : memref<256x1152xbf16, #tpu.memory_space<vmem>>, vector<256x128xbf16>,
    %c2_47 = arith.constant 2 : index
    %c2_48 = arith.constant 2 : index
    %c0_49 = arith.constant 0 : index
    %41 = vector.load %arg15[%c2_47, %c2_48, %c0_49] : memref<18x18x128xbf16, #tpu.memory_space<vmem>>, vector<16x16x128xbf16>
    %42 = vector.shape_cast %41 : vector<16x16x128xbf16> to vector<256x128xbf16>
    %c0_50 = arith.constant 0 : index
    %c1024 = arith.constant 1024 : index
    %43 = vector.load %arg16[%c0_50, %c1024] : memref<256x1152xbf16, #tpu.memory_space<vmem>>, vector<256x128xbf16>
    tpu.vector_store %arg16[%c0_50, %c1024], %42 {strides = array<i32>} : memref<256x1152xbf16, #tpu.memory_space<vmem>>, vector<256x128xbf16>,
    %c0_51 = arith.constant 0 : index
    %c0_52 = arith.constant 0 : index
    %44 = vector.load %arg16[%c0_51, %c0_52] : memref<256x1152xbf16, #tpu.memory_space<vmem>>, vector<256x1152xbf16>
    %c0_53 = arith.constant 0 : index
    %c0_54 = arith.constant 0 : index
    %45 = vector.load %arg5[%c0_53, %c0_54] : memref<1152x256xbf16, #tpu.memory_space<vmem>>, vector<1152x256xbf16>
    %cst_55 = arith.constant dense<0.000000e+00> : vector<256x256xf32>
    %46 = tpu.matmul %44, %45, %cst_55 {dimension_numbers = #tpu.dot_dimension_numbers<[1], [0], [0], [1], [0, 0, 1, 1], [], []>} : vector<256x1152xbf16>, vector<1152x256xbf16>, vector<256x256xf32> -> vector<256x256xf32>
    %c0_56 = arith.constant 0 : index
    %c0_57 = arith.constant 0 : index
    %47 = vector.load %arg6[%c0_56, %c0_57] : memref<1x256xf32, #tpu.memory_space<vmem>>, vector<1x256xf32>
    %48 = vector.broadcast %47 : vector<1x256xf32> to vector<256x256xf32>
    %49 = arith.mulf %46, %48 : vector<256x256xf32>
    %c0_58 = arith.constant 0 : index
    %c0_59 = arith.constant 0 : index
    %50 = vector.load %arg7[%c0_58, %c0_59] : memref<1x256xf32, #tpu.memory_space<vmem>>, vector<1x256xf32>
    %51 = vector.broadcast %50 : vector<1x256xf32> to vector<256x256xf32>
    %52 = arith.addf %49, %51 : vector<256x256xf32>
    %cst_60 = arith.constant 0.000000e+00 : f32
    %53 = vector.broadcast %cst_60 : f32 to vector<256x256xf32>
    %54 = arith.maximumf %52, %53 : vector<256x256xf32>
    %55 = arith.truncf %54 : vector<256x256xf32> to vector<256x256xbf16>
    %56 = vector.extract_strided_slice %55 {offsets = [0, 0], sizes = [256, 128], strides = [1, 1]} : vector<256x256xbf16> to vector<256x128xbf16>
    %57 = vector.extract_strided_slice %55 {offsets = [0, 128], sizes = [256, 128], strides = [1, 1]} : vector<256x256xbf16> to vector<256x128xbf16>
    %58 = arith.extf %56 : vector<256x128xbf16> to vector<256x128xf32>
    %59 = arith.extf %57 : vector<256x128xbf16> to vector<256x128xf32>
    %60 = arith.addf %58, %59 : vector<256x128xf32>
    %cst_61 = arith.constant dense<0.000000e+00> : vector<128xf32>
    %61 = vector.multi_reduction <add>, %60, %cst_61 [0] : vector<256x128xf32> to vector<128xf32>
    %62 = vector.shape_cast %61 : vector<128xf32> to vector<1x128xf32>
    %cst_62 = arith.constant 2.560000e+02 : f32
    %63 = vector.broadcast %cst_62 : f32 to vector<1x128xf32>
    %64 = arith.divf %62, %63 : vector<1x128xf32>
    %65 = arith.truncf %64 : vector<1x128xf32> to vector<1x128xbf16>
    %c0_63 = arith.constant 0 : index
    %c0_64 = arith.constant 0 : index
    %66 = vector.load %arg8[%c0_63, %c0_64] : memref<128x128xbf16, #tpu.memory_space<vmem>>, vector<128x128xbf16>
    %cst_65 = arith.constant dense<0.000000e+00> : vector<1x128xf32>
    %67 = tpu.matmul %65, %66, %cst_65 {dimension_numbers = #tpu.dot_dimension_numbers<[1], [0], [0], [1], [0, 0, 1, 1], [], []>} : vector<1x128xbf16>, vector<128x128xbf16>, vector<1x128xf32> -> vector<1x128xf32>
    %c0_66 = arith.constant 0 : index
    %c0_67 = arith.constant 0 : index
    %68 = vector.load %arg9[%c0_66, %c0_67] : memref<1x128xf32, #tpu.memory_space<vmem>>, vector<1x128xf32>
    %69 = arith.addf %67, %68 : vector<1x128xf32>
    %cst_68 = arith.constant 0.000000e+00 : f32
    %70 = vector.broadcast %cst_68 : f32 to vector<1x128xf32>
    %71 = arith.maximumf %69, %70 : vector<1x128xf32>
    %72 = arith.truncf %71 : vector<1x128xf32> to vector<1x128xbf16>
    %c0_69 = arith.constant 0 : index
    %c0_70 = arith.constant 0 : index
    %73 = vector.load %arg10[%c0_69, %c0_70] : memref<128x256xbf16, #tpu.memory_space<vmem>>, vector<128x256xbf16>
    %cst_71 = arith.constant dense<0.000000e+00> : vector<1x256xf32>
    %74 = tpu.matmul %72, %73, %cst_71 {dimension_numbers = #tpu.dot_dimension_numbers<[1], [0], [0], [1], [0, 0, 1, 1], [], []>} : vector<1x128xbf16>, vector<128x256xbf16>, vector<1x256xf32> -> vector<1x256xf32>
    %c0_72 = arith.constant 0 : index
    %c0_73 = arith.constant 0 : index
    %75 = vector.load %arg11[%c0_72, %c0_73] : memref<1x256xf32, #tpu.memory_space<vmem>>, vector<1x256xf32>
    %76 = arith.addf %74, %75 : vector<1x256xf32>
    %77 = vector.extract_strided_slice %76 {offsets = [0, 0], sizes = [1, 128], strides = [1, 1]} : vector<1x256xf32> to vector<1x128xf32>
    %78 = vector.extract_strided_slice %76 {offsets = [0, 128], sizes = [1, 128], strides = [1, 1]} : vector<1x256xf32> to vector<1x128xf32>
    %79 = arith.maximumf %77, %78 : vector<1x128xf32>
    %80 = arith.subf %77, %79 : vector<1x128xf32>
    %81 = math.exp %80 : vector<1x128xf32>
    %82 = arith.subf %78, %79 : vector<1x128xf32>
    %83 = math.exp %82 : vector<1x128xf32>
    %84 = arith.addf %81, %83 : vector<1x128xf32>
    %85 = tpu.reciprocal %84 {approx = true} : vector<1x128xf32> -> vector<1x128xf32>
    %86 = arith.mulf %81, %85 : vector<1x128xf32>
    %87 = arith.truncf %86 : vector<1x128xf32> to vector<1x128xbf16>
    %88 = arith.mulf %83, %85 : vector<1x128xf32>
    %89 = arith.truncf %88 : vector<1x128xf32> to vector<1x128xbf16>
    %90 = vector.broadcast %87 : vector<1x128xbf16> to vector<256x128xbf16>
    %91 = arith.mulf %56, %90 : vector<256x128xbf16>
    %92 = vector.broadcast %89 : vector<1x128xbf16> to vector<256x128xbf16>
    %93 = arith.mulf %57, %92 : vector<256x128xbf16>
    %94 = arith.addf %91, %93 : vector<256x128xbf16>
    %95 = arith.extf %94 : vector<256x128xbf16> to vector<256x128xf32>
    %cst_74 = arith.constant dense<0.000000e+00> : vector<128xf32>
    %96 = vector.multi_reduction <add>, %95, %cst_74 [0] : vector<256x128xf32> to vector<128xf32>
    %97 = vector.shape_cast %96 : vector<128xf32> to vector<1x128xf32>
    %cst_75 = arith.constant 2.560000e+02 : f32
    %98 = vector.broadcast %cst_75 : f32 to vector<1x128xf32>
    %99 = arith.divf %97, %98 : vector<1x128xf32>
    %100 = arith.truncf %99 : vector<1x128xf32> to vector<1x128xbf16>
    %c0_76 = arith.constant 0 : index
    %c0_77 = arith.constant 0 : index
    %101 = vector.load %arg12[%c0_76, %c0_77] : memref<128x128xbf16, #tpu.memory_space<vmem>>, vector<128x128xbf16>
    %cst_78 = arith.constant dense<0.000000e+00> : vector<1x128xf32>
    %102 = tpu.matmul %100, %101, %cst_78 {dimension_numbers = #tpu.dot_dimension_numbers<[1], [0], [0], [1], [0, 0, 1, 1], [], []>} : vector<1x128xbf16>, vector<128x128xbf16>, vector<1x128xf32> -> vector<1x128xf32>
    %c0_79 = arith.constant 0 : index
    %c0_80 = arith.constant 0 : index
    %103 = vector.load %arg13[%c0_79, %c0_80] : memref<1x128xf32, #tpu.memory_space<vmem>>, vector<1x128xf32>
    %104 = arith.addf %102, %103 : vector<1x128xf32>
    %c0_81 = arith.constant 0 : index
    %c0_82 = arith.constant 0 : index
    %c0_83 = arith.constant 0 : index
    %105 = vector.load %arg14[%c0_81, %c0_82, %c0_83] : memref<1x1x128xf32, #tpu.memory_space<vmem>>, vector<1x1x128xf32>
    %106 = vector.shape_cast %105 : vector<1x1x128xf32> to vector<1x128xf32>
    %107 = vector.shape_cast %104 : vector<1x128xf32> to vector<1x1x128xf32>
    tpu.vector_store %arg14[%c0_81, %c0_82, %c0_83], %107 {strides = array<i32>} : memref<1x1x128xf32, #tpu.memory_space<vmem>>, vector<1x1x128xf32>,
    return
  }
  func.func @transform_0(%arg0: i32) -> (i32, i32, i32) {
    %c0_i32 = arith.constant 0 : i32
    %c0_i32_0 = arith.constant 0 : i32
    %c0_i32_1 = arith.constant 0 : i32
    return %arg0, %c0_i32, %c0_i32_0 : i32, i32, i32
  }
  func.func @transform_1(%arg0: i32) -> (i32, i32) {
    %c0_i32 = arith.constant 0 : i32
    %c0_i32_0 = arith.constant 0 : i32
    %c0_i32_1 = arith.constant 0 : i32
    return %c0_i32, %c0_i32_0 : i32, i32
  }
  func.func @transform_2(%arg0: i32) -> (i32, i32) {
    %c0_i32 = arith.constant 0 : i32
    %c0_i32_0 = arith.constant 0 : i32
    %c0_i32_1 = arith.constant 0 : i32
    return %c0_i32, %c0_i32_0 : i32, i32
  }
  func.func @transform_3(%arg0: i32) -> (i32, i32) {
    %c0_i32 = arith.constant 0 : i32
    %c0_i32_0 = arith.constant 0 : i32
    %c0_i32_1 = arith.constant 0 : i32
    return %c0_i32, %c0_i32_0 : i32, i32
  }
  func.func @transform_4(%arg0: i32) -> (i32, i32) {
    %c0_i32 = arith.constant 0 : i32
    %c0_i32_0 = arith.constant 0 : i32
    %c0_i32_1 = arith.constant 0 : i32
    return %c0_i32, %c0_i32_0 : i32, i32
  }
  func.func @transform_5(%arg0: i32) -> (i32, i32) {
    %c0_i32 = arith.constant 0 : i32
    %c0_i32_0 = arith.constant 0 : i32
    %c0_i32_1 = arith.constant 0 : i32
    return %c0_i32, %c0_i32_0 : i32, i32
  }
  func.func @transform_6(%arg0: i32) -> (i32, i32) {
    %c0_i32 = arith.constant 0 : i32
    %c0_i32_0 = arith.constant 0 : i32
    %c0_i32_1 = arith.constant 0 : i32
    return %c0_i32, %c0_i32_0 : i32, i32
  }
  func.func @transform_7(%arg0: i32) -> (i32, i32) {
    %c0_i32 = arith.constant 0 : i32
    %c0_i32_0 = arith.constant 0 : i32
    %c0_i32_1 = arith.constant 0 : i32
    return %c0_i32, %c0_i32_0 : i32, i32
  }
  func.func @transform_8(%arg0: i32) -> (i32, i32) {
    %c0_i32 = arith.constant 0 : i32
    %c0_i32_0 = arith.constant 0 : i32
    %c0_i32_1 = arith.constant 0 : i32
    return %c0_i32, %c0_i32_0 : i32, i32
  }
  func.func @transform_9(%arg0: i32) -> (i32, i32) {
    %c0_i32 = arith.constant 0 : i32
    %c0_i32_0 = arith.constant 0 : i32
    %c0_i32_1 = arith.constant 0 : i32
    return %c0_i32, %c0_i32_0 : i32, i32
  }
  func.func @transform_10(%arg0: i32) -> (i32, i32) {
    %c0_i32 = arith.constant 0 : i32
    %c0_i32_0 = arith.constant 0 : i32
    %c0_i32_1 = arith.constant 0 : i32
    return %c0_i32, %c0_i32_0 : i32, i32
  }
  func.func @transform_11(%arg0: i32) -> (i32, i32) {
    %c0_i32 = arith.constant 0 : i32
    %c0_i32_0 = arith.constant 0 : i32
    %c0_i32_1 = arith.constant 0 : i32
    return %c0_i32, %c0_i32_0 : i32, i32
  }
  func.func @transform_12(%arg0: i32) -> (i32, i32) {
    %c0_i32 = arith.constant 0 : i32
    %c0_i32_0 = arith.constant 0 : i32
    %c0_i32_1 = arith.constant 0 : i32
    return %c0_i32, %c0_i32_0 : i32, i32
  }
  func.func @transform_13(%arg0: i32) -> (i32, i32, i32) {
    %c0_i32 = arith.constant 0 : i32
    %c0_i32_0 = arith.constant 0 : i32
    %c0_i32_1 = arith.constant 0 : i32
    return %arg0, %c0_i32, %c0_i32_0 : i32, i32, i32
  }
}

</mosaic_0001>

<bundles_post_ra>
// kernel: resnest_forward.1
= control target key start
LH: loop header
LB: loop body
LE: loop exit
PB: predicated region body
PF: predicated region fallthrough
CT: control target
= control target key end

     0   :  { %s10700_s0 = inlined_call_operand.vmem [shape: bf16[2,256,128], index: 0, kind: input, shape index: {}]   ;;  %s10701_s1 = inlined_call_operand.vmem [shape: bf16[128,128], index: 1, kind: input, shape index: {}]   ;;  %s10702_s2 = inlined_call_operand.vmem [shape: f32[1,128], index: 2, kind: input, shape index: {}]   ;;  %s10703_s3 = inlined_call_operand.vmem [shape: f32[1,128], index: 3, kind: input, shape index: {}]   ;;  %s10704_s4 = inlined_call_operand.vmem [shape: bf16[1152,256], index: 4, kind: input, shape index: {}]   ;;  %s10705_s5 = inlined_call_operand.vmem [shape: f32[1,256], index: 5, kind: input, shape index: {}]   ;;  %s10706_s6 = inlined_call_operand.vmem [shape: f32[1,256], index: 6, kind: input, shape index: {}]   ;;  %s10707_s7 = inlined_call_operand.vmem [shape: bf16[128,128], index: 7, kind: input, shape index: {}]   ;;  %s10708_s8 = inlined_call_operand.vmem [shape: f32[1,128], index: 8, kind: input, shape index: {}]   ;;  %s10709_s9 = inlined_call_operand.vmem [shape: bf16[128,256], index: 9, kind: input, shape index: {}]   ;;  %s10710_s10 = inlined_call_operand.vmem [shape: f32[1,256], index: 10, kind: input, shape index: {}]   ;;  %s10711_s11 = inlined_call_operand.vmem [shape: bf16[128,128], index: 11, kind: input, shape index: {}]   ;;  %s10712_s12 = inlined_call_operand.vmem [shape: f32[1,128], index: 12, kind: input, shape index: {}]   ;;  %s10713_s13 = inlined_call_operand.hbm [shape: f32[2,1,128], index: 13, kind: output, shape index: {}]  }
   0x1   :  { %10722 = sst [smem:[#allocation32_spill]] %s10700_s0 }
   0x2   :  { %18 = vsyncpa [#allocation5], 0 }
   0x3   :  { %20 = vsyncpa [#allocation5 + $0x1], 0  ;;  %s8636_s25 = smov 0   ;;  %s8638_s26 = smov 0  }
   0x4   :  { %s8640_s27 = smov 0   ;;  %s8642_s28 = smov 0  }
   0x5 LB: > { %s8657_s29 = sadd.s32 4294967295, %s8560_s28   ;;  %s7265_s30 = sadd.s32 4294967294, %s8560_s28   ;;  %s8560_s28 = sphi %s8642_s28, %s10791_s28   ;;  %s8556_s27 = sphi %s8640_s27, %s10790_s27   ;;  %s8552_s26 = sphi %s8638_s26, %s10789_s26   ;;  %s8548_s25 = sphi %s8636_s25, %s10788_s25  }
   0x6   : > { %s8661_s14 = sadd.s32 1, %s8560_s28   ;;  %s311_s15 = sadd.s32 1, %s8556_s27 }
   0x7   : > { %s308_s16 = ssub.s32 %s8560_s28, %s8661_s14  ;;  %p321_p0 = scmp.ne.s32.totalorder %s8556_s27, %s8552_s26 }
   0x8   : > { %p309_p1 = scmp.eq.s32.totalorder %s308_s16, 0  ;;  %p322_p2 = scmp.eq.s32.totalorder %s8657_s29, 1 }
   0x9   : > { %p327_p3 = scmp.ne.s32.totalorder %s8552_s26, %s8548_s25  ;;  %p328_p4 = scmp.eq.s32.totalorder %s7265_s30, 1 }
   0xa   : > { %s8672_s17 = scalar_select %p309_p1, %s8556_s27, %s311_s15  }
   0xb   : > { %p8674_p5 = por %p322_p2, %p321_p0  ;;  %p8678_p6 = por %p328_p4, %p327_p3 }
   0xc   : > { %10723 = sst [smem:[#allocation7_spill]] %s8672_s17  ;;  %p7268_p7 = scmp.ge.s32.totalorder %s8560_s28, 1 }
   0xd   : > { %p390_p8 = scmp.lt.s32.totalorder %s8560_s28, 3 }
   0xf   : > { %p391_p9 = pnand %p7268_p7, %p390_p8 }
  0x11   : > { %394 = sbr.rel (%p391_p9) target bundleno = 1826 (0x722), region = 72 }
  0x18   : > { %v8161_v0 = vld [vmem:[%s10701_s1] sm:$0xff]   ;;  %p433_p10 = scmp.lt.s32.totalorder %s8657_s29, 1  ;;  %v8162_v1 = vld [vmem:[%s10701_s1 + $0x8] sm:$0xff]   ;;  %v10714_v2 = vmov 0   ;;  %v8163_v3 = vld [vmem:[%s10701_s1 + $0x10] sm:$0xff]   ;;  %s10726_s0 = sld [smem:[#allocation32_spill]] }
  0x19   : > { %7775 = vmatprep.subr.bf16.mxu0 %v8161_v0  ;;  %445 = vst [vmem:[#allocation2 + $0x18] sm:$0xf] %v10714_v2  ;;  %439 = vst [vmem:[#allocation2] sm:$0xf] %v10714_v2  ;;  %v8164_v4 = vld [vmem:[%s10701_s1 + $0x18] sm:$0xff]   ;;  %v8165_v6 = vld [vmem:[%s10701_s1 + $0x20] sm:$0xff]  }
  0x1a   : > { %s8692_s24 = scalar_select %p433_p10, %s8657_s29, 1  ;;  %440 = vst [vmem:[#allocation2 + $0x4] sm:$0xf] %v10714_v2  ;;  %441 = vst [vmem:[#allocation2 + $0x8] sm:$0x1] %v10714_v2  ;;  %7776 = vmatpush3.bf16.msra.mxu0 %v8161_v0  ;;  %v8166_v7 = vld [vmem:[%s10701_s1 + $0x28] sm:$0xff]  }
  0x1b   : > { %442 = vst [vmem:[#allocation2 + $0xc] sm:$0xf] %v10714_v2  ;;  %443 = vst [vmem:[#allocation2 + $0x10] sm:$0xf] %v10714_v2  ;;  %7777 = vmatprep.subr.bf16.mxu0 %v8162_v1  ;;  %v8167_v8 = vld [vmem:[%s10701_s1 + $0x30] sm:$0xff]   ;;  %v8168_v9 = vld [vmem:[%s10701_s1 + $0x38] sm:$0xff]  }
  0x1c   : > { %444 = vst [vmem:[#allocation2 + $0x14] sm:$0x1] %v10714_v2  ;;  %446 = vst [vmem:[#allocation2 + $0x1c] sm:$0xf] %v10714_v2  ;;  %s7700_s16 = sshll.u32 %s8692_s24, 7  ;;  %vm1376_vm3 = vcmask 1043456  }
  0x1d   : > { %447 = vst [vmem:[#allocation2 + $0x20] sm:$0x1] %v10714_v2  ;;  %448 = vst [vmem:[#allocation2 + $0x24] sm:$0xf] %v10714_v2  ;;  %v8191_v10 = vld [vmem:[%s10704_s4 + $0x204] ss:$8 sps:$4 sm:$0xff]  }
  0x1e   : > { %449 = vst [vmem:[#allocation2 + $0x28] sm:$0xf] %v10714_v2  ;;  %450 = vst [vmem:[#allocation2 + $0x2c] sm:$0x1] %v10714_v2  ;;  %s8755_s22 = scalar_lea.vmem %s10726_s0, %s7700_s16  ;;  %7778 = vmatpush3.bf16.msra.mxu0 %v8162_v1  ;;  %v8193_v11 = vld [vmem:[%s10704_s4 + $0x200] ss:$8 sps:$4 sm:$0xff]   ;;  %5726 = vmatprep.subr.bf16.mxu1 %v8191_v10 }
  0x1f   : > { %451 = vst [vmem:[#allocation2 + $0x30] sm:$0xf] %v10714_v2  ;;  %452 = vst [vmem:[#allocation2 + $0x34] sm:$0xf] %v10714_v2  ;;  %7779 = vmatprep.subr.bf16.mxu0 %v8163_v3  ;;  %v8169_v5 = vld [vmem:[%s8755_s22] sm:$0xff]   ;;  %v8170_v12 = vld [vmem:[%s8755_s22 + $0x8] sm:$0xff]   ;;  %5727 = vmatpush1.bf16.msra.mxu1 %v8193_v11 }
  0x20   : > { %453 = vst [vmem:[#allocation2 + $0x38] sm:$0x1] %v10714_v2  ;;  %454 = vst [vmem:[#allocation2 + $0x3c] sm:$0xf] %v10714_v2  ;;  %7791 = vmatprep.mubr.bf16.mxu0 %v8169_v5  ;;  %v8187_v13 = vld [vmem:[%s10704_s4 + $0x4] ss:$8 sps:$4 sm:$0xff]  }
  0x21   : > { %455 = vst [vmem:[#allocation2 + $0x40] sm:$0xf] %v10714_v2  ;;  %456 = vst [vmem:[#allocation2 + $0x44] sm:$0x1] %v10714_v2  ;;  %v8171_v14 = vld [vmem:[%s8755_s22 + $0x10] sm:$0xff]   ;;  %v8172_v24 = vld [vmem:[%s8755_s22 + $0x18] sm:$0xff]  }
  0x22   : > { %457 = vst [vmem:[#allocation2 + $0x48] sm:$0xf] %v10714_v2  ;;  %458 = vst [vmem:[#allocation2 + $0x4c] sm:$0xf] %v10714_v2  ;;  %7780 = vmatpush3.bf16.msra.mxu0 %v8163_v3  ;;  %v8197_v15 = vld [vmem:[%s10704_s4 + $0x214] ss:$8 sps:$4 sm:$0xff]  }
  0x23   : > { %459 = vst [vmem:[#allocation2 + $0x50] sm:$0x1] %v10714_v2  ;;  %460 = vst [vmem:[#allocation2 + $0x54] sm:$0xf] %v10714_v2  ;;  %7781 = vmatprep.subr.bf16.mxu0 %v8164_v4  ;;  %v8199_v16 = vld [vmem:[%s10704_s4 + $0x210] ss:$8 sps:$4 sm:$0xff]   ;;  %5728 = vmatprep.subr.bf16.mxu1 %v8197_v15 }
  0x24   : > { %461 = vst [vmem:[#allocation2 + $0x58] sm:$0xf] %v10714_v2  ;;  %462 = vst [vmem:[#allocation2 + $0x5c] sm:$0x1] %v10714_v2  ;;  %v8185_v17 = vld [vmem:[%s10704_s4] ss:$8 sps:$4 sm:$0xff]   ;;  %5729 = vmatpush1.bf16.msra.mxu1 %v8199_v16 }
  0x25   : > { %463 = vst [vmem:[#allocation2 + $0x60] sm:$0xf] %v10714_v2  ;;  %464 = vst [vmem:[#allocation2 + $0x64] sm:$0xf] %v10714_v2  ;;  %v8190_v18 = vld [vmem:[%s10704_s4 + $0x14] ss:$8 sps:$4 sm:$0xff]  }
  0x26   : > { %465 = vst [vmem:[#allocation2 + $0x68] sm:$0x1] %v10714_v2  ;;  %466 = vst [vmem:[#allocation2 + $0x6c] sm:$0xf] %v10714_v2  ;;  %7782 = vmatpush3.bf16.msra.mxu0 %v8164_v4  ;;  %v8203_v19 = vld [vmem:[%s10704_s4 + $0x224] ss:$8 sps:$4 sm:$0xff]  }
  0x27   : > { %467 = vst [vmem:[#allocation2 + $0x70] sm:$0xf] %v10714_v2  ;;  %468 = vst [vmem:[#allocation2 + $0x74] sm:$0x1] %v10714_v2  ;;  %7783 = vmatprep.subr.bf16.mxu0 %v8165_v6  ;;  %v8205_v20 = vld [vmem:[%s10704_s4 + $0x220] ss:$8 sps:$4 sm:$0xff]   ;;  %5730 = vmatprep.subr.bf16.mxu1 %v8203_v19 }
  0x28   : > { %469 = vst [vmem:[#allocation2 + $0x78] sm:$0xf] %v10714_v2  ;;  %470 = vst [vmem:[#allocation2 + $0x7c] sm:$0xf] %v10714_v2  ;;  %v8188_v21 = vld [vmem:[%s10704_s4 + $0x10] ss:$8 sps:$4 sm:$0xff]   ;;  %5731 = vmatpush1.bf16.msra.mxu1 %v8205_v20 }
  0x29   : > { %471 = vst [vmem:[#allocation2 + $0x80] sm:$0x1] %v10714_v2  ;;  %472 = vst [vmem:[#allocation2 + $0x84] sm:$0xf] %v10714_v2  ;;  %v8209_v22 = vld [vmem:[%s10704_s4 + $0x234] ss:$8 sps:$4 sm:$0xff]  }
  0x2a   : > { %473 = vst [vmem:[#allocation2 + $0x88] sm:$0xf] %v10714_v2  ;;  %474 = vst [vmem:[#allocation2 + $0x8c] sm:$0x1] %v10714_v2  ;;  %7784 = vmatpush3.bf16.msra.mxu0 %v8165_v6  ;;  %v8196_v23 = vld [vmem:[%s10704_s4 + $0x24] ss:$8 sps:$4 sm:$0xff]   ;;  %5732 = vmatprep.subr.bf16.mxu1 %v8209_v22 }
  0x2b   : > { %475 = vst [vmem:[#allocation2 + $0x90] sm:$0xf] %v10714_v2  ;;  %476 = vst [vmem:[#allocation2 + $0x94] sm:$0xf] %v10714_v2  ;;  %7785 = vmatprep.subr.bf16.mxu0 %v8166_v7  ;;  %v8173_v25 = vld [vmem:[%s8755_s22 + $0x20] sm:$0xff]   ;;  %v8174_v33 = vld [vmem:[%s8755_s22 + $0x28] sm:$0xff]  }
  0x2c   : > { %477 = vst [vmem:[#allocation2 + $0x98] sm:$0x1] %v10714_v2  ;;  %478 = vst [vmem:[#allocation2 + $0x9c] sm:$0xf] %v10714_v2  ;;  %v8211_v26 = vld [vmem:[%s10704_s4 + $0x230] ss:$8 sps:$4 sm:$0xff]  }
  0x2d   : > { %479 = vst [vmem:[#allocation2 + $0xa0] sm:$0xf] %v10714_v2  ;;  %480 = vst [vmem:[#allocation2 + $0xa4] sm:$0x1] %v10714_v2  ;;  %v8194_v27 = vld [vmem:[%s10704_s4 + $0x20] ss:$8 sps:$4 sm:$0xff]   ;;  %5733 = vmatpush1.bf16.msra.mxu1 %v8211_v26 }
  0x2e   : > { %481 = vst [vmem:[#allocation2 + $0xa8] sm:$0xf] %v10714_v2  ;;  %482 = vst [vmem:[#allocation2 + $0xac] sm:$0xf] %v10714_v2  ;;  %7786 = vmatpush3.bf16.msra.mxu0 %v8166_v7  ;;  %v8202_v28 = vld [vmem:[%s10704_s4 + $0x34] ss:$8 sps:$4 sm:$0xff]  }
  0x2f   : > { %483 = vst [vmem:[#allocation2 + $0xb0] sm:$0x1] %v10714_v2  ;;  %484 = vst [vmem:[#allocation2 + $0xb4] sm:$0xf] %v10714_v2  ;;  %7787 = vmatprep.subr.bf16.mxu0 %v8167_v8  ;;  %v8215_v29 = vld [vmem:[%s10704_s4 + $0x244] ss:$8 sps:$4 sm:$0xff]  }
  0x30   : > { %485 = vst [vmem:[#allocation2 + $0xb8] sm:$0xf] %v10714_v2  ;;  %486 = vst [vmem:[#allocation2 + $0xbc] sm:$0x1] %v10714_v2  ;;  %v8217_v30 = vld [vmem:[%s10704_s4 + $0x240] ss:$8 sps:$4 sm:$0xff]   ;;  %5734 = vmatprep.subr.bf16.mxu1 %v8215_v29 }
  0x31   : > { %487 = vst [vmem:[#allocation2 + $0xc0] sm:$0xf] %v10714_v2  ;;  %488 = vst [vmem:[#allocation2 + $0xc4] sm:$0xf] %v10714_v2  ;;  %v8200_v31 = vld [vmem:[%s10704_s4 + $0x30] ss:$8 sps:$4 sm:$0xff]   ;;  %5735 = vmatpush1.bf16.msra.mxu1 %v8217_v30 }
  0x32   : > { %489 = vst [vmem:[#allocation2 + $0xc8] sm:$0x1] %v10714_v2  ;;  %490 = vst [vmem:[#allocation2 + $0xcc] sm:$0xf] %v10714_v2  ;;  %7788 = vmatpush3.bf16.msra.mxu0 %v8167_v8  ;;  %v8221_v32 = vld [vmem:[%s10704_s4 + $0x254] ss:$8 sps:$4 sm:$0xff]  }
  0x33   : > { %491 = vst [vmem:[#allocation2 + $0xd0] sm:$0xf] %v10714_v2  ;;  %492 = vst [vmem:[#allocation2 + $0xd4] sm:$0x1] %v10714_v2  ;;  %7789 = vmatprep.subr.bf16.mxu0 %v8168_v9  ;;  %v8208_v34 = vld [vmem:[%s10704_s4 + $0x44] ss:$8 sps:$4 sm:$0xff]   ;;  %5736 = vmatprep.subr.bf16.mxu1 %v8221_v32 }
  0x34   : > { %v8175_v35 = vld [vmem:[%s8755_s22 + $0x30] sm:$0xff]   ;;  %v8206_v36 = vld [vmem:[%s10704_s4 + $0x40] ss:$8 sps:$4 sm:$0xff]   ;;  %v8227_v39 = vld [vmem:[%s10704_s4 + $0x264] ss:$8 sps:$4 sm:$0xff]   ;;  %vm1383_vm7 = vcmask 1040384  }
  0x35   : > { %v8223_v37 = vld [vmem:[%s10704_s4 + $0x250] ss:$8 sps:$4 sm:$0xff]   ;;  %v8214_v38 = vld [vmem:[%s10704_s4 + $0x54] ss:$8 sps:$4 sm:$0xff]   ;;  %v8229_v40 = vld [vmem:[%s10704_s4 + $0x260] ss:$8 sps:$4 sm:$0xff]  }
  0x36   : > { %7790 = vmatpush3.bf16.msra.mxu0 %v8168_v9  ;;  %v8212_v41 = vld [vmem:[%s10704_s4 + $0x50] ss:$8 sps:$4 sm:$0xff]   ;;  %v8220_v42 = vld [vmem:[%s10704_s4 + $0x64] ss:$8 sps:$4 sm:$0xff]   ;;  %5737 = vmatpush1.bf16.msra.mxu1 %v8223_v37  ;;  %v8218_v45 = vld [vmem:[%s10704_s4 + $0x60] ss:$8 sps:$4 sm:$0xff]  }
  0x37   : > { %5340 = vmatprep.subr.bf16.mxu0 %v8187_v13  ;;  %v8176_v43 = vld [vmem:[%s8755_s22 + $0x38] sm:$0xff]   ;;  %5738 = vmatprep.subr.bf16.mxu1 %v8227_v39  ;;  %v8177_v44 = vld [vmem:[%s8755_s22 + $0x40] sm:$0xff]   ;;  %v8178_v49 = vld [vmem:[%s8755_s22 + $0x48] sm:$0xff]   ;;  %vm1685_vm0 = vsmask.f32 3328  ;;  %vm2248_vm11 = vcmask 1042432  }
  0x38   : > { %v8226_v46 = vld [vmem:[%s10704_s4 + $0x74] ss:$8 sps:$4 sm:$0xff]   ;;  %v8224_v47 = vld [vmem:[%s10704_s4 + $0x70] ss:$8 sps:$4 sm:$0xff]   ;;  %v8232_v48 = vld [vmem:[%s10704_s4 + $0x84] ss:$8 sps:$4 sm:$0xff]  }
  0x39   : > { %7792 = vmatmul.mubr.bf16.vlgmr.msra.gmra.mrb[0].mxu0 %v8170_v12  ;;  %v8179_v50 = vld [vmem:[%s8755_s22 + $0x50] sm:$0xff]   ;;  %v8230_v51 = vld [vmem:[%s10704_s4 + $0x80] ss:$8 sps:$4 sm:$0xff]   ;;  %v8180_v52 = vld [vmem:[%s8755_s22 + $0x58] sm:$0xff]   ;;  %vm1686_vm1 = vsmask.f32 7440 }
  0x3a   : > { %7795 = vmatprep.mubr.bf16.mxu0 %v8171_v14  ;;  %5341 = vmatpush1.bf16.msra.mxu0 %v8185_v17  ;;  %v8181_v53 = vld [vmem:[%s8755_s22 + $0x60] sm:$0xff]   ;;  %v8182_v54 = vld [vmem:[%s8755_s22 + $0x68] sm:$0xff]   ;;  %v8183_v55 = vld [vmem:[%s8755_s22 + $0x70] sm:$0xff]   ;;  %vm1377_vm4 = vsmask.f32 7938  ;;  %vm2249_vm12 = vcmask 1046532  }
  0x3b   : > { %5342 = vmatprep.subr.bf16.mxu0 %v8190_v18  ;;  %5739 = vmatpush1.bf16.msra.mxu1 %v8229_v40  ;;  %v8184_v56 = vld [vmem:[%s8755_s22 + $0x78] sm:$0xff]   ;;  %v8239_v61 = vld [vmem:[%s10704_s4 + $0x284] ss:$8 sps:$4 sm:$0xff]   ;;  %v8241_v62 = vld [vmem:[%s10704_s4 + $0x280] ss:$8 sps:$4 sm:$0xff]   ;;  %vm8564_vm14 = vmmov 0  }
  0x3c   : > { %v8233_v57 = vld [vmem:[%s10704_s4 + $0x274] ss:$8 sps:$4 sm:$0xff]   ;;  %v8235_v58 = vld [vmem:[%s10704_s4 + $0x270] ss:$8 sps:$4 sm:$0xff]   ;;  %v8244_v63 = vld [vmem:[%s10704_s4 + $0xa4] ss:$8 sps:$4 sm:$0xff]  }
  0x3d   : > { %v8238_v59 = vld [vmem:[%s10704_s4 + $0x94] ss:$8 sps:$4 sm:$0xff]   ;;  %5740 = vmatprep.subr.bf16.mxu1 %v8233_v57  ;;  %v8236_v60 = vld [vmem:[%s10704_s4 + $0x90] ss:$8 sps:$4 sm:$0xff]   ;;  %v8242_v0 = vld [vmem:[%s10704_s4 + $0xa0] ss:$8 sps:$4 sm:$0xff]  }
  0x3e   : > { %5343 = vmatpush1.bf16.msra.mxu0 %v8188_v21  ;;  %v8245_v1 = vld [vmem:[%s10704_s4 + $0x294] ss:$8 sps:$4 sm:$0xff]   ;;  %v8247_v3 = vld [vmem:[%s10704_s4 + $0x290] ss:$8 sps:$4 sm:$0xff]   ;;  %v8251_v6 = vld [vmem:[%s10704_s4 + $0x2a4] ss:$8 sps:$4 sm:$0xff]  }
  0x3f   : > { %5344 = vmatprep.subr.bf16.mxu0 %v8196_v23  ;;  %5741 = vmatpush1.bf16.msra.mxu1 %v8235_v58  ;;  %v8248_v4 = vld [vmem:[%s10704_s4 + $0xb0] ss:$8 sps:$4 sm:$0xff]   ;;  %v8250_v5 = vld [vmem:[%s10704_s4 + $0xb4] ss:$8 sps:$4 sm:$0xff]   ;;  %v8253_v7 = vld [vmem:[%s10704_s4 + $0x2a0] ss:$8 sps:$4 sm:$0xff]  }
  0x40   : > { %5742 = vmatprep.subr.bf16.mxu1 %v8239_v61  ;;  %v8256_v8 = vld [vmem:[%s10704_s4 + $0xc4] ss:$8 sps:$4 sm:$0xff]   ;;  %v8254_v9 = vld [vmem:[%s10704_s4 + $0xc0] ss:$8 sps:$4 sm:$0xff]   ;;  %v8257_v10 = vld [vmem:[%s10704_s4 + $0x2b4] ss:$8 sps:$4 sm:$0xff]  }
  0x41   : > { %7796 = vmatmul.mubr.bf16.gmra.mrb[4].mxu0 %v8172_v24  ;;  %v8259_v11 = vld [vmem:[%s10704_s4 + $0x2b0] ss:$8 sps:$4 sm:$0xff]   ;;  %v8262_v12 = vld [vmem:[%s10704_s4 + $0xd4] ss:$8 sps:$4 sm:$0xff]   ;;  %v1637_v14 = vld [vmem:[#allocation2] sm:$0xf] }
  0x42   : > { %7799 = vmatprep.mubr.bf16.mxu0 %v8173_v25  ;;  %5345 = vmatpush1.bf16.msra.mxu0 %v8194_v27  ;;  %v8260_v13 = vld [vmem:[%s10704_s4 + $0xd0] ss:$8 sps:$4 sm:$0xff]   ;;  %v1638_v15 = vld [vmem:[#allocation2 + $0x4] sm:$0xf]  ;;  %v1689_v16 = vshrl.u32 %v1637_v14, 16  ;;  %v1692_v17 = vshll.u32 %v1637_v14, 16  ;;  %vm8971_vm2 = vmor %vm1685_vm0, %vm1686_vm1 }
  0x43   : > { %5346 = vmatprep.subr.bf16.mxu0 %v8202_v28  ;;  %5743 = vmatpush1.bf16.msra.mxu1 %v8241_v62  ;;  %v1698_v18 = vshll.u32 %v1638_v15, 16  ;;  %v1702_v19 = vshrl.u32 %v1638_v15, 16  ;;  %v8263_v20 = vld [vmem:[%s10704_s4 + $0x2c4] ss:$8 sps:$4 sm:$0xff]   ;;  %v8265_v21 = vld [vmem:[%s10704_s4 + $0x2c0] ss:$8 sps:$4 sm:$0xff]   ;;  %vm9014_vm8 = vmand %vm1376_vm3, %vm1377_vm4 }
  0x44   : > { %5744 = vmatprep.subr.bf16.mxu1 %v8245_v1  ;;  %v8268_v22 = vld [vmem:[%s10704_s4 + $0xe4] ss:$8 sps:$4 sm:$0xff]   ;;  %v1691_v23 = vrot.slane %v1689_v16, 4  ;;  %v1694_v24 = vrot.slane %v1692_v17, 5  ;;  %v8266_v25 = vld [vmem:[%s10704_s4 + $0xe0] ss:$8 sps:$4 sm:$0xff]   ;;  %vm9083_vm13 = vmor %vm2248_vm11, %vm2249_vm12 }
  0x45   : > { %v1639_v26 = vld [vmem:[#allocation2 + $0x8] sm:$0x1]  ;;  %v1700_v27 = vrot.slane %v1698_v18, 5  ;;  %v1704_v28 = vrot.slane %v1702_v19, 4  ;;  %v8269_v29 = vld [vmem:[%s10704_s4 + $0x2d4] ss:$8 sps:$4 sm:$0xff]  }
  0x46   : > { %5347 = vmatpush1.bf16.msra.mxu0 %v8200_v31  ;;  %v1695_v30 = vor.u32 %v1694_v24, %v1691_v23  ;;  %v1708_v32 = vshll.u32 %v1639_v26, 16  ;;  %vm1052_vm5 = vsmask.f32 256  ;;  %vm1053_vm6 = vsmask.f32 4368  ;;  %s431_s21 = sand.u32 1, %s8552_s26  }
  0x47   : > { %5348 = vmatprep.subr.bf16.mxu0 %v8208_v34  ;;  %5745 = vmatpush1.bf16.msra.mxu1 %v8247_v3  ;;  %v1705_v31 = vor.u32 %v1704_v28, %v1700_v27  ;;  %v8274_v34 = vld [vmem:[%s10704_s4 + $0xf4] ss:$8 sps:$4 sm:$0xff]   ;;  %v1388_v23 = vld [vmem:[#allocation2 + $0x18] sm:$0xf]  ;;  %vm9021_vm9 = vmor %vm1052_vm5, %vm1053_vm6  ;;  %s7697_s30 = sshll.u32 %s8657_s29, 4  ;;  %s432_s0 = scalar_lea.vmem [#allocation4], %s431_s21 }
  0x48   : > { %5746 = vmatprep.subr.bf16.mxu1 %v8251_v6  ;;  %v1710_v40 = vrot.slane %v1708_v32, 5  ;;  %vm9027_vm10 = vmand %vm1383_vm7, %vm1052_vm5  ;;  %s7210_s15 = sshll.u32 %s432_s0, 4  ;;  %s10658_s17 = scalar_lea.hbm %s10713_s13, %s7697_s30  ;;  %s10660_s15 = int_to_ptr.vmem [resolvable:$true] %s7210_s15 }
  0x49   : > { %7800 = vmatmul.mubr.bf16.gmra.mrb[8].mxu0 %v8174_v33  ;;  %v8271_v33 = vld [vmem:[%s10704_s4 + $0x2d0] ss:$8 sps:$4 sm:$0xff]   ;;  %v1706_v39 = vrot.slane %v1705_v31, 4  ;;  %s7198_s20 = scalar_lea.sflag [#allocation5], %s431_s21  ;;  %s8498_s29 = scalar_lea.vmem %s10660_s15, 16 }
  0x4a   : > { %7803 = vmatprep.mubr.bf16.mxu0 %v8175_v35  ;;  %5349 = vmatpush1.bf16.msra.mxu0 %v8206_v36  ;;  %v8272_v35 = vld [vmem:[%s10704_s4 + $0xf0] ss:$8 sps:$4 sm:$0xff]   ;;  %v8275_v36 = vld [vmem:[%s10704_s4 + $0x2e4] ss:$8 sps:$4 sm:$0xff]   ;;  %p8499_p11 = scmp.ne.s32.totalorder %s10660_s15, %s8498_s29  ;;  %s8565_s23 = smov [#allocation4]  }
  0x4b   : > { %5350 = vmatprep.subr.bf16.mxu0 %v8214_v38  ;;  %5747 = vmatpush1.bf16.msra.mxu1 %v8253_v7  ;;  %v1696_v38 = vrot.slane %v1695_v30, 4  ;;  %v1379_v30 = vld [vmem:[#allocation2 + $0xc] sm:$0xf]  ;;  %s8502_s22 = sshll.u32 %s8565_s23, 4  ;;  %s8503_s22 = int_to_ptr.vmem [resolvable:$false] %s8502_s22 }
  0x4c   : > { %5748 = vmatprep.subr.bf16.mxu1 %v8257_v10  ;;  %p8500_p12 = pnand %p8499_p11, %p8674_p5  ;;  %s8504_s24 = scalar_lea.vmem %s8503_s22, 32 }
  0x4d   : > { %p8505_p0 = scmp.lt.s32.totalorder %s10660_s15, %s8503_s22  ;;  %p8506_p1 = scmp.lt.s32.totalorder %s8504_s24, %s8498_s29 }
  0x4e   : > { %5351 = vmatpush1.bf16.msra.mxu0 %v8212_v41  ;;  %v8277_v41 = vld [vmem:[%s10704_s4 + $0x2e0] ss:$8 sps:$4 sm:$0xff]   ;;  %p8501_p13 = pneg %p8500_p12 }
  0x4f   : > { %5352 = vmatprep.subr.bf16.mxu0 %v8220_v42  ;;  %5749 = vmatpush1.bf16.msra.mxu1 %v8259_v11  ;;  %v1701_v42 = vsel %vm8971_vm2, %v1696_v38, %v1700_v27  ;;  %v1392_v38 = vld [vmem:[#allocation2 + $0x20] sm:$0x1]  ;;  %p8507_p2 = por %p8506_p1, %p8505_p0 }
  0x50   : > { %5750 = vmatprep.subr.bf16.mxu1 %v8263_v20 }
  0x51   : > { %7804 = vmatmul.mubr.bf16.gmra.mrb[12].mxu0 %v8176_v43  ;;  %v1711_v43 = vsel %vm8971_vm2, %v1706_v39, %v1710_v40  ;;  %p8508_p3 = pnand %p8507_p2, %p8501_p13 }
  0x52   : > { %7807 = vmatprep.mubr.bf16.mxu0 %v8177_v44  ;;  %5353 = vmatpush1.bf16.msra.mxu0 %v8218_v45  ;;  %v8278_v44 = vld [vmem:[#allocation2] sm:$0xff]   ;;  %v7345_v45 = vcombine.low %v1701_v42, %v1711_v43 }
  0x53   : > { %5354 = vmatprep.subr.bf16.mxu0 %v8226_v46  ;;  %5751 = vmatpush1.bf16.msra.mxu1 %v8265_v21  ;;  %v8279_v46 = vld [vmem:[%s10704_s4 + $0x2f4] ss:$8 sps:$4 sm:$0xff]  }
  0x54   : > { %5752 = vmatprep.subr.bf16.mxu1 %v8269_v29 }
  0x56   : > { %5355 = vmatpush1.bf16.msra.mxu0 %v8224_v47  ;;  %v8281_v47 = vld [vmem:[%s10704_s4 + $0x2f0] ss:$8 sps:$4 sm:$0xff]  }
  0x57   : > { %5356 = vmatprep.subr.bf16.mxu0 %v8232_v48  ;;  %5753 = vmatpush1.bf16.msra.mxu1 %v8271_v33  ;;  %v8284_v48 = vld [vmem:[%s10704_s4 + $0x304] ss:$8 sps:$4 sm:$0xff]  }
  0x58   : > { %5754 = vmatprep.subr.bf16.mxu1 %v8275_v36 }
  0x59   : > { %7808 = vmatmul.mubr.bf16.gmra.mrb[16].mxu0 %v8178_v49  ;;  %v8994_v49 = vld [vmem:[%s10702_s2] ss:$0 sm:$0xff] }
  0x5a   : > { %7811 = vmatprep.mubr.bf16.mxu0 %v8179_v50  ;;  %5357 = vmatpush1.bf16.msra.mxu0 %v8230_v51  ;;  %v8999_v51 = vld [vmem:[%s10703_s3] ss:$0 sm:$0xff] }
  0x5b   : > { %5358 = vmatprep.subr.bf16.mxu0 %v8238_v59  ;;  %5755 = vmatpush1.bf16.msra.mxu1 %v8277_v41 }
  0x5c   : > { %5756 = vmatprep.subr.bf16.mxu1 %v8279_v46 }
  0x5e   : > { %5359 = vmatpush1.bf16.msra.mxu0 %v8236_v60 }
  0x5f   : > { %5360 = vmatprep.subr.bf16.mxu0 %v8244_v63  ;;  %5757 = vmatpush1.bf16.msra.mxu1 %v8281_v47 }
  0x60   : > { %5919 = vmatprep.subr.bf16.mxu1 %v8284_v48 }
  0x61   : > { %7812 = vmatmul.mubr.bf16.gmra.mrb[20].mxu0 %v8180_v52 }
  0x62   : > { %7815 = vmatprep.mubr.bf16.mxu0 %v8181_v53  ;;  %5361 = vmatpush1.bf16.msra.mxu0 %v8242_v0 }
  0x63   : > { %5362 = vmatprep.subr.bf16.mxu0 %v8250_v5 }
  0x66   : > { %5363 = vmatpush1.bf16.msra.mxu0 %v8248_v4 }
  0x67   : > { %5364 = vmatprep.subr.bf16.mxu0 %v8256_v8 }
  0x69   : > { %7816 = vmatmul.mubr.bf16.gmra.mrb[24].mxu0 %v8182_v54 }
  0x6a   : > { %7819 = vmatprep.mubr.bf16.mxu0 %v8183_v55  ;;  %5365 = vmatpush1.bf16.msra.mxu0 %v8254_v9 }
  0x6b   : > { %5366 = vmatprep.subr.bf16.mxu0 %v8262_v12 }
  0x6e   : > { %5367 = vmatpush1.bf16.msra.mxu0 %v8260_v13 }
  0x6f   : > { %5368 = vmatprep.subr.bf16.mxu0 %v8268_v22 }
  0x71   : > { %7820 = vmatmul.mubr.bf16.gmra.mrb[28].mxu0 %v8184_v56 }
  0x72   : > { %5369 = vmatpush1.bf16.msra.mxu0 %v8266_v25  ;;  %5372 = vmatprep.mubr.bf16.mxu0 %v7345_v45 }
  0x73   : > { %5370 = vmatprep.subr.bf16.mxu0 %v8274_v34 }
  0x76   : > { %5371 = vmatpush1.bf16.msra.mxu0 %v8272_v35 }
  0x79   : > { %5373 = vmatmul.mubr.bf16.vlgmr.msra.gmra.mrb[32].mxu0 %v8278_v44  ;;  %v1385_v44 = vld [vmem:[#allocation2 + $0x14] sm:$0x1] }
 0x10c   : > { %v7793_v50 = vpop.f32.mrb[0].mxu0 }
 0x10d   : > { %v855_v52 = vmul.f32 %v7793_v50, %v8994_v49  ;;  %v719_v53 = vpop.f32.mrb[1].mxu0 }
 0x10e   : > { %v853_v54 = vmul.f32 %v8994_v49, %v719_v53  ;;  %v7794_v55 = vpop.f32.mrb[2].mxu0 }
 0x10f   : > { %v894_v56 = vadd.f32 %v8999_v51, %v855_v52  ;;  %v856_v57 = vmul.f32 %v7794_v55, %v8994_v49  ;;  %v722_v58 = vpop.f32.mrb[3].mxu0 }
 0x110   : > { %v892_v59 = vadd.f32 %v8999_v51, %v853_v54  ;;  %v854_v60 = vmul.f32 %v8994_v49, %v722_v58 }
 0x111   : > { %v926_v61 = vmax.f32 %v894_v56, 0.0  ;;  %v895_v62 = vadd.f32 %v8999_v51, %v856_v57 }
 0x112   : > { %v924_v63 = vmax.f32 %v892_v59, 0.0  ;;  %v893_v0 = vadd.f32 %v8999_v51, %v854_v60 }
 0x113   : > { %v7703_v1 = vpack.c.bf16 %v926_v61, %v926_v61  ;;  %v927_v3 = vmax.f32 %v895_v62, 0.0 }
 0x114   : > { %v7701_v4 = vpack.c.bf16 %v924_v63, %v924_v63  ;;  %v925_v5 = vmax.f32 %v893_v0, 0.0  ;;  %v7797_v6 = vpop.f32.mrb[4].mxu0 }
 0x115   : > { %v1073_v7 = vshrl.u32 %v7703_v1, 16  ;;  %v1076_v8 = vshll.u32 %v7703_v1, 16  ;;  %v7704_v9 = vpack.c.bf16 %v927_v3, %v927_v3  ;;  %v859_v10 = vmul.f32 %v7797_v6, %v8994_v49  ;;  %v735_v11 = vpop.f32.mrb[5].mxu0 }
 0x116   : > { %v1056_v12 = vshrl.u32 %v7701_v4, 16  ;;  %v1059_v13 = vshll.u32 %v7701_v4, 16  ;;  %v7702_v14 = vpack.c.bf16 %v925_v5, %v925_v5  ;;  %v857_v15 = vmul.f32 %v8994_v49, %v735_v11  ;;  %v7798_v16 = vpop.f32.mrb[6].mxu0  ;;  %v1402_v5 = vld [vmem:[#allocation2 + $0x30] sm:$0xf] }
 0x117   : > { %v1075_v17 = vrot.slane %v1073_v7, 7  ;;  %v1081_v18 = vshrl.u32 %v7704_v9, 16  ;;  %v1084_v19 = vshll.u32 %v7704_v9, 16  ;;  %v898_v20 = vadd.f32 %v8999_v51, %v859_v10  ;;  %v738_v21 = vpop.f32.mrb[7].mxu0 }
 0x118   : > { %v1058_v24 = vrot.slane %v1056_v12, 7  ;;  %v1064_v25 = vshrl.u32 %v7702_v14, 16  ;;  %v1067_v26 = vshll.u32 %v7702_v14, 16  ;;  %v896_v27 = vadd.f32 %v8999_v51, %v857_v15  ;;  %v1395_v12 = vld [vmem:[#allocation2 + $0x24] sm:$0xf] }
 0x119   : > { %v1078_v28 = vor.u32 %v1076_v8, %v1075_v17  ;;  %v1079_v29 = vrot.slane %v1075_v17, 4  ;;  %v1083_v32 = vrot.slane %v1081_v18, 7  ;;  %v930_v33 = vmax.f32 %v898_v20, 0.0 }
 0x11a   : > { %v1061_v34 = vor.u32 %v1059_v13, %v1058_v24  ;;  %v1062_v35 = vrot.slane %v1058_v24, 4  ;;  %v1066_v39 = vrot.slane %v1064_v25, 7  ;;  %v928_v40 = vmax.f32 %v896_v27, 0.0 }
 0x11b   : > { %v1389_v41 = vsel %vm9014_vm8, %v1078_v28, %v1388_v23  ;;  %v1086_v42 = vor.u32 %v1084_v19, %v1083_v32  ;;  %v1088_v43 = vrot.slane %v1083_v32, 4  ;;  %v7707_v45 = vpack.c.bf16 %v930_v33, %v930_v33 }
 0x11c   : > { %1390 = vst [vmem:[#allocation2 + $0x18] sm:$0xf] %v1389_v41  ;;  %v1380_v46 = vsel %vm9014_vm8, %v1061_v34, %v1379_v30  ;;  %v1069_v47 = vor.u32 %v1067_v26, %v1066_v39  ;;  %v1071_v48 = vrot.slane %v1066_v39, 4  ;;  %v7705_v50 = vpack.c.bf16 %v928_v40, %v928_v40  ;;  %v7801_v52 = vpop.f32.mrb[8].mxu0 }
 0x11d   : > { %1381 = vst [vmem:[#allocation2 + $0xc] sm:$0xf] %v1380_v46  ;;  %v1087_v53 = vsel %vm9021_vm9, %v1079_v29, %v1086_v42  ;;  %v1393_v54 = vsel %vm9027_vm10, %v1088_v43, %v1392_v38  ;;  %v1107_v55 = vshrl.u32 %v7707_v45, 16  ;;  %v1110_v56 = vshll.u32 %v7707_v45, 16  ;;  %v751_v57 = vpop.f32.mrb[9].mxu0 }
 0x11e   : > { %1391 = vst [vmem:[#allocation2 + $0x1c] sm:$0xf] %v1087_v53  ;;  %1394 = vst [vmem:[#allocation2 + $0x20] sm:$0x1] %v1393_v54  ;;  %v1070_v58 = vsel %vm9021_vm9, %v1062_v35, %v1069_v47  ;;  %v1386_v59 = vsel %vm9027_vm10, %v1071_v48, %v1385_v44  ;;  %v1090_v60 = vshrl.u32 %v7705_v50, 16  ;;  %v1093_v61 = vshll.u32 %v7705_v50, 16 }
 0x11f   : > { %v7802_v62 = vpop.f32.mrb[10].mxu0  ;;  %1382 = vst [vmem:[#allocation2 + $0x10] sm:$0xf] %v1070_v58  ;;  %1387 = vst [vmem:[#allocation2 + $0x14] sm:$0x1] %v1386_v59  ;;  %v9043_v63 = vrot.slane %v1107_v55, 7  ;;  %v860_v0 = vmul.f32 %v7798_v16, %v8994_v49  ;;  %v858_v1 = vmul.f32 %v8994_v49, %v738_v21  ;;  %v863_v3 = vmul.f32 %v7801_v52, %v8994_v49 }
 0x120   : > { %v754_v4 = vpop.f32.mrb[11].mxu0  ;;  %v9048_v6 = vrot.slane %v1090_v60, 7  ;;  %v861_v7 = vmul.f32 %v8994_v49, %v751_v57  ;;  %v864_v8 = vmul.f32 %v7802_v62, %v8994_v49  ;;  %v1406_v48 = vld [vmem:[#allocation2 + $0x38] sm:$0x1]  ;;  %v1399_v50 = vld [vmem:[#allocation2 + $0x2c] sm:$0x1] }
 0x121   : > { %v862_v9 = vmul.f32 %v8994_v49, %v754_v4  ;;  %v1112_v10 = vor.u32 %v1110_v56, %v9043_v63  ;;  %v1113_v11 = vrot.slane %v9043_v63, 4  ;;  %v899_v13 = vadd.f32 %v8999_v51, %v860_v0  ;;  %v1416_v58 = vld [vmem:[#allocation2 + $0x48] sm:$0xf]  ;;  %v1409_v59 = vld [vmem:[#allocation2 + $0x3c] sm:$0xf] }
 0x122   : > { %v897_v14 = vadd.f32 %v8999_v51, %v858_v1  ;;  %v1095_v15 = vor.u32 %v1093_v61, %v9048_v6  ;;  %v1096_v16 = vrot.slane %v9048_v6, 4  ;;  %v902_v17 = vadd.f32 %v8999_v51, %v863_v3 }
 0x123   : > { %v900_v18 = vadd.f32 %v8999_v51, %v861_v7  ;;  %v1403_v19 = vsel %vm9014_vm8, %v1112_v10, %v1402_v5  ;;  %v931_v20 = vmax.f32 %v899_v13, 0.0  ;;  %v903_v23 = vadd.f32 %v8999_v51, %v864_v8 }
 0x124   : > { %v929_v21 = vmax.f32 %v897_v14, 0.0  ;;  %1404 = vst [vmem:[#allocation2 + $0x30] sm:$0xf] %v1403_v19  ;;  %v1396_v24 = vsel %vm9014_vm8, %v1095_v15, %v1395_v12  ;;  %v934_v25 = vmax.f32 %v902_v17, 0.0  ;;  %v901_v27 = vadd.f32 %v8999_v51, %v862_v9  ;;  %v9067_v28 = vld [vmem:[#allocation2 + $0xc] sm:$0xe] }
 0x125   : > { %v932_v26 = vmax.f32 %v900_v18, 0.0  ;;  %v9069_v29 = vld [vmem:[#allocation2 + $0xc] sm:$0xf]  ;;  %1397 = vst [vmem:[#allocation2 + $0x24] sm:$0xf] %v1396_v24  ;;  %v7708_v30 = vpack.c.bf16 %v931_v20, %v931_v20  ;;  %v935_v33 = vmax.f32 %v903_v23, 0.0 }
 0x126   : > { %v7706_v32 = vpack.c.bf16 %v929_v21, %v929_v21  ;;  %v7425_v34 = vrot.slane %v9067_v28, 9  ;;  %v9072_v35 = vpop.f32.mrb[12].mxu0  ;;  %v7711_v38 = vpack.c.bf16 %v934_v25, %v934_v25  ;;  %v933_v40 = vmax.f32 %v901_v27, 0.0  ;;  %v3100_v41 = vld [vmem:[#allocation2 + $0x10] sm:$0xf] }
 0x127   : > { %v7709_v39 = vpack.c.bf16 %v932_v26, %v932_v26  ;;  %v1713_v42 = vshrl.u32 %v9069_v29, 16  ;;  %v1115_v43 = vshrl.u32 %v7708_v30, 16  ;;  %v1118_v44 = vshll.u32 %v7708_v30, 16  ;;  %v3101_v47 = vld [vmem:[#allocation2 + $0x14] sm:$0x1]  ;;  %v9077_v8 = vpop.f32.mrb[13].mxu0 }
 0x128   : > { %v1098_v45 = vshrl.u32 %v7706_v32, 16  ;;  %v1101_v46 = vshll.u32 %v7706_v32, 16  ;;  %v1141_v52 = vshrl.u32 %v7711_v38, 16  ;;  %v1144_v53 = vshll.u32 %v7711_v38, 16  ;;  %v1641_v20 = vld [vmem:[#allocation2 + $0x10] sm:$0xf] }
 0x129   : > { %v1124_v54 = vshrl.u32 %v7709_v39, 16  ;;  %v1127_v55 = vshll.u32 %v7709_v39, 16  ;;  %v1117_v56 = vrot.slane %v1115_v43, 7  ;;  %v7712_v60 = vpack.c.bf16 %v935_v33, %v935_v33  ;;  %v9097_v21 = vpop.f32.mrb[14].mxu0  ;;  %v1642_v25 = vld [vmem:[#allocation2 + $0x14] sm:$0x1] }
 0x12a   : > { %v1100_v57 = vrot.slane %v1098_v45, 7  ;;  %v7710_v61 = vpack.c.bf16 %v933_v40, %v933_v40  ;;  %v1143_v62 = vrot.slane %v1141_v52, 7  ;;  %v3197_v1 = vrot.slane %v3100_v41, 5  ;;  %v1420_v26 = vld [vmem:[#allocation2 + $0x50] sm:$0x1] }
 0x12b   : > { %v9075_v0 = vrot.slane %v1124_v54, 7  ;;  %v3200_v3 = vrot.slane %v3101_v47, 5  ;;  %v1120_v4 = vor.u32 %v1118_v44, %v1117_v56  ;;  %v1122_v5 = vrot.slane %v1117_v56, 4  ;;  %v1413_v39 = vld [vmem:[#allocation2 + $0x44] sm:$0x1] }
 0x12c   : > { %v1103_v6 = vor.u32 %v1101_v46, %v1100_v57  ;;  %v1105_v7 = vrot.slane %v1100_v57, 4  ;;  %v1146_v9 = vor.u32 %v1144_v53, %v1143_v62  ;;  %v1147_v10 = vrot.slane %v1143_v62, 4  ;;  %v2587_v54 = vld [vmem:[#allocation2 + $0xc] sm:$0xf] }
 0x12d   : > { %v1129_v12 = vor.u32 %v1127_v55, %v9075_v0  ;;  %v1130_v13 = vrot.slane %v9075_v0, 4  ;;  %v1121_v15 = vsel %vm9021_vm9, %v1113_v11, %v1120_v4  ;;  %v1407_v17 = vsel %vm9027_vm10, %v1122_v5, %v1406_v48  ;;  %v2589_v0 = vld [vmem:[#allocation2 + $0x14] sm:$0x1] }
 0x12e   : > { %v1104_v18 = vsel %vm9021_vm9, %v1096_v16, %v1103_v6  ;;  %v1400_v19 = vsel %vm9027_vm10, %v1105_v7, %v1399_v50  ;;  %1405 = vst [vmem:[#allocation2 + $0x34] sm:$0xf] %v1121_v15  ;;  %1408 = vst [vmem:[#allocation2 + $0x38] sm:$0x1] %v1407_v17  ;;  %v1417_v63 = vsel %vm9014_vm8, %v1146_v9, %v1416_v58  ;;  %v1149_v23 = vshrl.u32 %v7712_v60, 16  ;;  %v9103_v16 = vpop.f32.mrb[15].mxu0 }
 0x12f   : > { %1398 = vst [vmem:[#allocation2 + $0x28] sm:$0xf] %v1104_v18  ;;  %1401 = vst [vmem:[#allocation2 + $0x2c] sm:$0x1] %v1400_v19  ;;  %v1410_v11 = vsel %vm9014_vm8, %v1129_v12, %v1409_v59  ;;  %v1152_v24 = vshll.u32 %v7712_v60, 16  ;;  %v1132_v27 = vshrl.u32 %v7710_v61, 16  ;;  %v3198_v30 = vsel %vm9083_vm13, %v7425_v34, %v3197_v1 }
 0x130   : > { %1418 = vst [vmem:[#allocation2 + $0x48] sm:$0xf] %v1417_v63  ;;  %1411 = vst [vmem:[#allocation2 + $0x3c] sm:$0xf] %v1410_v11  ;;  %v1135_v28 = vshll.u32 %v7710_v61, 16  ;;  %v3199_v32 = vrot.slane %v3197_v1, 4  ;;  %v867_v63 = vmul.f32 %v9072_v35, %v8994_v49 }
 0x131   : > { %v9107_v33 = vpop.f32.mrb[16].mxu0  ;;  %v1151_v38 = vrot.slane %v1149_v23, 7  ;;  %v1715_v40 = vrot.slane %v1713_v42, 4  ;;  %v1716_v41 = vshll.u32 %v9069_v29, 16  ;;  %v1722_v43 = vshll.u32 %v1641_v20, 16 }
 0x132   : > { %v1134_v44 = vrot.slane %v1132_v27, 7  ;;  %v3201_v45 = vsel %vm9083_vm13, %v3199_v32, %v3200_v3  ;;  %v1726_v46 = vshrl.u32 %v1641_v20, 16  ;;  %v1732_v47 = vshll.u32 %v1642_v25, 16  ;;  %v9112_v48 = vpop.f32.mrb[17].mxu0  ;;  %v2588_v58 = vld [vmem:[#allocation2 + $0x10] sm:$0xf] }
 0x133   : > { %v1154_v50 = vor.u32 %v1152_v24, %v1151_v38  ;;  %v1156_v52 = vrot.slane %v1151_v38, 4  ;;  %v7441_v34 = vcombine.low %v3198_v30, %v3201_v45  ;;  %v1718_v53 = vrot.slane %v1716_v41, 5  ;;  %v9114_v29 = vpop.f32.mrb[18].mxu0  ;;  %v3102_v7 = vld [vmem:[#allocation2 + $0x18] sm:$0xe]  ;;  %v8285_v41 = vld [vmem:[#allocation2 + $0xc] sm:$0xff]  }
 0x134   : > { %v1137_v55 = vor.u32 %v1135_v28, %v1134_v44  ;;  %v1139_v56 = vrot.slane %v1134_v44, 4  ;;  %v1724_v57 = vrot.slane %v1722_v43, 5  ;;  %v1728_v42 = vrot.slane %v1726_v46, 4  ;;  %v9120_v1 = vpop.f32.mrb[19].mxu0  ;;  %v1643_v17 = vld [vmem:[#allocation2 + $0x18] sm:$0xf] }
 0x135   : > { %v1155_v59 = vsel %vm9021_vm9, %v1147_v10, %v1154_v50  ;;  %v1421_v60 = vsel %vm9027_vm10, %v1156_v52, %v1420_v26  ;;  %5758 = vmatprep.mubr.bf16.mxu1 %v7441_v34  ;;  %v1719_v61 = vor.u32 %v1718_v53, %v1715_v40  ;;  %v1734_v62 = vrot.slane %v1732_v47, 5  ;;  %v3104_v26 = vld [vmem:[#allocation2 + $0x20] sm:$0x1]  ;;  %v9130_v27 = vpop.f32.mrb[20].mxu0  ;;  %v1644_v50 = vld [vmem:[#allocation2 + $0x1c] sm:$0xf] }
 0x136   : > { %1419 = vst [vmem:[#allocation2 + $0x4c] sm:$0xf] %v1155_v59  ;;  %1422 = vst [vmem:[#allocation2 + $0x50] sm:$0x1] %v1421_v60  ;;  %v1138_v3 = vsel %vm9021_vm9, %v1130_v13, %v1137_v55  ;;  %v1414_v4 = vsel %vm9027_vm10, %v1139_v56, %v1413_v39  ;;  %v1729_v5 = vor.u32 %v1728_v42, %v1724_v57  ;;  %v2636_v6 = vshrl.u32 %v2587_v54, 16  ;;  %v9135_v44 = vpop.f32.mrb[21].mxu0 }
 0x137   : > { %1412 = vst [vmem:[#allocation2 + $0x40] sm:$0xf] %v1138_v3  ;;  %1415 = vst [vmem:[#allocation2 + $0x44] sm:$0x1] %v1414_v4  ;;  %v1720_v9 = vrot.slane %v1719_v61, 4  ;;  %v2639_v10 = vshll.u32 %v2587_v54, 16  ;;  %v906_v32 = vadd.f32 %v8999_v51, %v867_v63  ;;  %v865_v47 = vmul.f32 %v8994_v49, %v9077_v8 }
 0x138   : > { %v2645_v12 = vshll.u32 %v2588_v58, 16  ;;  %v2649_v15 = vshrl.u32 %v2588_v58, 16  ;;  %v1730_v18 = vrot.slane %v1729_v5, 4  ;;  %v2638_v19 = vrot.slane %v2636_v6, 4  ;;  %v3103_v13 = vld [vmem:[#allocation2 + $0x1c] sm:$0xf] }
 0x139   : > { %v2655_v20 = vshll.u32 %v2589_v0, 16  ;;  %v1725_v11 = vsel %vm8971_vm2, %v1720_v9, %v1724_v57  ;;  %v2641_v23 = vrot.slane %v2639_v10, 5  ;;  %v7426_v38 = vrot.slane %v3102_v7, 9  ;;  %v9139_v34 = vpop.f32.mrb[22].mxu0  ;;  %v8282_v42 = vld [vmem:[%s10704_s4 + $0x300] ss:$8 sps:$4 sm:$0xff]  }
 0x13a   : > { %v2647_v24 = vrot.slane %v2645_v12, 5  ;;  %v2651_v25 = vrot.slane %v2649_v15, 4  ;;  %v1735_v28 = vsel %vm8971_vm2, %v1730_v18, %v1734_v62  ;;  %v3204_v43 = vrot.slane %v3103_v13, 5  ;;  %v9143_v57 = vpop.f32.mrb[23].mxu0  ;;  %v1645_v3 = vld [vmem:[#allocation2 + $0x20] sm:$0x1] }
 0x13b   : > { %v2657_v30 = vrot.slane %v2655_v20, 5  ;;  %v7346_v39 = vcombine.low %v1725_v11, %v1735_v28  ;;  %v2642_v40 = vor.u32 %v2641_v23, %v2638_v19  ;;  %v938_v45 = vmax.f32 %v906_v32, 0.0  ;;  %v8288_v5 = vld [vmem:[%s10704_s4 + $0x314] ss:$8 sps:$4 sm:$0xff]   ;;  %v2590_v12 = vld [vmem:[#allocation2 + $0x18] sm:$0xf] }
 0x13c   : > { %v2652_v35 = vor.u32 %v2651_v25, %v2647_v24  ;;  %v3207_v46 = vrot.slane %v3104_v26, 5  ;;  %v1737_v52 = vshrl.u32 %v1643_v17, 16  ;;  %v3205_v55 = vsel %vm9083_vm13, %v7426_v38, %v3204_v43  ;;  %v1430_v23 = vld [vmem:[#allocation2 + $0x60] sm:$0xf]  ;;  %v8286_v28 = vld [vmem:[%s10704_s4 + $0x310] ss:$8 sps:$4 sm:$0xff]  }
 0x13d   : > { %5382 = vmatprep.mubr.bf16.mxu0 %v7346_v39  ;;  %v2643_v53 = vrot.slane %v2642_v40, 4  ;;  %v3206_v56 = vrot.slane %v3204_v43, 4  ;;  %v7715_v58 = vpack.c.bf16 %v938_v45, %v938_v45  ;;  %v904_v8 = vadd.f32 %v8999_v51, %v865_v47  ;;  %v2591_v45 = vld [vmem:[#allocation2 + $0x1c] sm:$0xf]  ;;  %v1423_v47 = vld [vmem:[#allocation2 + $0x54] sm:$0xf] }
 0x13e   : > { %v2653_v54 = vrot.slane %v2652_v35, 4  ;;  %5383 = vmatmul.mubr.bf16.gmra.mrb[36].mxu0 %v8285_v41  ;;  %v1739_v59 = vrot.slane %v1737_v52, 4  ;;  %v1740_v60 = vshll.u32 %v1643_v17, 16  ;;  %v1746_v4 = vshll.u32 %v1644_v50, 16 }
 0x13f   : > { %v2648_v61 = vsel %vm8971_vm2, %v2643_v53, %v2647_v24  ;;  %v3208_v0 = vsel %vm9083_vm13, %v3206_v56, %v3207_v46  ;;  %v1175_v7 = vshrl.u32 %v7715_v58, 16  ;;  %v1178_v9 = vshll.u32 %v7715_v58, 16 }
 0x140   : > { %v2658_v62 = vsel %vm8971_vm2, %v2653_v54, %v2657_v30  ;;  %v7442_v10 = vcombine.low %v3205_v55, %v3208_v0  ;;  %v936_v15 = vmax.f32 %v904_v8, 0.0  ;;  %v1742_v17 = vrot.slane %v1740_v60, 5  ;;  %v8290_v54 = vld [vmem:[%s10704_s4 + $0x320] ss:$8 sps:$4 sm:$0xff]   ;;  %v8296_v55 = vld [vmem:[%s10704_s4 + $0x334] ss:$8 sps:$4 sm:$0xff]  }
 0x141   : > { %v7409_v6 = vcombine.low %v2648_v61, %v2658_v62  ;;  %v1748_v18 = vrot.slane %v1746_v4, 5  ;;  %v1750_v19 = vshrl.u32 %v1644_v50, 16  ;;  %v9158_v20 = vrot.slane %v1175_v7, 7  ;;  %v2592_v7 = vld [vmem:[#allocation2 + $0x20] sm:$0x1] }
 0x142   : > { %v1756_v63 = vshll.u32 %v1645_v3, 16  ;;  %v868_v13 = vmul.f32 %v9097_v21, %v8994_v49  ;;  %v866_v11 = vmul.f32 %v8994_v49, %v9103_v16  ;;  %v7713_v24 = vpack.c.bf16 %v936_v15, %v936_v15  ;;  %v8292_v16 = vld [vmem:[%s10704_s4 + $0x324] ss:$8 sps:$4 sm:$0xff]  }
 0x143   : > { %5759 = vmatmul.mubr.bf16.vlgmr.msra.gmra.mrb[0].mxu1 %v7409_v6  ;;  %v1743_v25 = vor.u32 %v1742_v17, %v1739_v59  ;;  %v1752_v26 = vrot.slane %v1750_v19, 4  ;;  %v2660_v30 = vshrl.u32 %v2590_v12, 16  ;;  %v1180_v32 = vor.u32 %v1178_v9, %v9158_v20  ;;  %v9186_v59 = vpop.f32.mrb[24].mxu0  ;;  %v3105_v19 = vld [vmem:[#allocation2 + $0x24] sm:$0xe] }
 0x144   : > { %5920 = vmatpush1.bf16.msra.mxu1 %v8282_v42  ;;  %5768 = vmatprep.mubr.bf16.mxu1 %v7442_v10  ;;  %v1181_v38 = vrot.slane %v9158_v20, 4  ;;  %v1758_v39 = vrot.slane %v1756_v63, 5  ;;  %v907_v21 = vadd.f32 %v8999_v51, %v868_v13  ;;  %v1158_v40 = vshrl.u32 %v7713_v24, 16  ;;  %v9188_v3 = vpop.f32.mrb[25].mxu0  ;;  %v8294_v10 = vld [vmem:[%s10704_s4 + $0x330] ss:$8 sps:$4 sm:$0xff]  }
 0x145   : > { %5921 = vmatprep.subr.bf16.mxu1 %v8288_v5  ;;  %v1161_v35 = vshll.u32 %v7713_v24, 16  ;;  %v1744_v41 = vrot.slane %v1743_v25, 4  ;;  %v1753_v43 = vor.u32 %v1752_v26, %v1748_v18  ;;  %v1431_v46 = vsel %vm9014_vm8, %v1180_v32, %v1430_v23  ;;  %v3106_v63 = vld [vmem:[#allocation2 + $0x28] sm:$0xf]  ;;  %v8289_v26 = vld [vmem:[#allocation2 + $0x18] sm:$0xff]  }
 0x146   : > { %v939_v50 = vmax.f32 %v907_v21, 0.0  ;;  %v905_v52 = vadd.f32 %v8999_v51, %v866_v11  ;;  %v2662_v53 = vrot.slane %v2660_v30, 4  ;;  %1432 = vst [vmem:[#allocation2 + $0x60] sm:$0xf] %v1431_v46  ;;  %v9182_v56 = vrot.slane %v1158_v40, 7 }
 0x147   : > { %v1749_v42 = vsel %vm8971_vm2, %v1744_v41, %v1748_v18  ;;  %v1754_v58 = vrot.slane %v1753_v43, 4  ;;  %v2663_v8 = vshll.u32 %v2590_v12, 16  ;;  %v2669_v62 = vshll.u32 %v2591_v45, 16  ;;  %v1434_v11 = vld [vmem:[#allocation2 + $0x68] sm:$0x1] }
 0x148   : > { %5922 = vmatpush1.bf16.msra.mxu1 %v8286_v28  ;;  %v7716_v60 = vpack.c.bf16 %v939_v50, %v939_v50  ;;  %v937_v61 = vmax.f32 %v905_v52, 0.0  ;;  %v2673_v0 = vshrl.u32 %v2591_v45, 16  ;;  %v1163_v4 = vor.u32 %v1161_v35, %v9182_v56  ;;  %v8300_v28 = vld [vmem:[%s10704_s4 + $0x344] ss:$8 sps:$4 sm:$0xff]   ;;  %v1427_v40 = vld [vmem:[#allocation2 + $0x5c] sm:$0x1] }
 0x149   : > { %5923 = vmatprep.subr.bf16.mxu1 %v8292_v16  ;;  %v1164_v5 = vrot.slane %v9182_v56, 4  ;;  %v1759_v6 = vsel %vm8971_vm2, %v1754_v58, %v1758_v39  ;;  %v2665_v9 = vrot.slane %v2663_v8, 5  ;;  %v2671_v24 = vrot.slane %v2669_v62, 5  ;;  %v1646_v16 = vld [vmem:[#allocation2 + $0x24] sm:$0xf]  ;;  %v9205_v50 = vpop.f32.mrb[26].mxu0 }
 0x14a   : > { %v7347_v12 = vcombine.low %v1749_v42, %v1759_v6  ;;  %v1183_v15 = vshrl.u32 %v7716_v60, 16  ;;  %v1186_v17 = vshll.u32 %v7716_v60, 16  ;;  %v7714_v18 = vpack.c.bf16 %v937_v61, %v937_v61  ;;  %v3107_v43 = vld [vmem:[#allocation2 + $0x2c] sm:$0x1]  ;;  %v1647_v58 = vld [vmem:[#allocation2 + $0x28] sm:$0xf] }
 0x14b   : > { %v1424_v13 = vsel %vm9014_vm8, %v1163_v4, %v1423_v47  ;;  %v2666_v23 = vor.u32 %v2665_v9, %v2662_v53  ;;  %v2675_v25 = vrot.slane %v2673_v0, 4  ;;  %v2679_v21 = vshll.u32 %v2592_v7, 16  ;;  %v8298_v47 = vld [vmem:[%s10704_s4 + $0x340] ss:$8 sps:$4 sm:$0xff]   ;;  %v9207_v8 = vpop.f32.mrb[27].mxu0 }
 0x14c   : > { %5924 = vmatpush1.bf16.msra.mxu1 %v8290_v54  ;;  %1425 = vst [vmem:[#allocation2 + $0x54] sm:$0xf] %v1424_v13  ;;  %5392 = vmatprep.mubr.bf16.mxu0 %v7347_v12  ;;  %v1185_v30 = vrot.slane %v1183_v15, 7  ;;  %v1166_v32 = vshrl.u32 %v7714_v18, 16  ;;  %v1169_v39 = vshll.u32 %v7714_v18, 16  ;;  %v7427_v45 = vrot.slane %v3105_v19, 9 }
 0x14d   : > { %5925 = vmatprep.subr.bf16.mxu1 %v8296_v55  ;;  %v2667_v35 = vrot.slane %v2666_v23, 4  ;;  %v2676_v41 = vor.u32 %v2675_v25, %v2671_v24  ;;  %5393 = vmatmul.mubr.bf16.gmra.mrb[40].mxu0 %v8289_v26  ;;  %v3211_v46 = vrot.slane %v3106_v63, 5  ;;  %v2681_v42 = vrot.slane %v2679_v21, 5  ;;  %v2593_v9 = vld [vmem:[#allocation2 + $0x24] sm:$0xf]  ;;  %v9222_v15 = vpop.f32.mrb[28].mxu0 }
 0x14e   : > { %v1188_v52 = vor.u32 %v1186_v17, %v1185_v30  ;;  %v1190_v53 = vrot.slane %v1185_v30, 4  ;;  %v1168_v54 = vrot.slane %v1166_v32, 7  ;;  %v8304_v12 = vld [vmem:[%s10704_s4 + $0x354] ss:$8 sps:$4 sm:$0xff]   ;;  %v1761_v17 = vshrl.u32 %v1646_v16, 16  ;;  %v9229_v63 = vpop.f32.mrb[29].mxu0 }
 0x14f   : > { %v2672_v55 = vsel %vm8971_vm2, %v2667_v35, %v2671_v24  ;;  %v2677_v60 = vrot.slane %v2676_v41, 4  ;;  %v3212_v61 = vsel %vm9083_vm13, %v7427_v45, %v3211_v46  ;;  %v3213_v62 = vrot.slane %v3211_v46, 4  ;;  %v8302_v19 = vld [vmem:[%s10704_s4 + $0x350] ss:$8 sps:$4 sm:$0xff]   ;;  %v2594_v25 = vld [vmem:[#allocation2 + $0x28] sm:$0xf] }
 0x150   : > { %5926 = vmatpush1.bf16.msra.mxu1 %v8294_v10  ;;  %v1189_v0 = vsel %vm9021_vm9, %v1181_v38, %v1188_v52  ;;  %v1435_v4 = vsel %vm9027_vm10, %v1190_v53, %v1434_v11  ;;  %v1171_v6 = vor.u32 %v1169_v39, %v1168_v54  ;;  %v1173_v7 = vrot.slane %v1168_v54, 4  ;;  %v1648_v38 = vld [vmem:[#allocation2 + $0x2c] sm:$0x1]  ;;  %v3109_v54 = vld [vmem:[#allocation2 + $0x34] sm:$0xf] }
 0x151   : > { %5927 = vmatprep.subr.bf16.mxu1 %v8300_v28  ;;  %1433 = vst [vmem:[#allocation2 + $0x64] sm:$0xf] %v1189_v0  ;;  %1436 = vst [vmem:[#allocation2 + $0x68] sm:$0x1] %v1435_v4  ;;  %v2682_v20 = vsel %vm8971_vm2, %v2677_v60, %v2681_v42  ;;  %v3214_v10 = vrot.slane %v3107_v43, 5  ;;  %v1764_v18 = vshll.u32 %v1646_v16, 16 }
 0x152   : > { %v1172_v13 = vsel %vm9021_vm9, %v1164_v5, %v1171_v6  ;;  %v1428_v11 = vsel %vm9027_vm10, %v1173_v7, %v1427_v40  ;;  %v7410_v23 = vcombine.low %v2672_v55, %v2682_v20  ;;  %v1770_v24 = vshll.u32 %v1647_v58, 16  ;;  %v8308_v26 = vld [vmem:[%s10704_s4 + $0x364] ss:$8 sps:$4 sm:$0xff]   ;;  %v9240_v28 = vpop.f32.mrb[30].mxu0  ;;  %v3108_v43 = vld [vmem:[#allocation2 + $0x30] sm:$0xe] }
 0x153   : > { %1426 = vst [vmem:[#allocation2 + $0x58] sm:$0xf] %v1172_v13  ;;  %1429 = vst [vmem:[#allocation2 + $0x5c] sm:$0x1] %v1428_v11  ;;  %v3215_v56 = vsel %vm9083_vm13, %v3213_v62, %v3214_v10  ;;  %v1763_v30 = vrot.slane %v1761_v17, 4  ;;  %v1766_v32 = vrot.slane %v1764_v18, 5 }
 0x154   : > { %v1774_v5 = vshrl.u32 %v1647_v58, 16  ;;  %v2595_v39 = vld [vmem:[#allocation2 + $0x2c] sm:$0x1]  ;;  %5928 = vmatpush1.bf16.msra.mxu1 %v8298_v47  ;;  %v9244_v21 = vpop.f32.mrb[31].mxu0  ;;  %v7443_v16 = vcombine.low %v3212_v61, %v3215_v56  ;;  %v1772_v40 = vrot.slane %v1770_v24, 5  ;;  %v1780_v35 = vshll.u32 %v1648_v38, 16 }
 0x155   : > { %5769 = vmatmul.mubr.bf16.gmra.mrb[4].mxu1 %v7410_v23  ;;  %v2684_v41 = vshrl.u32 %v2593_v9, 16  ;;  %5929 = vmatprep.subr.bf16.mxu1 %v8304_v12  ;;  %v1767_v45 = vor.u32 %v1766_v32, %v1763_v30  ;;  %v2687_v52 = vshll.u32 %v2593_v9, 16  ;;  %v2693_v53 = vshll.u32 %v2594_v25, 16  ;;  %v8306_v42 = vld [vmem:[%s10704_s4 + $0x360] ss:$8 sps:$4 sm:$0xff]  }
 0x156   : > { %v1776_v46 = vrot.slane %v1774_v5, 4  ;;  %5778 = vmatprep.mubr.bf16.mxu1 %v7443_v16  ;;  %v1782_v47 = vrot.slane %v1780_v35, 5  ;;  %v2697_v55 = vshrl.u32 %v2594_v25, 16  ;;  %v2703_v60 = vshll.u32 %v2595_v39, 16  ;;  %v3110_v6 = vld [vmem:[#allocation2 + $0x38] sm:$0x1] }
 0x157   : > { %v2686_v58 = vrot.slane %v2684_v41, 4  ;;  %v1768_v61 = vrot.slane %v1767_v45, 4  ;;  %v2689_v0 = vrot.slane %v2687_v52, 5  ;;  %v2695_v4 = vrot.slane %v2693_v53, 5  ;;  %v1649_v24 = vld [vmem:[#allocation2 + $0x30] sm:$0xf] }
 0x158   : > { %v1777_v62 = vor.u32 %v1776_v46, %v1772_v40  ;;  %5930 = vmatpush1.bf16.msra.mxu1 %v8302_v19  ;;  %v2699_v7 = vrot.slane %v2697_v55, 4  ;;  %v2705_v12 = vrot.slane %v2703_v60, 5  ;;  %v871_v9 = vmul.f32 %v9107_v33, %v8994_v49  ;;  %v8293_v39 = vld [vmem:[#allocation2 + $0x24] sm:$0xff]   ;;  %v1651_v41 = vld [vmem:[#allocation2 + $0x38] sm:$0x1] }
 0x159   : > { %v7428_v20 = vrot.slane %v3108_v43, 9  ;;  %5931 = vmatprep.subr.bf16.mxu1 %v8308_v26  ;;  %v1773_v10 = vsel %vm8971_vm2, %v1768_v61, %v1772_v40  ;;  %v2690_v17 = vor.u32 %v2689_v0, %v2686_v58  ;;  %v3218_v18 = vrot.slane %v3109_v54, 5  ;;  %v1650_v40 = vld [vmem:[#allocation2 + $0x34] sm:$0xf] }
 0x15a   : > { %v1778_v38 = vrot.slane %v1777_v62, 4  ;;  %v2700_v13 = vor.u32 %v2699_v7, %v2695_v4  ;;  %v910_v11 = vadd.f32 %v8999_v51, %v871_v9  ;;  %v3221_v23 = vrot.slane %v3110_v6, 5  ;;  %v9273_v7 = vld [vmem:[#allocation2 + $0x30] sm:$0xf] }
 0x15b   : > { %v869_v19 = vmul.f32 %v8994_v49, %v9112_v48  ;;  %v2691_v33 = vrot.slane %v2690_v17, 4  ;;  %v3219_v26 = vsel %vm9083_vm13, %v7428_v20, %v3218_v18  ;;  %v3220_v56 = vrot.slane %v3218_v18, 4 }
 0x15c   : > { %v1783_v25 = vsel %vm8971_vm2, %v1778_v38, %v1782_v47  ;;  %5932 = vmatpush1.bf16.msra.mxu1 %v8306_v42  ;;  %v2701_v32 = vrot.slane %v2700_v13, 4  ;;  %v942_v5 = vmax.f32 %v910_v11, 0.0  ;;  %v1785_v43 = vshrl.u32 %v1649_v24, 16  ;;  %v8310_v42 = vld [vmem:[%s10704_s4 + $0x370] ss:$8 sps:$4 sm:$0xff]  }
 0x15d   : > { %v7348_v30 = vcombine.low %v1773_v10, %v1783_v25  ;;  %v908_v16 = vadd.f32 %v8999_v51, %v869_v19  ;;  %v2696_v48 = vsel %vm8971_vm2, %v2691_v33, %v2695_v4  ;;  %v3222_v35 = vsel %vm9083_vm13, %v3220_v56, %v3221_v23  ;;  %v8312_v47 = vld [vmem:[%s10704_s4 + $0x374] ss:$8 sps:$4 sm:$0xff]   ;;  %v8314_v23 = vld [vmem:[%s10704_s4 + $0x100] ss:$8 sps:$4 sm:$0xff]   ;;  %v1437_v19 = vld [vmem:[#allocation2 + $0x6c] sm:$0xf] }
 0x15e   : > { %v1788_v45 = vshll.u32 %v1649_v24, 16  ;;  %v2706_v46 = vsel %vm8971_vm2, %v2701_v32, %v2705_v12  ;;  %v7719_v52 = vpack.c.bf16 %v942_v5, %v942_v5  ;;  %v7444_v53 = vcombine.low %v3219_v26, %v3222_v35  ;;  %5933 = vmatprep.subr.bf16.mxu1 %v8312_v47  ;;  %v1444_v12 = vld [vmem:[#allocation2 + $0x78] sm:$0xf]  ;;  %v8316_v56 = vld [vmem:[%s10704_s4 + $0x104] ss:$8 sps:$4 sm:$0xff]  }
 0x15f   : > { %5402 = vmatprep.mubr.bf16.mxu0 %v7348_v30  ;;  %v940_v54 = vmax.f32 %v908_v16, 0.0  ;;  %v7411_v58 = vcombine.low %v2696_v48, %v2706_v46  ;;  %v1787_v55 = vrot.slane %v1785_v43, 4  ;;  %v1794_v61 = vshll.u32 %v1650_v40, 16  ;;  %v8319_v16 = vld [vmem:[%s10704_s4 + $0x114] ss:$8 sps:$4 sm:$0xff]   ;;  %5533 = vmatprep.subr.bf16.mxu0 %v8316_v56 }
 0x160   : > { %5403 = vmatmul.mubr.bf16.gmra.mrb[44].mxu0 %v8293_v39  ;;  %v1790_v60 = vrot.slane %v1788_v45, 5  ;;  %v1209_v62 = vshrl.u32 %v7719_v52, 16  ;;  %v1212_v0 = vshll.u32 %v7719_v52, 16  ;;  %v1798_v6 = vshrl.u32 %v1650_v40, 16  ;;  %5934 = vmatpush1.bf16.msra.mxu1 %v8310_v42  ;;  %v9303_v40 = vld [vmem:[%s10703_s3] ss:$0 sm:$0xff] }
 0x161   : > { %v7717_v4 = vpack.c.bf16 %v940_v54, %v940_v54  ;;  %5779 = vmatmul.mubr.bf16.gmra.mrb[8].mxu1 %v7411_v58  ;;  %v1796_v20 = vrot.slane %v1794_v61, 5  ;;  %v1804_v10 = vshll.u32 %v1651_v41, 16  ;;  %v872_v38 = vmul.f32 %v9114_v29, %v8994_v49  ;;  %v2597_v29 = vld [vmem:[#allocation2 + $0x34] sm:$0xf]  ;;  %v2598_v35 = vld [vmem:[#allocation2 + $0x38] sm:$0x1]  ;;  %5534 = vmatpush1.bf16.msra.mxu0 %v8314_v23 }
 0x162   : > { %v1791_v9 = vor.u32 %v1790_v60, %v1787_v55  ;;  %v9277_v17 = vrot.slane %v1209_v62, 7  ;;  %5788 = vmatprep.mubr.bf16.mxu1 %v7444_v53  ;;  %v1800_v11 = vrot.slane %v1798_v6, 4  ;;  %v870_v26 = vmul.f32 %v8994_v49, %v9120_v1  ;;  %v8320_v49 = vld [vmem:[%s10704_s4 + $0x380] ss:$8 sps:$4 sm:$0xff]   ;;  %v8322_v43 = vld [vmem:[%s10704_s4 + $0x384] ss:$8 sps:$4 sm:$0xff]   ;;  %5535 = vmatprep.subr.bf16.mxu0 %v8319_v16 }
 0x163   : > { %v1192_v18 = vshrl.u32 %v7717_v4, 16  ;;  %v1195_v13 = vshll.u32 %v7717_v4, 16  ;;  %v1806_v25 = vrot.slane %v1804_v10, 5  ;;  %v911_v33 = vadd.f32 %v8999_v51, %v872_v38  ;;  %v3111_v54 = vld [vmem:[#allocation2 + $0x3c] sm:$0xe]  ;;  %5935 = vmatprep.subr.bf16.mxu1 %v8322_v43 }
 0x164   : > { %v1792_v24 = vrot.slane %v1791_v9, 4  ;;  %v1214_v30 = vor.u32 %v1212_v0, %v9277_v17  ;;  %v1215_v32 = vrot.slane %v9277_v17, 4  ;;  %v1801_v39 = vor.u32 %v1800_v11, %v1796_v20  ;;  %v8317_v42 = vld [vmem:[%s10704_s4 + $0x110] ss:$8 sps:$4 sm:$0xff]   ;;  %v8326_v61 = vld [vmem:[%s10704_s4 + $0x124] ss:$8 sps:$4 sm:$0xff]   ;;  %5936 = vmatpush1.bf16.msra.mxu1 %v8320_v49 }
 0x165   : > { %v9290_v5 = vrot.slane %v1192_v18, 7  ;;  %v943_v1 = vmax.f32 %v911_v33, 0.0  ;;  %v909_v48 = vadd.f32 %v9303_v40, %v870_v26  ;;  %v2708_v41 = vshrl.u32 %v9273_v7, 16  ;;  %v3112_v9 = vld [vmem:[#allocation2 + $0x40] sm:$0xf]  ;;  %5536 = vmatpush1.bf16.msra.mxu0 %v8317_v42 }
 0x166   : > { %v1797_v51 = vsel %vm8971_vm2, %v1792_v24, %v1796_v20  ;;  %v1445_v45 = vsel %vm9014_vm8, %v1214_v30, %v1444_v12  ;;  %v1802_v53 = vrot.slane %v1801_v39, 4  ;;  %v2711_v60 = vshll.u32 %v9273_v7, 16  ;;  %v8297_v12 = vld [vmem:[#allocation2 + $0x30] sm:$0xff]   ;;  %v3113_v20 = vld [vmem:[#allocation2 + $0x44] sm:$0x1]  ;;  %5537 = vmatprep.subr.bf16.mxu0 %v8326_v61 }
 0x167   : > { %v1197_v46 = vor.u32 %v1195_v13, %v9290_v5  ;;  %v1198_v52 = vrot.slane %v9290_v5, 4  ;;  %1446 = vst [vmem:[#allocation2 + $0x78] sm:$0xf] %v1445_v45  ;;  %v7720_v47 = vpack.c.bf16 %v943_v1, %v943_v1  ;;  %v941_v58 = vmax.f32 %v909_v48, 0.0  ;;  %v8324_v13 = vld [vmem:[%s10704_s4 + $0x120] ss:$8 sps:$4 sm:$0xff]  }
 0x168   : > { %v2710_v55 = vrot.slane %v2708_v41, 4  ;;  %v1807_v0 = vsel %vm8971_vm2, %v1802_v53, %v1806_v25  ;;  %v2717_v4 = vshll.u32 %v2597_v29, 16  ;;  %v2721_v6 = vshrl.u32 %v2597_v29, 16  ;;  %v8329_v11 = vld [vmem:[%s10704_s4 + $0x134] ss:$8 sps:$4 sm:$0xff]  }
 0x169   : > { %v1438_v62 = vsel %vm9014_vm8, %v1197_v46, %v1437_v19  ;;  %v7349_v7 = vcombine.low %v1797_v51, %v1807_v0  ;;  %v1217_v10 = vshrl.u32 %v7720_v47, 16  ;;  %v1220_v38 = vshll.u32 %v7720_v47, 16  ;;  %v1448_v23 = vld [vmem:[#allocation2 + $0x80] sm:$0x1]  ;;  %v8330_v26 = vld [vmem:[%s10704_s4 + $0x390] ss:$8 sps:$4 sm:$0xff]   ;;  %5538 = vmatpush1.bf16.msra.mxu0 %v8324_v13 }
 0x16a   : > { %1439 = vst [vmem:[#allocation2 + $0x6c] sm:$0xf] %v1438_v62  ;;  %v7718_v18 = vpack.c.bf16 %v941_v58, %v941_v58  ;;  %v2713_v19 = vrot.slane %v2711_v60, 5  ;;  %v2719_v24 = vrot.slane %v2717_v4, 5  ;;  %v2723_v25 = vrot.slane %v2721_v6, 4  ;;  %5539 = vmatprep.subr.bf16.mxu0 %v8329_v11 }
 0x16b   : > { %v2727_v33 = vshll.u32 %v2598_v35, 16  ;;  %5412 = vmatprep.mubr.bf16.mxu0 %v7349_v7  ;;  %v1219_v29 = vrot.slane %v1217_v10, 7  ;;  %v7429_v39 = vrot.slane %v3111_v54, 9  ;;  %v8332_v16 = vld [vmem:[%s10704_s4 + $0x394] ss:$8 sps:$4 sm:$0xff]   ;;  %v3225_v35 = vrot.slane %v3112_v9, 5 }
 0x16c   : > { %v1200_v56 = vshrl.u32 %v7718_v18, 16  ;;  %v1203_v30 = vshll.u32 %v7718_v18, 16  ;;  %v1441_v49 = vld [vmem:[#allocation2 + $0x74] sm:$0x1]  ;;  %v2714_v51 = vor.u32 %v2713_v19, %v2710_v55  ;;  %v2724_v1 = vor.u32 %v2723_v25, %v2719_v24  ;;  %5413 = vmatmul.mubr.bf16.gmra.mrb[48].mxu0 %v8297_v12  ;;  %v1652_v41 = vld [vmem:[#allocation2 + $0x3c] sm:$0xf]  ;;  %5937 = vmatprep.subr.bf16.mxu1 %v8332_v16 }
 0x16d   : > { %v2729_v48 = vrot.slane %v2727_v33, 5  ;;  %v1222_v43 = vor.u32 %v1220_v38, %v1219_v29  ;;  %v1224_v45 = vrot.slane %v1219_v29, 4  ;;  %v3228_v53 = vrot.slane %v3113_v20, 5  ;;  %v1653_v42 = vld [vmem:[#allocation2 + $0x40] sm:$0xf]  ;;  %5938 = vmatpush1.bf16.msra.mxu1 %v8330_v26 }
 0x16e   : > { %v1202_v46 = vrot.slane %v1200_v56, 7  ;;  %v2715_v47 = vrot.slane %v2714_v51, 4  ;;  %v2725_v54 = vrot.slane %v2724_v1, 4  ;;  %v3226_v58 = vsel %vm9083_vm13, %v7429_v39, %v3225_v35  ;;  %v8327_v55 = vld [vmem:[%s10704_s4 + $0x130] ss:$8 sps:$4 sm:$0xff]  }
 0x16f   : > { %v3227_v60 = vrot.slane %v3225_v35, 4  ;;  %v1223_v61 = vsel %vm9021_vm9, %v1215_v32, %v1222_v43  ;;  %v1449_v62 = vsel %vm9027_vm10, %v1224_v45, %v1448_v23  ;;  %v1654_v6 = vld [vmem:[#allocation2 + $0x44] sm:$0x1]  ;;  %v1809_v20 = vshrl.u32 %v1652_v41, 16  ;;  %v2599_v7 = vld [vmem:[#allocation2 + $0x3c] sm:$0xf]  ;;  %5540 = vmatpush1.bf16.msra.mxu0 %v8327_v55 }
 0x170   : > { %v1205_v0 = vor.u32 %v1203_v30, %v1202_v46  ;;  %v1207_v4 = vrot.slane %v1202_v46, 4  ;;  %v8336_v12 = vld [vmem:[%s10704_s4 + $0x144] ss:$8 sps:$4 sm:$0xff]   ;;  %1447 = vst [vmem:[#allocation2 + $0x7c] sm:$0xf] %v1223_v61  ;;  %v2720_v9 = vsel %vm8971_vm2, %v2715_v47, %v2719_v24  ;;  %v2730_v17 = vsel %vm8971_vm2, %v2725_v54, %v2729_v48 }
 0x171   : > { %1450 = vst [vmem:[#allocation2 + $0x80] sm:$0x1] %v1449_v62  ;;  %v3229_v32 = vsel %vm9083_vm13, %v3227_v60, %v3228_v53  ;;  %v2600_v10 = vld [vmem:[#allocation2 + $0x40] sm:$0xf]  ;;  %v7412_v13 = vcombine.low %v2720_v9, %v2730_v17  ;;  %v2601_v23 = vld [vmem:[#allocation2 + $0x44] sm:$0x1]  ;;  %5541 = vmatprep.subr.bf16.mxu0 %v8336_v12 }
 0x172   : > { %v1206_v38 = vsel %vm9021_vm9, %v1198_v52, %v1205_v0  ;;  %v1442_v18 = vsel %vm9027_vm10, %v1207_v4, %v1441_v49  ;;  %v7445_v11 = vcombine.low %v3226_v58, %v3229_v32  ;;  %v8334_v19 = vld [vmem:[%s10704_s4 + $0x140] ss:$8 sps:$4 sm:$0xff]   ;;  %v1811_v24 = vrot.slane %v1809_v20, 4  ;;  %v3115_v29 = vld [vmem:[#allocation2 + $0x4c] sm:$0xf] }
 0x173   : > { %1440 = vst [vmem:[#allocation2 + $0x70] sm:$0xf] %v1206_v38  ;;  %1443 = vst [vmem:[#allocation2 + $0x74] sm:$0x1] %v1442_v18  ;;  %v1812_v25 = vshll.u32 %v1652_v41, 16  ;;  %v1818_v33 = vshll.u32 %v1653_v42, 16  ;;  %5789 = vmatmul.mubr.bf16.gmra.mrb[12].mxu1 %v7412_v13  ;;  %5542 = vmatpush1.bf16.msra.mxu0 %v8334_v19 }
 0x174   : > { %v1822_v26 = vshrl.u32 %v1653_v42, 16  ;;  %v3114_v5 = vld [vmem:[#allocation2 + $0x48] sm:$0xe]  ;;  %v8339_v52 = vld [vmem:[%s10704_s4 + $0x154] ss:$8 sps:$4 sm:$0xff]   ;;  %v1828_v56 = vshll.u32 %v1654_v6, 16  ;;  %5798 = vmatprep.mubr.bf16.mxu1 %v7445_v11 }
 0x175   : > { %v2732_v30 = vshrl.u32 %v2599_v7, 16  ;;  %v2735_v39 = vshll.u32 %v2599_v7, 16  ;;  %v2741_v16 = vshll.u32 %v2600_v10, 16  ;;  %v8340_v49 = vld [vmem:[%s10704_s4 + $0x3a0] ss:$8 sps:$4 sm:$0xff]   ;;  %v1814_v51 = vrot.slane %v1812_v25, 5  ;;  %5543 = vmatprep.subr.bf16.mxu0 %v8339_v52 }
 0x176   : > { %v1820_v1 = vrot.slane %v1818_v33, 5  ;;  %v1824_v48 = vrot.slane %v1822_v26, 4  ;;  %v2745_v35 = vshrl.u32 %v2600_v10, 16  ;;  %v8342_v41 = vld [vmem:[%s10704_s4 + $0x3a4] ss:$8 sps:$4 sm:$0xff]   ;;  %v1830_v43 = vrot.slane %v1828_v56, 5 }
 0x177   : > { %v2734_v45 = vrot.slane %v2732_v30, 4  ;;  %v2737_v46 = vrot.slane %v2735_v39, 5  ;;  %v2743_v53 = vrot.slane %v2741_v16, 5  ;;  %v1815_v42 = vor.u32 %v1814_v51, %v1811_v24  ;;  %v8337_v60 = vld [vmem:[%s10704_s4 + $0x150] ss:$8 sps:$4 sm:$0xff]   ;;  %5939 = vmatprep.subr.bf16.mxu1 %v8342_v41  ;;  %v8301_v26 = vld [vmem:[#allocation2 + $0x3c] sm:$0xff]  }
 0x178   : > { %v1825_v47 = vor.u32 %v1824_v48, %v1820_v1  ;;  %v2747_v54 = vrot.slane %v2745_v35, 4  ;;  %v2751_v58 = vshll.u32 %v2601_v23, 16  ;;  %v9381_v61 = vld [vmem:[%s10702_s2] ss:$0 sm:$0xff]  ;;  %v3116_v0 = vld [vmem:[#allocation2 + $0x50] sm:$0x1]  ;;  %5940 = vmatpush1.bf16.msra.mxu1 %v8340_v49  ;;  %5544 = vmatpush1.bf16.msra.mxu0 %v8337_v60 }
 0x179   : > { %v2738_v55 = vor.u32 %v2737_v46, %v2734_v45  ;;  %v875_v62 = vmul.f32 %v9381_v61, %v9130_v27  ;;  %v7430_v4 = vrot.slane %v3114_v5, 9  ;;  %v3232_v6 = vrot.slane %v3115_v29, 5  ;;  %v8346_v12 = vld [vmem:[%s10704_s4 + $0x164] ss:$8 sps:$4 sm:$0xff]   ;;  %v1655_v18 = vld [vmem:[#allocation2 + $0x48] sm:$0xf] }
 0x17a   : > { %v1816_v9 = vrot.slane %v1815_v42, 4  ;;  %v1826_v17 = vrot.slane %v1825_v47, 4  ;;  %v2748_v32 = vor.u32 %v2747_v54, %v2743_v53  ;;  %v2753_v20 = vrot.slane %v2751_v58, 5  ;;  %v1656_v29 = vld [vmem:[#allocation2 + $0x4c] sm:$0xf]  ;;  %5545 = vmatprep.subr.bf16.mxu0 %v8346_v12 }
 0x17b   : > { %v2739_v7 = vrot.slane %v2738_v55, 4  ;;  %v914_v10 = vadd.f32 %v9303_v40, %v875_v62  ;;  %v3233_v38 = vsel %vm9083_vm13, %v7430_v4, %v3232_v6  ;;  %v3234_v27 = vrot.slane %v3232_v6, 4  ;;  %v8344_v52 = vld [vmem:[%s10704_s4 + $0x160] ss:$8 sps:$4 sm:$0xff]   ;;  %v1657_v39 = vld [vmem:[#allocation2 + $0x50] sm:$0x1] }
 0x17c   : > { %v1821_v13 = vsel %vm8971_vm2, %v1816_v9, %v1820_v1  ;;  %v1831_v11 = vsel %vm8971_vm2, %v1826_v17, %v1830_v43  ;;  %v2749_v23 = vrot.slane %v2748_v32, 4  ;;  %v3235_v19 = vrot.slane %v3116_v0, 5  ;;  %v9407_v35 = vld [vmem:[#allocation2 + $0x48] sm:$0xf]  ;;  %v8347_v41 = vld [vmem:[%s10704_s4 + $0x170] ss:$8 sps:$4 sm:$0xff]   ;;  %5546 = vmatpush1.bf16.msra.mxu0 %v8344_v52 }
 0x17d   : > { %v7350_v24 = vcombine.low %v1821_v13, %v1831_v11  ;;  %v2744_v25 = vsel %vm8971_vm2, %v2739_v7, %v2743_v53  ;;  %v946_v33 = vmax.f32 %v914_v10, 0.0  ;;  %v873_v5 = vmul.f32 %v9381_v61, %v9135_v44  ;;  %v8349_v42 = vld [vmem:[%s10704_s4 + $0x174] ss:$8 sps:$4 sm:$0xff]   ;;  %v8350_v55 = vld [vmem:[%s10704_s4 + $0x3b0] ss:$8 sps:$4 sm:$0xff]  }
 0x17e   : > { %v2754_v56 = vsel %vm8971_vm2, %v2749_v23, %v2753_v20  ;;  %v3236_v30 = vsel %vm9083_vm13, %v3234_v27, %v3235_v19  ;;  %v1833_v16 = vshrl.u32 %v1655_v18, 16  ;;  %v1836_v49 = vshll.u32 %v1655_v18, 16  ;;  %v1458_v62 = vld [vmem:[#allocation2 + $0x90] sm:$0xf]  ;;  %5547 = vmatprep.subr.bf16.mxu0 %v8349_v42  ;;  %v8352_v9 = vld [vmem:[%s10704_s4 + $0x3b4] ss:$8 sps:$4 sm:$0xff]  }
 0x17f   : > { %5422 = vmatprep.mubr.bf16.mxu0 %v7350_v24  ;;  %v7413_v51 = vcombine.low %v2744_v25, %v2754_v56  ;;  %v7723_v1 = vpack.c.bf16 %v946_v33, %v946_v33  ;;  %v7446_v48 = vcombine.low %v3233_v38, %v3236_v30  ;;  %v912_v44 = vadd.f32 %v9303_v40, %v873_v5  ;;  %v9427_v10 = vld [vmem:[#allocation2 + $0x4c] sm:$0xf]  ;;  %v8354_v11 = vld [vmem:[%s10704_s4 + $0x180] ss:$8 sps:$4 sm:$0xff]   ;;  %v2604_v30 = vld [vmem:[#allocation2 + $0x50] sm:$0x1] }
 0x180   : > { %5423 = vmatmul.mubr.bf16.gmra.mrb[52].mxu0 %v8301_v26  ;;  %v1835_v43 = vrot.slane %v1833_v16, 4  ;;  %v1838_v45 = vrot.slane %v1836_v49, 5  ;;  %v1842_v46 = vshll.u32 %v1656_v29, 16  ;;  %v1846_v53 = vshrl.u32 %v1656_v29, 16  ;;  %v8356_v38 = vld [vmem:[%s10704_s4 + $0x184] ss:$8 sps:$4 sm:$0xff]   ;;  %5941 = vmatprep.subr.bf16.mxu1 %v8352_v9 }
 0x181   : > { %5799 = vmatmul.mubr.bf16.gmra.mrb[16].mxu1 %v7413_v51  ;;  %v1243_v47 = vshrl.u32 %v7723_v1, 16  ;;  %v1246_v54 = vshll.u32 %v7723_v1, 16  ;;  %v944_v58 = vmax.f32 %v912_v44, 0.0  ;;  %v1852_v60 = vshll.u32 %v1657_v39, 16  ;;  %5548 = vmatpush1.bf16.msra.mxu0 %v8347_v41  ;;  %v8362_v33 = vld [vmem:[%s10704_s4 + $0x3c4] ss:$8 sps:$4 sm:$0xff]  }
 0x182   : > { %5808 = vmatprep.mubr.bf16.mxu1 %v7446_v48  ;;  %v1839_v0 = vor.u32 %v1838_v45, %v1835_v43  ;;  %v1844_v4 = vrot.slane %v1842_v46, 5  ;;  %v1848_v6 = vrot.slane %v1846_v53, 4  ;;  %v876_v12 = vmul.f32 %v9381_v61, %v9139_v34  ;;  %5942 = vmatpush1.bf16.msra.mxu1 %v8350_v55  ;;  %v1451_v26 = vld [vmem:[#allocation2 + $0x84] sm:$0xf]  ;;  %v8359_v39 = vld [vmem:[%s10704_s4 + $0x194] ss:$8 sps:$4 sm:$0xff]  }
 0x183   : > { %v9423_v17 = vrot.slane %v1243_v47, 7  ;;  %v7721_v32 = vpack.c.bf16 %v944_v58, %v944_v58  ;;  %v1854_v20 = vrot.slane %v1852_v60, 5  ;;  %v874_v7 = vmul.f32 %v9381_v61, %v9143_v57  ;;  %v8360_v57 = vld [vmem:[%s10704_s4 + $0x3c0] ss:$8 sps:$4 sm:$0xff]   ;;  %5549 = vmatprep.subr.bf16.mxu0 %v8356_v38  ;;  %v3117_v48 = vld [vmem:[#allocation2 + $0x54] sm:$0xe]  ;;  %5943 = vmatprep.subr.bf16.mxu1 %v8362_v33 }
 0x184   : > { %v1840_v27 = vrot.slane %v1839_v0, 4  ;;  %v1849_v34 = vor.u32 %v1848_v6, %v1844_v4  ;;  %v915_v18 = vadd.f32 %v9303_v40, %v876_v12  ;;  %v2756_v13 = vshrl.u32 %v9407_v35, 16  ;;  %v3118_v46 = vld [vmem:[#allocation2 + $0x58] sm:$0xf]  ;;  %v8372_v60 = vld [vmem:[%s10704_s4 + $0x3d4] ss:$8 sps:$4 sm:$0xff]  }
 0x185   : > { %v1248_v23 = vor.u32 %v1246_v54, %v9423_v17  ;;  %v1249_v19 = vrot.slane %v9423_v17, 4  ;;  %v1226_v24 = vshrl.u32 %v7721_v32, 16  ;;  %v1229_v25 = vshll.u32 %v7721_v32, 16  ;;  %v8357_v53 = vld [vmem:[%s10704_s4 + $0x190] ss:$8 sps:$4 sm:$0xff]   ;;  %5550 = vmatpush1.bf16.msra.mxu0 %v8354_v11  ;;  %v8305_v6 = vld [vmem:[#allocation2 + $0x48] sm:$0xff]  }
 0x186   : > { %v1845_v5 = vsel %vm8971_vm2, %v1840_v27, %v1844_v4  ;;  %v1850_v29 = vrot.slane %v1849_v34, 4  ;;  %v947_v52 = vmax.f32 %v915_v18, 0.0  ;;  %v913_v56 = vadd.f32 %v9303_v40, %v874_v7  ;;  %5944 = vmatpush1.bf16.msra.mxu1 %v8360_v57  ;;  %v8370_v58 = vld [vmem:[%s10704_s4 + $0x3d0] ss:$8 sps:$4 sm:$0xff]   ;;  %5551 = vmatprep.subr.bf16.mxu0 %v8359_v39  ;;  %v8366_v12 = vld [vmem:[%s10704_s4 + $0x1a4] ss:$8 sps:$4 sm:$0xff]  }
 0x187   : > { %v1459_v16 = vsel %vm9014_vm8, %v1248_v23, %v1458_v62  ;;  %v9453_v49 = vrot.slane %v1226_v24, 7  ;;  %v2758_v51 = vrot.slane %v2756_v13, 4  ;;  %v2759_v1 = vshll.u32 %v9407_v35, 16  ;;  %v1462_v32 = vld [vmem:[#allocation2 + $0x98] sm:$0x1]  ;;  %5945 = vmatprep.subr.bf16.mxu1 %v8372_v60 }
 0x188   : > { %1460 = vst [vmem:[#allocation2 + $0x90] sm:$0xf] %v1459_v16  ;;  %v1855_v44 = vsel %vm8971_vm2, %v1850_v29, %v1854_v20  ;;  %v7724_v41 = vpack.c.bf16 %v947_v52, %v947_v52  ;;  %v945_v43 = vmax.f32 %v913_v56, 0.0  ;;  %v2765_v45 = vshll.u32 %v9427_v10, 16  ;;  %v3119_v27 = vld [vmem:[#allocation2 + $0x5c] sm:$0x1] }
 0x189   : > { %v1231_v42 = vor.u32 %v1229_v25, %v9453_v49  ;;  %v1232_v47 = vrot.slane %v9453_v49, 4  ;;  %v7351_v35 = vcombine.low %v1845_v5, %v1855_v44  ;;  %v2761_v54 = vrot.slane %v2759_v1, 5  ;;  %v8364_v34 = vld [vmem:[%s10704_s4 + $0x1a0] ss:$8 sps:$4 sm:$0xff]   ;;  %v1658_v23 = vld [vmem:[#allocation2 + $0x54] sm:$0xf]  ;;  %5552 = vmatpush1.bf16.msra.mxu0 %v8357_v53 }
 0x18a   : > { %v1251_v55 = vshrl.u32 %v7724_v41, 16  ;;  %v1254_v62 = vshll.u32 %v7724_v41, 16  ;;  %v7722_v0 = vpack.c.bf16 %v945_v43, %v945_v43  ;;  %v9470_v4 = vrot.slane %v2765_v45, 5  ;;  %v8380_v24 = vld [vmem:[%s10704_s4 + $0x3e0] ss:$8 sps:$4 sm:$0xff]   ;;  %5946 = vmatpush1.bf16.msra.mxu1 %v8370_v58  ;;  %5553 = vmatprep.subr.bf16.mxu0 %v8366_v12 }
 0x18b   : > { %v1452_v9 = vsel %vm9014_vm8, %v1231_v42, %v1451_v26  ;;  %5432 = vmatprep.mubr.bf16.mxu0 %v7351_v35  ;;  %v2762_v20 = vor.u32 %v2761_v54, %v2758_v51  ;;  %v2769_v7 = vshrl.u32 %v9427_v10, 16  ;;  %v2775_v38 = vshll.u32 %v2604_v30, 16  ;;  %v1455_v25 = vld [vmem:[#allocation2 + $0x8c] sm:$0x1]  ;;  %v8369_v16 = vld [vmem:[%s10704_s4 + $0x1b4] ss:$8 sps:$4 sm:$0xff]  }
 0x18c   : > { %1453 = vst [vmem:[#allocation2 + $0x84] sm:$0xf] %v1452_v9  ;;  %v1253_v18 = vrot.slane %v1251_v55, 7  ;;  %v1234_v13 = vshrl.u32 %v7722_v0, 16  ;;  %v1237_v11 = vshll.u32 %v7722_v0, 16  ;;  %5433 = vmatmul.mubr.bf16.gmra.mrb[56].mxu0 %v8305_v6  ;;  %v7431_v57 = vrot.slane %v3117_v48, 9 }
 0x18d   : > { %v2763_v10 = vrot.slane %v2762_v20, 4  ;;  %v2771_v33 = vrot.slane %v2769_v7, 4  ;;  %v2777_v26 = vrot.slane %v2775_v38, 5  ;;  %v3239_v5 = vrot.slane %v3118_v46, 5  ;;  %v8382_v29 = vld [vmem:[%s10704_s4 + $0x3e4] ss:$8 sps:$4 sm:$0xff]   ;;  %5554 = vmatpush1.bf16.msra.mxu0 %v8364_v34 }
 0x18e   : > { %v1256_v52 = vor.u32 %v1254_v62, %v1253_v18  ;;  %v1258_v56 = vrot.slane %v1253_v18, 4  ;;  %v1236_v30 = vrot.slane %v1234_v13, 7  ;;  %v3242_v39 = vrot.slane %v3119_v27, 5  ;;  %v1659_v41 = vld [vmem:[#allocation2 + $0x58] sm:$0xf]  ;;  %5947 = vmatprep.subr.bf16.mxu1 %v8382_v29  ;;  %5555 = vmatprep.subr.bf16.mxu0 %v8369_v16 }
 0x18f   : > { %v2768_v51 = vsel %vm8971_vm2, %v2763_v10, %v9470_v4  ;;  %v2772_v1 = vor.u32 %v2771_v33, %v9470_v4  ;;  %v3240_v48 = vsel %vm9083_vm13, %v7431_v57, %v3239_v5  ;;  %v3241_v44 = vrot.slane %v3239_v5, 4  ;;  %v1660_v43 = vld [vmem:[#allocation2 + $0x5c] sm:$0x1]  ;;  %v2605_v45 = vld [vmem:[#allocation2 + $0x54] sm:$0xf]  ;;  %5948 = vmatpush1.bf16.msra.mxu1 %v8380_v24 }
 0x190   : > { %v1257_v46 = vsel %vm9021_vm9, %v1249_v19, %v1256_v52  ;;  %v1463_v53 = vsel %vm9027_vm10, %v1258_v56, %v1462_v32  ;;  %v1239_v42 = vor.u32 %v1237_v11, %v1236_v30  ;;  %v1241_v35 = vrot.slane %v1236_v30, 4  ;;  %v2606_v54 = vld [vmem:[#allocation2 + $0x58] sm:$0xf]  ;;  %v8376_v19 = vld [vmem:[%s10704_s4 + $0x1c4] ss:$8 sps:$4 sm:$0xff]  }
 0x191   : > { %v8367_v58 = vld [vmem:[%s10704_s4 + $0x1b0] ss:$8 sps:$4 sm:$0xff]   ;;  %1461 = vst [vmem:[#allocation2 + $0x94] sm:$0xf] %v1257_v46  ;;  %1464 = vst [vmem:[#allocation2 + $0x98] sm:$0x1] %v1463_v53  ;;  %v3243_v55 = vsel %vm9083_vm13, %v3241_v44, %v3242_v39 }
 0x192   : > { %v2773_v60 = vrot.slane %v2772_v1, 4  ;;  %v1857_v17 = vshrl.u32 %v1658_v23, 16  ;;  %v1860_v62 = vshll.u32 %v1658_v23, 16  ;;  %v1240_v0 = vsel %vm9021_vm9, %v1232_v47, %v1239_v42  ;;  %v2607_v38 = vld [vmem:[#allocation2 + $0x5c] sm:$0x1]  ;;  %5556 = vmatpush1.bf16.msra.mxu0 %v8367_v58 }
 0x193   : > { %v1456_v4 = vsel %vm9027_vm10, %v1241_v35, %v1455_v25  ;;  %v7447_v6 = vcombine.low %v3240_v48, %v3243_v55  ;;  %v1866_v12 = vshll.u32 %v1659_v41, 16  ;;  %1454 = vst [vmem:[#allocation2 + $0x88] sm:$0xf] %v1240_v0  ;;  %v1870_v7 = vshrl.u32 %v1659_v41, 16  ;;  %v3120_v27 = vld [vmem:[#allocation2 + $0x60] sm:$0xe]  ;;  %5557 = vmatprep.subr.bf16.mxu0 %v8376_v19 }
 0x194   : > { %1457 = vst [vmem:[#allocation2 + $0x8c] sm:$0x1] %v1456_v4  ;;  %v2778_v9 = vsel %vm8971_vm2, %v2773_v60, %v2777_v26  ;;  %v1859_v32 = vrot.slane %v1857_v17, 4  ;;  %v1862_v20 = vrot.slane %v1860_v62, 5  ;;  %v1876_v18 = vshll.u32 %v1660_v43, 16 }
 0x195   : > { %v7414_v49 = vcombine.low %v2768_v51, %v2778_v9  ;;  %v1868_v34 = vrot.slane %v1866_v12, 5  ;;  %v2780_v47 = vshrl.u32 %v2605_v45, 16  ;;  %v3121_v13 = vld [vmem:[#allocation2 + $0x64] sm:$0xf]  ;;  %v8374_v11 = vld [vmem:[%s10704_s4 + $0x1c0] ss:$8 sps:$4 sm:$0xff]   ;;  %v879_v48 = vmul.f32 %v9381_v61, %v9186_v59 }
 0x196   : > { %v1863_v57 = vor.u32 %v1862_v20, %v1859_v32  ;;  %v1872_v23 = vrot.slane %v1870_v7, 4  ;;  %v2783_v24 = vshll.u32 %v2605_v45, 16  ;;  %v2789_v25 = vshll.u32 %v2606_v54, 16  ;;  %v8379_v10 = vld [vmem:[%s10704_s4 + $0x1d4] ss:$8 sps:$4 sm:$0xff]   ;;  %5558 = vmatpush1.bf16.msra.mxu0 %v8374_v11 }
 0x197   : > { %5809 = vmatmul.mubr.bf16.gmra.mrb[20].mxu1 %v7414_v49  ;;  %v1878_v33 = vrot.slane %v1876_v18, 5  ;;  %v2782_v26 = vrot.slane %v2780_v47, 4  ;;  %v2793_v5 = vshrl.u32 %v2606_v54, 16  ;;  %v2799_v29 = vshll.u32 %v2607_v38, 16  ;;  %v3122_v16 = vld [vmem:[#allocation2 + $0x68] sm:$0x1]  ;;  %5559 = vmatprep.subr.bf16.mxu0 %v8379_v10 }
 0x198   : > { %5818 = vmatprep.mubr.bf16.mxu1 %v7447_v6  ;;  %v1864_v52 = vrot.slane %v1863_v57, 4  ;;  %v1873_v56 = vor.u32 %v1872_v23, %v1868_v34  ;;  %v2785_v30 = vrot.slane %v2783_v24, 5  ;;  %v2791_v39 = vrot.slane %v2789_v25, 5  ;;  %v8377_v53 = vld [vmem:[%s10704_s4 + $0x1d0] ss:$8 sps:$4 sm:$0xff]  }
 0x199   : > { %v2795_v51 = vrot.slane %v2793_v5, 4  ;;  %v2801_v1 = vrot.slane %v2799_v29, 5  ;;  %v7432_v44 = vrot.slane %v3120_v27, 9  ;;  %v3246_v46 = vrot.slane %v3121_v13, 5  ;;  %v1661_v59 = vld [vmem:[#allocation2 + $0x60] sm:$0xf] }
 0x19a   : > { %v1869_v41 = vsel %vm8971_vm2, %v1864_v52, %v1868_v34  ;;  %v1874_v43 = vrot.slane %v1873_v56, 4  ;;  %v2786_v45 = vor.u32 %v2785_v30, %v2782_v26  ;;  %v918_v35 = vadd.f32 %v9303_v40, %v879_v48  ;;  %v8386_v60 = vld [vmem:[%s10704_s4 + $0x1e4] ss:$8 sps:$4 sm:$0xff]   ;;  %v8309_v12 = vld [vmem:[#allocation2 + $0x54] sm:$0xff]   ;;  %5560 = vmatpush1.bf16.msra.mxu0 %v8377_v53  ;;  %v8384_v27 = vld [vmem:[%s10704_s4 + $0x1e0] ss:$8 sps:$4 sm:$0xff]  }
 0x19b   : > { %v2796_v42 = vor.u32 %v2795_v51, %v2791_v39  ;;  %v3249_v54 = vrot.slane %v3122_v16, 5  ;;  %v877_v58 = vmul.f32 %v9381_v61, %v9188_v3  ;;  %v3247_v62 = vsel %vm9083_vm13, %v7432_v44, %v3246_v46  ;;  %v1662_v9 = vld [vmem:[#allocation2 + $0x64] sm:$0xf]  ;;  %v1663_v13 = vld [vmem:[#allocation2 + $0x68] sm:$0x1]  ;;  %5561 = vmatprep.subr.bf16.mxu0 %v8386_v60 }
 0x19c   : > { %v1879_v55 = vsel %vm8971_vm2, %v1874_v43, %v1878_v33  ;;  %v2787_v17 = vrot.slane %v2786_v45, 4  ;;  %v3248_v19 = vrot.slane %v3246_v46, 4  ;;  %v950_v6 = vmax.f32 %v918_v35, 0.0  ;;  %v8388_v25 = vld [vmem:[%s10704_s4 + $0x1f0] ss:$8 sps:$4 sm:$0xff]  }
 0x19d   : > { %v7352_v0 = vcombine.low %v1869_v41, %v1879_v55  ;;  %v2797_v4 = vrot.slane %v2796_v42, 4  ;;  %v916_v3 = vadd.f32 %v9303_v40, %v877_v58  ;;  %v1881_v7 = vshrl.u32 %v1661_v59, 16  ;;  %v8390_v29 = vld [vmem:[%s10704_s4 + $0x1f4] ss:$8 sps:$4 sm:$0xff]   ;;  %v8391_v16 = vld [vmem:[%s10704_s4 + $0x3f0] ss:$8 sps:$4 sm:$0xff]  }
 0x19e   : > { %v2792_v32 = vsel %vm8971_vm2, %v2787_v17, %v2791_v39  ;;  %v3250_v20 = vsel %vm9083_vm13, %v3248_v19, %v3249_v54  ;;  %v1884_v38 = vshll.u32 %v1661_v59, 16  ;;  %v7727_v34 = vpack.c.bf16 %v950_v6, %v950_v6  ;;  %5562 = vmatpush1.bf16.msra.mxu0 %v8384_v27  ;;  %v8393_v51 = vld [vmem:[%s10704_s4 + $0x3f4] ss:$8 sps:$4 sm:$0xff]   ;;  %v2608_v43 = vld [vmem:[#allocation2 + $0x60] sm:$0xf] }
 0x19f   : > { %5442 = vmatprep.mubr.bf16.mxu0 %v7352_v0  ;;  %v2802_v49 = vsel %vm8971_vm2, %v2797_v4, %v2801_v1  ;;  %v7448_v18 = vcombine.low %v3247_v62, %v3250_v20  ;;  %v948_v47 = vmax.f32 %v916_v3, 0.0  ;;  %v1883_v57 = vrot.slane %v1881_v7, 4  ;;  %5563 = vmatprep.subr.bf16.mxu0 %v8390_v29  ;;  %v1472_v45 = vld [vmem:[#allocation2 + $0xa8] sm:$0xf]  ;;  %v1465_v59 = vld [vmem:[#allocation2 + $0x9c] sm:$0xf] }
 0x1a0   : > { %v7415_v11 = vcombine.low %v2792_v32, %v2802_v49  ;;  %5443 = vmatmul.mubr.bf16.gmra.mrb[60].mxu0 %v8309_v12  ;;  %v1886_v23 = vrot.slane %v1884_v38, 5  ;;  %v1890_v24 = vshll.u32 %v1662_v9, 16  ;;  %v1277_v10 = vshrl.u32 %v7727_v34, 16  ;;  %5949 = vmatprep.subr.bf16.mxu1 %v8393_v51  ;;  %v2609_v55 = vld [vmem:[#allocation2 + $0x64] sm:$0xf] }
 0x1a1   : > { %v1280_v33 = vshll.u32 %v7727_v34, 16  ;;  %v7725_v26 = vpack.c.bf16 %v948_v47, %v948_v47  ;;  %v1894_v5 = vshrl.u32 %v1662_v9, 16  ;;  %v1900_v30 = vshll.u32 %v1663_v13, 16  ;;  %5950 = vmatpush1.bf16.msra.mxu1 %v8391_v16  ;;  %v2610_v0 = vld [vmem:[#allocation2 + $0x68] sm:$0x1] }
 0x1a2   : > { %5819 = vmatmul.mubr.bf16.gmra.mrb[24].mxu1 %v7415_v11  ;;  %v1887_v52 = vor.u32 %v1886_v23, %v1883_v57  ;;  %v1892_v56 = vrot.slane %v1890_v24, 5  ;;  %v880_v39 = vmul.f32 %v9381_v61, %v9205_v50  ;;  %v9565_v1 = vrot.slane %v1277_v10, 7  ;;  %5564 = vmatpush1.bf16.msra.mxu0 %v8388_v25  ;;  %v3123_v9 = vld [vmem:[#allocation2 + $0x6c] sm:$0xe]  ;;  %v8313_v23 = vld [vmem:[#allocation2 + $0x60] sm:$0xff]  }
 0x1a3   : > { %5828 = vmatprep.mubr.bf16.mxu1 %v7448_v18  ;;  %v1260_v48 = vshrl.u32 %v7725_v26, 16  ;;  %v1263_v44 = vshll.u32 %v7725_v26, 16  ;;  %v1896_v41 = vrot.slane %v1894_v5, 4  ;;  %v1902_v50 = vrot.slane %v1900_v30, 5  ;;  %v3124_v24 = vld [vmem:[#allocation2 + $0x70] sm:$0xf] }
 0x1a4   : > { %v1888_v46 = vrot.slane %v1887_v52, 4  ;;  %v919_v53 = vadd.f32 %v9303_v40, %v880_v39  ;;  %v878_v42 = vmul.f32 %v9381_v61, %v9207_v8  ;;  %v1282_v35 = vor.u32 %v1280_v33, %v9565_v1  ;;  %v3125_v5 = vld [vmem:[#allocation2 + $0x74] sm:$0x1]  ;;  %v1476_v39 = vld [vmem:[#allocation2 + $0xb0] sm:$0x1] }
 0x1a5   : > { %v1283_v54 = vrot.slane %v9565_v1, 4  ;;  %v9572_v58 = vrot.slane %v1260_v48, 7  ;;  %v1897_v60 = vor.u32 %v1896_v41, %v1892_v56  ;;  %v2804_v4 = vshrl.u32 %v2608_v43, 16 }
 0x1a6   : > { %v1893_v17 = vsel %vm8971_vm2, %v1888_v46, %v1892_v56  ;;  %v951_v62 = vmax.f32 %v919_v53, 0.0  ;;  %v917_v19 = vadd.f32 %v9303_v40, %v878_v42  ;;  %v1473_v8 = vsel %vm9014_vm8, %v1282_v35, %v1472_v45  ;;  %v8397_v40 = vld [vmem:[%s10704_s4 + $0x404] ss:$8 sps:$4 sm:$0xff]  }
 0x1a7   : > { %v1265_v6 = vor.u32 %v1263_v44, %v9572_v58  ;;  %v1266_v12 = vrot.slane %v9572_v58, 4  ;;  %v1898_v3 = vrot.slane %v1897_v60, 4  ;;  %1474 = vst [vmem:[#allocation2 + $0xa8] sm:$0xf] %v1473_v8  ;;  %v2806_v7 = vrot.slane %v2804_v4, 4  ;;  %6112 = vmatprep.subr.bf16.mxu1 %v8397_v40 }
 0x1a8   : > { %v7728_v32 = vpack.c.bf16 %v951_v62, %v951_v62  ;;  %v949_v20 = vmax.f32 %v917_v19, 0.0  ;;  %v2807_v38 = vshll.u32 %v2608_v43, 16  ;;  %v2813_v34 = vshll.u32 %v2609_v55, 16  ;;  %v1664_v44 = vld [vmem:[#allocation2 + $0x6c] sm:$0xf] }
 0x1a9   : > { %v1466_v27 = vsel %vm9014_vm8, %v1265_v6, %v1465_v59  ;;  %v1903_v49 = vsel %vm8971_vm2, %v1898_v3, %v1902_v50  ;;  %v2817_v18 = vshrl.u32 %v2609_v55, 16  ;;  %v2823_v26 = vshll.u32 %v2610_v0, 16  ;;  %v1469_v50 = vld [vmem:[#allocation2 + $0xa4] sm:$0x1]  ;;  %v1665_v62 = vld [vmem:[#allocation2 + $0x70] sm:$0xf] }
 0x1aa   : > { %1467 = vst [vmem:[#allocation2 + $0x9c] sm:$0xf] %v1466_v27  ;;  %v7353_v47 = vcombine.low %v1893_v17, %v1903_v49  ;;  %v1285_v13 = vshrl.u32 %v7728_v32, 16  ;;  %v1288_v11 = vshll.u32 %v7728_v32, 16  ;;  %v7726_v57 = vpack.c.bf16 %v949_v20, %v949_v20  ;;  %v2611_v19 = vld [vmem:[#allocation2 + $0x6c] sm:$0xf] }
 0x1ab   : > { %v2809_v25 = vrot.slane %v2807_v38, 5  ;;  %v2815_v10 = vrot.slane %v2813_v34, 5  ;;  %v2819_v33 = vrot.slane %v2817_v18, 4  ;;  %v7433_v30 = vrot.slane %v3123_v9, 9  ;;  %v1666_v6 = vld [vmem:[#allocation2 + $0x74] sm:$0x1] }
 0x1ac   : > { %5452 = vmatprep.mubr.bf16.mxu0 %v7353_v47  ;;  %v1287_v29 = vrot.slane %v1285_v13, 7  ;;  %v1268_v52 = vshrl.u32 %v7726_v57, 16  ;;  %v1271_v56 = vshll.u32 %v7726_v57, 16  ;;  %v2825_v1 = vrot.slane %v2823_v26, 5  ;;  %v2612_v3 = vld [vmem:[#allocation2 + $0x70] sm:$0xf] }
 0x1ad   : > { %v2810_v16 = vor.u32 %v2809_v25, %v2806_v7  ;;  %v2820_v51 = vor.u32 %v2819_v33, %v2815_v10  ;;  %5453 = vmatmul.mubr.bf16.gmra.mrb[64].mxu0 %v8313_v23  ;;  %v3253_v48 = vrot.slane %v3124_v24, 5  ;;  %v3256_v46 = vrot.slane %v3125_v5, 5  ;;  %v2613_v38 = vld [vmem:[#allocation2 + $0x74] sm:$0x1]  ;;  %v3126_v18 = vld [vmem:[#allocation2 + $0x78] sm:$0xe] }
 0x1ae   : > { %v1290_v41 = vor.u32 %v1288_v11, %v1287_v29  ;;  %v1292_v43 = vrot.slane %v1287_v29, 4  ;;  %v1270_v45 = vrot.slane %v1268_v52, 7  ;;  %v1908_v27 = vshll.u32 %v1664_v44, 16  ;;  %v3127_v47 = vld [vmem:[#allocation2 + $0x7c] sm:$0xf] }
 0x1af   : > { %v2811_v53 = vrot.slane %v2810_v16, 4  ;;  %v2821_v42 = vrot.slane %v2820_v51, 4  ;;  %v3254_v35 = vsel %vm9083_vm13, %v7433_v30, %v3253_v48  ;;  %v3255_v58 = vrot.slane %v3253_v48, 4 }
 0x1b0   : > { %v1291_v59 = vsel %vm9021_vm9, %v1283_v54, %v1290_v41  ;;  %v1477_v60 = vsel %vm9027_vm10, %v1292_v43, %v1476_v39  ;;  %v1273_v55 = vor.u32 %v1271_v56, %v1270_v45  ;;  %v1275_v17 = vrot.slane %v1270_v45, 4 }
 0x1b1   : > { %1475 = vst [vmem:[#allocation2 + $0xac] sm:$0xf] %v1291_v59  ;;  %1478 = vst [vmem:[#allocation2 + $0xb0] sm:$0x1] %v1477_v60  ;;  %v2816_v0 = vsel %vm8971_vm2, %v2811_v53, %v2815_v10  ;;  %v2826_v4 = vsel %vm8971_vm2, %v2821_v42, %v2825_v1  ;;  %v3257_v8 = vsel %vm9083_vm13, %v3255_v58, %v3256_v46  ;;  %v1905_v54 = vshrl.u32 %v1664_v44, 16 }
 0x1b2   : > { %v1274_v9 = vsel %vm9021_vm9, %v1266_v12, %v1273_v55  ;;  %v1470_v32 = vsel %vm9027_vm10, %v1275_v17, %v1469_v50  ;;  %v7416_v20 = vcombine.low %v2816_v0, %v2826_v4  ;;  %v7449_v7 = vcombine.low %v3254_v35, %v3257_v8  ;;  %v3128_v1 = vld [vmem:[#allocation2 + $0x80] sm:$0x1]  ;;  %v1667_v59 = vld [vmem:[#allocation2 + $0x78] sm:$0xf]  ;;  %v8323_v4 = vld [vmem:[#allocation2 + $0x6c] sm:$0xff]  }
 0x1b3   : > { %1468 = vst [vmem:[#allocation2 + $0xa0] sm:$0xf] %v1274_v9  ;;  %1471 = vst [vmem:[#allocation2 + $0xa4] sm:$0x1] %v1470_v32  ;;  %v1907_v40 = vrot.slane %v1905_v54, 4  ;;  %v1914_v49 = vshll.u32 %v1665_v62, 16  ;;  %v883_v51 = vmul.f32 %v9381_v61, %v9222_v15  ;;  %v881_v8 = vmul.f32 %v9381_v61, %v9229_v63 }
 0x1b4   : > { %v1918_v34 = vshrl.u32 %v1665_v62, 16  ;;  %5829 = vmatmul.mubr.bf16.gmra.mrb[28].mxu1 %v7416_v20  ;;  %v1924_v13 = vshll.u32 %v1666_v6, 16  ;;  %v2828_v11 = vshrl.u32 %v2611_v19, 16  ;;  %v2831_v57 = vshll.u32 %v2611_v19, 16  ;;  %v8497_v53 = vld [vmem:[%s10703_s3] ss:$0 sm:$0xff] }
 0x1b5   : > { %v2837_v23 = vshll.u32 %v2612_v3, 16  ;;  %5838 = vmatprep.mubr.bf16.mxu1 %v7449_v7  ;;  %v1910_v12 = vrot.slane %v1908_v27, 5  ;;  %v1916_v24 = vrot.slane %v1914_v49, 5  ;;  %v2841_v10 = vshrl.u32 %v2612_v3, 16  ;;  %v1668_v6 = vld [vmem:[#allocation2 + $0x7c] sm:$0xf] }
 0x1b6   : > { %v1920_v25 = vrot.slane %v1918_v34, 4  ;;  %v1926_v33 = vrot.slane %v1924_v13, 5  ;;  %v2830_v26 = vrot.slane %v2828_v11, 4  ;;  %v2833_v5 = vrot.slane %v2831_v57, 5  ;;  %v1669_v9 = vld [vmem:[#allocation2 + $0x80] sm:$0x1] }
 0x1b7   : > { %v2839_v29 = vrot.slane %v2837_v23, 5  ;;  %v1911_v52 = vor.u32 %v1910_v12, %v1907_v40  ;;  %v2843_v30 = vrot.slane %v2841_v10, 4  ;;  %v2847_v39 = vshll.u32 %v2613_v38, 16  ;;  %v2614_v23 = vld [vmem:[#allocation2 + $0x78] sm:$0xf] }
 0x1b8   : > { %v1921_v56 = vor.u32 %v1920_v25, %v1916_v24  ;;  %v2834_v16 = vor.u32 %v2833_v5, %v2830_v26  ;;  %v7434_v48 = vrot.slane %v3126_v18, 9  ;;  %v3260_v44 = vrot.slane %v3127_v47, 5  ;;  %v1486_v26 = vld [vmem:[#allocation2 + $0xc0] sm:$0xf] }
 0x1b9   : > { %v1912_v41 = vrot.slane %v1911_v52, 4  ;;  %v2844_v45 = vor.u32 %v2843_v30, %v2839_v29  ;;  %v2849_v46 = vrot.slane %v2847_v39, 5  ;;  %v922_v42 = vadd.f32 %v8497_v53, %v883_v51 }
 0x1ba   : > { %v1922_v43 = vrot.slane %v1921_v56, 4  ;;  %v2835_v50 = vrot.slane %v2834_v16, 4  ;;  %v3261_v35 = vsel %vm9083_vm13, %v7434_v48, %v3260_v44  ;;  %v3262_v58 = vrot.slane %v3260_v44, 4  ;;  %v2615_v16 = vld [vmem:[#allocation2 + $0x7c] sm:$0xf] }
 0x1bb   : > { %v1917_v15 = vsel %vm8971_vm2, %v1912_v41, %v1916_v24  ;;  %v2845_v55 = vrot.slane %v2844_v45, 4  ;;  %v3263_v17 = vrot.slane %v3128_v1, 5  ;;  %v954_v0 = vmax.f32 %v922_v42, 0.0  ;;  %v2616_v42 = vld [vmem:[#allocation2 + $0x80] sm:$0x1] }
 0x1bc   : > { %v1927_v60 = vsel %vm8971_vm2, %v1922_v43, %v1926_v33  ;;  %v2840_v19 = vsel %vm8971_vm2, %v2835_v50, %v2839_v29  ;;  %v1929_v32 = vshrl.u32 %v1667_v59, 16  ;;  %v1932_v20 = vshll.u32 %v1667_v59, 16 }
 0x1bd   : > { %v7354_v62 = vcombine.low %v1917_v15, %v1927_v60  ;;  %v2850_v54 = vsel %vm8971_vm2, %v2845_v55, %v2849_v46  ;;  %v3264_v3 = vsel %vm9083_vm13, %v3262_v58, %v3263_v17  ;;  %v7731_v38 = vpack.c.bf16 %v954_v0, %v954_v0  ;;  %v3129_v17 = vld [vmem:[#allocation2 + $0x84] sm:$0xe] }
 0x1be   : > { %v7417_v7 = vcombine.low %v2840_v19, %v2850_v54  ;;  %v7450_v40 = vcombine.low %v3261_v35, %v3264_v3  ;;  %v920_v27 = vadd.f32 %v8497_v53, %v881_v8  ;;  %v1931_v49 = vrot.slane %v1929_v32, 4  ;;  %v3131_v8 = vld [vmem:[#allocation2 + $0x8c] sm:$0x1]  ;;  %v8333_v32 = vld [vmem:[#allocation2 + $0x78] sm:$0xff]  }
 0x1bf   : > { %5462 = vmatprep.mubr.bf16.mxu0 %v7354_v62  ;;  %v1934_v34 = vrot.slane %v1932_v20, 5  ;;  %v1938_v18 = vshll.u32 %v1668_v6, 16  ;;  %v1942_v63 = vshrl.u32 %v1668_v6, 16  ;;  %v1311_v47 = vshrl.u32 %v7731_v38, 16  ;;  %v3130_v62 = vld [vmem:[#allocation2 + $0x88] sm:$0xf] }
 0x1c0   : > { %5463 = vmatmul.mubr.bf16.gmra.mrb[68].mxu0 %v8323_v4  ;;  %5839 = vmatmul.mubr.bf16.gmra.mrb[32].mxu1 %v7417_v7  ;;  %v1314_v13 = vshll.u32 %v7731_v38, 16  ;;  %v952_v11 = vmax.f32 %v920_v27, 0.0  ;;  %v1948_v57 = vshll.u32 %v1669_v9, 16  ;;  %v884_v10 = vmul.f32 %v9381_v61, %v9240_v28  ;;  %v1479_v28 = vld [vmem:[#allocation2 + $0xb4] sm:$0xf] }
 0x1c1   : > { %5848 = vmatprep.mubr.bf16.mxu1 %v7450_v40  ;;  %v1935_v12 = vor.u32 %v1934_v34, %v1931_v49  ;;  %v1940_v24 = vrot.slane %v1938_v18, 5  ;;  %v1944_v25 = vrot.slane %v1942_v63, 4  ;;  %v9625_v33 = vrot.slane %v1311_v47, 7  ;;  %v1490_v63 = vld [vmem:[#allocation2 + $0xc8] sm:$0x1] }
 0x1c2   : > { %v7729_v5 = vpack.c.bf16 %v952_v11, %v952_v11  ;;  %v1950_v29 = vrot.slane %v1948_v57, 5  ;;  %v882_v52 = vmul.f32 %v9381_v61, %v9244_v21  ;;  %v923_v39 = vadd.f32 %v8497_v53, %v884_v10  ;;  %v1483_v10 = vld [vmem:[#allocation2 + $0xbc] sm:$0x1] }
 0x1c3   : > { %v1936_v56 = vrot.slane %v1935_v12, 4  ;;  %v1945_v30 = vor.u32 %v1944_v25, %v1940_v24  ;;  %v2852_v51 = vshrl.u32 %v2614_v23, 16  ;;  %v1316_v1 = vor.u32 %v1314_v13, %v9625_v33  ;;  %v1670_v25 = vld [vmem:[#allocation2 + $0x84] sm:$0xf] }
 0x1c4   : > { %v1317_v48 = vrot.slane %v9625_v33, 4  ;;  %v1294_v44 = vshrl.u32 %v7729_v5, 16  ;;  %v1297_v41 = vshll.u32 %v7729_v5, 16  ;;  %v955_v46 = vmax.f32 %v923_v39, 0.0 }
 0x1c5   : > { %v1941_v43 = vsel %vm8971_vm2, %v1936_v56, %v1940_v24  ;;  %v1946_v45 = vrot.slane %v1945_v30, 4  ;;  %v921_v50 = vadd.f32 %v8497_v53, %v882_v52  ;;  %v1487_v21 = vsel %vm9014_vm8, %v1316_v1, %v1486_v26  ;;  %v1671_v52 = vld [vmem:[#allocation2 + $0x88] sm:$0xf]  ;;  %v2617_v1 = vld [vmem:[#allocation2 + $0x84] sm:$0xf] }
 0x1c6   : > { %v9635_v61 = vrot.slane %v1294_v44, 7  ;;  %v2854_v35 = vrot.slane %v2852_v51, 4  ;;  %v2855_v58 = vshll.u32 %v2614_v23, 16  ;;  %1488 = vst [vmem:[#allocation2 + $0xc0] sm:$0xf] %v1487_v21  ;;  %v7732_v15 = vpack.c.bf16 %v955_v46, %v955_v46 }
 0x1c7   : > { %v1951_v59 = vsel %vm8971_vm2, %v1946_v45, %v1950_v29  ;;  %v953_v60 = vmax.f32 %v921_v50, 0.0  ;;  %v2861_v55 = vshll.u32 %v2615_v16, 16  ;;  %v2865_v38 = vshrl.u32 %v2615_v16, 16  ;;  %v1672_v51 = vld [vmem:[#allocation2 + $0x8c] sm:$0x1] }
 0x1c8   : > { %v1299_v19 = vor.u32 %v1297_v41, %v9635_v61  ;;  %v1300_v53 = vrot.slane %v9635_v61, 4  ;;  %v7355_v0 = vcombine.low %v1941_v43, %v1951_v59  ;;  %v2857_v4 = vrot.slane %v2855_v58, 5  ;;  %v2618_v45 = vld [vmem:[#allocation2 + $0x88] sm:$0xf]  ;;  %v2619_v59 = vld [vmem:[#allocation2 + $0x8c] sm:$0x1] }
 0x1c9   : > { %v1319_v6 = vshrl.u32 %v7732_v15, 16  ;;  %v1322_v54 = vshll.u32 %v7732_v15, 16  ;;  %v7730_v3 = vpack.c.bf16 %v953_v60, %v953_v60  ;;  %v2863_v9 = vrot.slane %v2861_v55, 5  ;;  %v3132_v15 = vld [vmem:[#allocation2 + $0x90] sm:$0xe] }
 0x1ca   : > { %v1480_v20 = vsel %vm9014_vm8, %v1299_v19, %v1479_v28  ;;  %5472 = vmatprep.mubr.bf16.mxu0 %v7355_v0  ;;  %v2858_v7 = vor.u32 %v2857_v4, %v2854_v35  ;;  %v2871_v40 = vshll.u32 %v2616_v42, 16  ;;  %v7435_v18 = vrot.slane %v3129_v17, 9  ;;  %v3134_v4 = vld [vmem:[#allocation2 + $0x98] sm:$0x1] }
 0x1cb   : > { %1481 = vst [vmem:[#allocation2 + $0xb4] sm:$0xf] %v1480_v20  ;;  %v1321_v27 = vrot.slane %v1319_v6, 7  ;;  %v1302_v49 = vshrl.u32 %v7730_v3, 16  ;;  %v1305_v34 = vshll.u32 %v7730_v3, 16  ;;  %5473 = vmatmul.mubr.bf16.gmra.mrb[72].mxu0 %v8333_v32  ;;  %v2867_v13 = vrot.slane %v2865_v38, 4 }
 0x1cc   : > { %v2859_v47 = vrot.slane %v2858_v7, 4  ;;  %v2873_v11 = vrot.slane %v2871_v40, 5  ;;  %v3267_v57 = vrot.slane %v3130_v62, 5  ;;  %v3270_v22 = vrot.slane %v3131_v8, 5  ;;  %v3133_v62 = vld [vmem:[#allocation2 + $0x94] sm:$0xf] }
 0x1cd   : > { %v1324_v23 = vor.u32 %v1322_v54, %v1321_v27  ;;  %v1326_v12 = vrot.slane %v1321_v27, 4  ;;  %v1304_v24 = vrot.slane %v1302_v49, 7  ;;  %v2868_v26 = vor.u32 %v2867_v13, %v2863_v9  ;;  %v1673_v38 = vld [vmem:[#allocation2 + $0x90] sm:$0xf] }
 0x1ce   : > { %v2864_v33 = vsel %vm8971_vm2, %v2859_v47, %v2863_v9  ;;  %v3268_v5 = vsel %vm9083_vm13, %v7435_v18, %v3267_v57  ;;  %v3269_v29 = vrot.slane %v3267_v57, 4  ;;  %v1953_v28 = vshrl.u32 %v1670_v25, 16  ;;  %v1674_v18 = vld [vmem:[#allocation2 + $0x94] sm:$0xf] }
 0x1cf   : > { %v1325_v56 = vsel %vm9021_vm9, %v1317_v48, %v1324_v23  ;;  %v1491_v30 = vsel %vm9027_vm10, %v1326_v12, %v1490_v63  ;;  %v1307_v39 = vor.u32 %v1305_v34, %v1304_v24  ;;  %v1309_v16 = vrot.slane %v1304_v24, 4 }
 0x1d0   : > { %1489 = vst [vmem:[#allocation2 + $0xc4] sm:$0xf] %v1325_v56  ;;  %1492 = vst [vmem:[#allocation2 + $0xc8] sm:$0x1] %v1491_v30  ;;  %v2869_v44 = vrot.slane %v2868_v26, 4  ;;  %v3271_v41 = vsel %vm9083_vm13, %v3269_v29, %v3270_v22  ;;  %v1956_v43 = vshll.u32 %v1670_v25, 16 }
 0x1d1   : > { %v1308_v46 = vsel %vm9021_vm9, %v1300_v53, %v1307_v39  ;;  %v1484_v48 = vsel %vm9027_vm10, %v1309_v16, %v1483_v10  ;;  %v7451_v50 = vcombine.low %v3268_v5, %v3271_v41  ;;  %v1962_v21 = vshll.u32 %v1671_v52, 16  ;;  %v2620_v22 = vld [vmem:[#allocation2 + $0x90] sm:$0xf]  ;;  %v1675_v26 = vld [vmem:[#allocation2 + $0x98] sm:$0x1] }
 0x1d2   : > { %1482 = vst [vmem:[#allocation2 + $0xb8] sm:$0xf] %v1308_v46  ;;  %1485 = vst [vmem:[#allocation2 + $0xbc] sm:$0x1] %v1484_v48  ;;  %v2874_v61 = vsel %vm8971_vm2, %v2869_v44, %v2873_v11  ;;  %v1955_v42 = vrot.slane %v1953_v28, 4  ;;  %v1958_v35 = vrot.slane %v1956_v43, 5 }
 0x1d3   : > { %v1966_v58 = vshrl.u32 %v1671_v52, 16  ;;  %v7418_v60 = vcombine.low %v2864_v33, %v2874_v61  ;;  %v1964_v55 = vrot.slane %v1962_v21, 5  ;;  %v1972_v17 = vshll.u32 %v1672_v51, 16  ;;  %v8343_v33 = vld [vmem:[#allocation2 + $0x84] sm:$0xff]   ;;  %v2621_v16 = vld [vmem:[#allocation2 + $0x94] sm:$0xf] }
 0x1d4   : > { %v2876_v31 = vshrl.u32 %v2617_v1, 16  ;;  %v1959_v19 = vor.u32 %v1958_v35, %v1955_v42  ;;  %v2879_v53 = vshll.u32 %v2617_v1, 16  ;;  %v2885_v0 = vshll.u32 %v2618_v45, 16  ;;  %v2622_v51 = vld [vmem:[#allocation2 + $0x98] sm:$0x1] }
 0x1d5   : > { %v1968_v36 = vrot.slane %v1966_v58, 4  ;;  %5849 = vmatmul.mubr.bf16.gmra.mrb[36].mxu1 %v7418_v60  ;;  %v1974_v8 = vrot.slane %v1972_v17, 5  ;;  %v2889_v54 = vshrl.u32 %v2618_v45, 16  ;;  %v2895_v3 = vshll.u32 %v2619_v59, 16  ;;  %v3135_v43 = vld [vmem:[#allocation2 + $0x9c] sm:$0xe] }
 0x1d6   : > { %v2878_v6 = vrot.slane %v2876_v31, 4  ;;  %5858 = vmatprep.mubr.bf16.mxu1 %v7451_v50  ;;  %v1960_v9 = vrot.slane %v1959_v19, 4  ;;  %v2881_v20 = vrot.slane %v2879_v53, 5  ;;  %v2887_v7 = vrot.slane %v2885_v0, 5  ;;  %v3136_v21 = vld [vmem:[#allocation2 + $0xa0] sm:$0xf] }
 0x1d7   : > { %v1969_v32 = vor.u32 %v1968_v36, %v1964_v55  ;;  %v2891_v40 = vrot.slane %v2889_v54, 4  ;;  %v2897_v27 = vrot.slane %v2895_v3, 5  ;;  %v7436_v49 = vrot.slane %v3132_v15, 9  ;;  %v3137_v59 = vld [vmem:[#allocation2 + $0xa4] sm:$0x1] }
 0x1d8   : > { %v3274_v34 = vrot.slane %v3133_v62, 5  ;;  %v1965_v63 = vsel %vm8971_vm2, %v1960_v9, %v1964_v55  ;;  %v2882_v13 = vor.u32 %v2881_v20, %v2878_v6  ;;  %v3277_v11 = vrot.slane %v3134_v4, 5  ;;  %v1676_v53 = vld [vmem:[#allocation2 + $0x9c] sm:$0xf]  ;;  %v1677_v54 = vld [vmem:[#allocation2 + $0xa0] sm:$0xf] }
 0x1d9   : > { %v1970_v47 = vrot.slane %v1969_v32, 4  ;;  %v2892_v57 = vor.u32 %v2891_v40, %v2887_v7  ;;  %v1977_v24 = vshrl.u32 %v1673_v38, 16  ;;  %v1980_v5 = vshll.u32 %v1673_v38, 16 }
 0x1da   : > { %v3275_v23 = vsel %vm9083_vm13, %v7436_v49, %v3274_v34  ;;  %v3276_v12 = vrot.slane %v3274_v34, 4  ;;  %v2883_v10 = vrot.slane %v2882_v13, 4  ;;  %v1986_v29 = vshll.u32 %v1674_v18, 16  ;;  %v1678_v49 = vld [vmem:[#allocation2 + $0xa4] sm:$0x1] }
 0x1db   : > { %v1975_v25 = vsel %vm8971_vm2, %v1970_v47, %v1974_v8  ;;  %v2893_v56 = vrot.slane %v2892_v57, 4  ;;  %v1979_v39 = vrot.slane %v1977_v24, 4  ;;  %v1982_v41 = vrot.slane %v1980_v5, 5  ;;  %v2623_v34 = vld [vmem:[#allocation2 + $0x9c] sm:$0xf]  ;;  %v8353_v5 = vld [vmem:[#allocation2 + $0x90] sm:$0xff]  }
 0x1dc   : > { %v7356_v52 = vcombine.low %v1965_v63, %v1975_v25  ;;  %v3278_v30 = vsel %vm9083_vm13, %v3276_v12, %v3277_v11  ;;  %v2888_v1 = vsel %vm8971_vm2, %v2883_v10, %v2887_v7  ;;  %v1988_v28 = vrot.slane %v1986_v29, 5 }
 0x1dd   : > { %v7452_v44 = vcombine.low %v3275_v23, %v3278_v30  ;;  %v2898_v45 = vsel %vm8971_vm2, %v2893_v56, %v2897_v27  ;;  %v1990_v46 = vshrl.u32 %v1674_v18, 16  ;;  %v1996_v48 = vshll.u32 %v1675_v26, 16  ;;  %v2625_v30 = vld [vmem:[#allocation2 + $0xa4] sm:$0x1] }
 0x1de   : > { %5482 = vmatprep.mubr.bf16.mxu0 %v7356_v52  ;;  %v2900_v50 = vshrl.u32 %v2620_v22, 16  ;;  %v7419_v61 = vcombine.low %v2888_v1, %v2898_v45  ;;  %v1983_v42 = vor.u32 %v1982_v41, %v1979_v39  ;;  %v2903_v35 = vshll.u32 %v2620_v22, 16 }
 0x1df   : > { %5483 = vmatmul.mubr.bf16.gmra.mrb[76].mxu0 %v8343_v33  ;;  %v2909_v58 = vshll.u32 %v2621_v16, 16  ;;  %v1992_v15 = vrot.slane %v1990_v46, 4  ;;  %v1998_v60 = vrot.slane %v1996_v48, 5  ;;  %v2913_v17 = vshrl.u32 %v2621_v16, 16  ;;  %v2624_v33 = vld [vmem:[#allocation2 + $0xa0] sm:$0xf] }
 0x1e0   : > { %v2902_v55 = vrot.slane %v2900_v50, 4  ;;  %5859 = vmatmul.mubr.bf16.gmra.mrb[40].mxu1 %v7419_v61  ;;  %v1984_v31 = vrot.slane %v1983_v42, 4  ;;  %v2905_v62 = vrot.slane %v2903_v35, 5  ;;  %v2919_v36 = vshll.u32 %v2622_v51, 16  ;;  %v3139_v46 = vld [vmem:[#allocation2 + $0xac] sm:$0xf] }
 0x1e1   : > { %v2911_v19 = vrot.slane %v2909_v58, 5  ;;  %5868 = vmatprep.mubr.bf16.mxu1 %v7452_v44  ;;  %v1993_v0 = vor.u32 %v1992_v15, %v1988_v28  ;;  %v2915_v4 = vrot.slane %v2913_v17, 4  ;;  %v7437_v8 = vrot.slane %v3135_v43, 9  ;;  %v3138_v44 = vld [vmem:[#allocation2 + $0xa8] sm:$0xe] }
 0x1e2   : > { %v3281_v6 = vrot.slane %v3136_v21, 5  ;;  %v1989_v3 = vsel %vm8971_vm2, %v1984_v31, %v1988_v28  ;;  %v2906_v9 = vor.u32 %v2905_v62, %v2902_v55  ;;  %v2921_v32 = vrot.slane %v2919_v36, 5  ;;  %v3140_v48 = vld [vmem:[#allocation2 + $0xb0] sm:$0x1]  ;;  %v1679_v35 = vld [vmem:[#allocation2 + $0xa8] sm:$0xf] }
 0x1e3   : > { %v3284_v20 = vrot.slane %v3137_v59, 5  ;;  %v1994_v7 = vrot.slane %v1993_v0, 4  ;;  %v2916_v38 = vor.u32 %v2915_v4, %v2911_v19  ;;  %v2001_v63 = vshrl.u32 %v1676_v53, 16  ;;  %v1680_v58 = vld [vmem:[#allocation2 + $0xac] sm:$0xf] }
 0x1e4   : > { %v3282_v40 = vsel %vm9083_vm13, %v7437_v8, %v3281_v6  ;;  %v3283_v27 = vrot.slane %v3281_v6, 4  ;;  %v2907_v18 = vrot.slane %v2906_v9, 4  ;;  %v2004_v47 = vshll.u32 %v1676_v53, 16  ;;  %v1681_v8 = vld [vmem:[#allocation2 + $0xb0] sm:$0x1] }
 0x1e5   : > { %v2010_v13 = vshll.u32 %v1677_v54, 16  ;;  %v1999_v11 = vsel %vm8971_vm2, %v1994_v7, %v1998_v60  ;;  %v2917_v57 = vrot.slane %v2916_v38, 4  ;;  %v2014_v12 = vshrl.u32 %v1677_v54, 16  ;;  %v8363_v7 = vld [vmem:[#allocation2 + $0x9c] sm:$0xff]  }
 0x1e6   : > { %v3285_v23 = vsel %vm9083_vm13, %v3283_v27, %v3284_v20  ;;  %v7357_v24 = vcombine.low %v1989_v3, %v1999_v11  ;;  %v2912_v22 = vsel %vm8971_vm2, %v2907_v18, %v2911_v19  ;;  %v2003_v10 = vrot.slane %v2001_v63, 4 }
 0x1e7   : > { %v7453_v25 = vcombine.low %v3282_v40, %v3285_v23  ;;  %v2922_v26 = vsel %vm8971_vm2, %v2917_v57, %v2921_v32  ;;  %v2006_v29 = vrot.slane %v2004_v47, 5  ;;  %v2012_v52 = vrot.slane %v2010_v13, 5  ;;  %v2626_v32 = vld [vmem:[#allocation2 + $0xa8] sm:$0xf]  ;;  %v2627_v47 = vld [vmem:[#allocation2 + $0xac] sm:$0xf] }
 0x1e8   : > { %v2016_v56 = vrot.slane %v2014_v12, 4  ;;  %5492 = vmatprep.mubr.bf16.mxu0 %v7357_v24  ;;  %v7420_v39 = vcombine.low %v2912_v22, %v2922_v26  ;;  %v2020_v16 = vshll.u32 %v1678_v49, 16  ;;  %v2924_v51 = vshrl.u32 %v2623_v34, 16  ;;  %v2628_v13 = vld [vmem:[#allocation2 + $0xb0] sm:$0x1] }
 0x1e9   : > { %v2927_v1 = vshll.u32 %v2623_v34, 16  ;;  %5493 = vmatmul.mubr.bf16.gmra.mrb[80].mxu0 %v8353_v5  ;;  %v2007_v41 = vor.u32 %v2006_v29, %v2003_v10  ;;  %v2933_v43 = vshll.u32 %v2624_v33, 16  ;;  %v2937_v45 = vshrl.u32 %v2624_v33, 16  ;;  %v3141_v24 = vld [vmem:[#allocation2 + $0xb4] sm:$0xe] }
 0x1ea   : > { %v2017_v28 = vor.u32 %v2016_v56, %v2012_v52  ;;  %5869 = vmatmul.mubr.bf16.gmra.mrb[44].mxu1 %v7420_v39  ;;  %v2022_v50 = vrot.slane %v2020_v16, 5  ;;  %v2926_v21 = vrot.slane %v2924_v51, 4  ;;  %v2943_v42 = vshll.u32 %v2625_v30, 16  ;;  %v3142_v22 = vld [vmem:[#allocation2 + $0xb8] sm:$0xf] }
 0x1eb   : > { %v2929_v61 = vrot.slane %v2927_v1, 5  ;;  %5878 = vmatprep.mubr.bf16.mxu1 %v7453_v25  ;;  %v2008_v59 = vrot.slane %v2007_v41, 4  ;;  %v2935_v60 = vrot.slane %v2933_v43, 5  ;;  %v2939_v55 = vrot.slane %v2937_v45, 4  ;;  %v3143_v5 = vld [vmem:[#allocation2 + $0xbc] sm:$0x1] }
 0x1ec   : > { %v2018_v15 = vrot.slane %v2017_v28, 4  ;;  %v2945_v31 = vrot.slane %v2943_v42, 5  ;;  %v7438_v62 = vrot.slane %v3138_v44, 9  ;;  %v3288_v19 = vrot.slane %v3139_v46, 5  ;;  %v1682_v29 = vld [vmem:[#allocation2 + $0xb4] sm:$0xf] }
 0x1ed   : > { %v2930_v17 = vor.u32 %v2929_v61, %v2926_v21  ;;  %v2013_v36 = vsel %vm8971_vm2, %v2008_v59, %v2012_v52  ;;  %v2940_v0 = vor.u32 %v2939_v55, %v2935_v60  ;;  %v3291_v4 = vrot.slane %v3140_v48, 5 }
 0x1ee   : > { %v2023_v53 = vsel %vm8971_vm2, %v2018_v15, %v2022_v50  ;;  %v3289_v3 = vsel %vm9083_vm13, %v7438_v62, %v3288_v19  ;;  %v3290_v9 = vrot.slane %v3288_v19, 4  ;;  %v2025_v38 = vshrl.u32 %v1679_v35, 16 }
 0x1ef   : > { %v7358_v6 = vcombine.low %v2013_v36, %v2023_v53  ;;  %v2931_v54 = vrot.slane %v2930_v17, 4  ;;  %v2941_v20 = vrot.slane %v2940_v0, 4  ;;  %v2028_v40 = vshll.u32 %v1679_v35, 16  ;;  %v2629_v0 = vld [vmem:[#allocation2 + $0xb4] sm:$0xf] }
 0x1f0   : > { %v2034_v27 = vshll.u32 %v1680_v58, 16  ;;  %v3292_v34 = vsel %vm9083_vm13, %v3290_v9, %v3291_v4  ;;  %v2038_v18 = vshrl.u32 %v1680_v58, 16  ;;  %v2044_v63 = vshll.u32 %v1681_v8, 16  ;;  %v1683_v58 = vld [vmem:[#allocation2 + $0xb8] sm:$0xf]  ;;  %v8373_v8 = vld [vmem:[#allocation2 + $0xa8] sm:$0xff]  }
 0x1f1   : > { %5502 = vmatprep.mubr.bf16.mxu0 %v7358_v6  ;;  %v2936_v49 = vsel %vm8971_vm2, %v2931_v54, %v2935_v60  ;;  %v2946_v11 = vsel %vm8971_vm2, %v2941_v20, %v2945_v31  ;;  %v7454_v57 = vcombine.low %v3289_v3, %v3292_v34  ;;  %v2027_v23 = vrot.slane %v2025_v38, 4  ;;  %v1684_v31 = vld [vmem:[#allocation2 + $0xbc] sm:$0x1]  ;;  %v2630_v9 = vld [vmem:[#allocation2 + $0xb8] sm:$0xf] }
 0x1f2   : > { %5503 = vmatmul.mubr.bf16.gmra.mrb[84].mxu0 %v8363_v7  ;;  %v2030_v12 = vrot.slane %v2028_v40, 5  ;;  %v7421_v25 = vcombine.low %v2936_v49, %v2946_v11  ;;  %v2036_v10 = vrot.slane %v2034_v27, 5  ;;  %v2040_v33 = vrot.slane %v2038_v18, 4  ;;  %v3145_v27 = vld [vmem:[#allocation2 + $0xc4] sm:$0xf] }
 0x1f3   : > { %v2046_v26 = vrot.slane %v2044_v63, 5  ;;  %v2948_v56 = vshrl.u32 %v2626_v32, 16  ;;  %v2951_v30 = vshll.u32 %v2626_v32, 16  ;;  %v2957_v39 = vshll.u32 %v2627_v47, 16  ;;  %v3144_v32 = vld [vmem:[#allocation2 + $0xc0] sm:$0xe] }
 0x1f4   : > { %v2031_v52 = vor.u32 %v2030_v12, %v2027_v23  ;;  %5879 = vmatmul.mubr.bf16.gmra.mrb[48].mxu1 %v7421_v25  ;;  %v2041_v16 = vor.u32 %v2040_v33, %v2036_v10  ;;  %v2961_v51 = vshrl.u32 %v2627_v47, 16  ;;  %v2967_v1 = vshll.u32 %v2628_v13, 16  ;;  %v2631_v63 = vld [vmem:[#allocation2 + $0xbc] sm:$0x1]  ;;  %v3146_v12 = vld [vmem:[#allocation2 + $0xc8] sm:$0x1] }
 0x1f5   : > { %v7439_v44 = vrot.slane %v3141_v24, 9  ;;  %5888 = vmatprep.mubr.bf16.mxu1 %v7454_v57  ;;  %v2950_v28 = vrot.slane %v2948_v56, 4  ;;  %v2953_v43 = vrot.slane %v2951_v30, 5  ;;  %v2959_v45 = vrot.slane %v2957_v39, 5 }
 0x1f6   : > { %v2032_v41 = vrot.slane %v2031_v52, 4  ;;  %v2042_v46 = vrot.slane %v2041_v16, 4  ;;  %v2963_v48 = vrot.slane %v2961_v51, 4  ;;  %v2969_v50 = vrot.slane %v2967_v1, 5  ;;  %v2632_v16 = vld [vmem:[#allocation2 + $0xc0] sm:$0xf] }
 0x1f7   : > { %v3295_v21 = vrot.slane %v3142_v22, 5  ;;  %v2954_v42 = vor.u32 %v2953_v43, %v2950_v28  ;;  %v3298_v35 = vrot.slane %v3143_v5, 5  ;;  %v2049_v59 = vshrl.u32 %v1682_v29, 16  ;;  %v2633_v28 = vld [vmem:[#allocation2 + $0xc4] sm:$0xf] }
 0x1f8   : > { %v2037_v61 = vsel %vm8971_vm2, %v2032_v41, %v2036_v10  ;;  %v2047_v15 = vsel %vm8971_vm2, %v2042_v46, %v2046_v26  ;;  %v2964_v60 = vor.u32 %v2963_v48, %v2959_v45  ;;  %v2052_v53 = vshll.u32 %v1682_v29, 16 }
 0x1f9   : > { %v3296_v55 = vsel %vm9083_vm13, %v7439_v44, %v3295_v21  ;;  %v3297_v17 = vrot.slane %v3295_v21, 4  ;;  %v7359_v62 = vcombine.low %v2037_v61, %v2047_v15  ;;  %v2955_v19 = vrot.slane %v2954_v42, 4  ;;  %v2152_v21 = vld [vmem:[#allocation2] sm:$0xe]  ;;  %v2153_v61 = vld [vmem:[#allocation2 + $0x4] sm:$0xf] }
 0x1fa   : > { %v2051_v36 = vrot.slane %v2049_v59, 4  ;;  %v2965_v4 = vrot.slane %v2964_v60, 4  ;;  %v2058_v54 = vshll.u32 %v1683_v58, 16  ;;  %v2062_v3 = vshrl.u32 %v1683_v58, 16  ;;  %v8387_v58 = vld [vmem:[#allocation2 + $0xc] sm:$0xff]  }
 0x1fb   : > { %v3299_v6 = vsel %vm9083_vm13, %v3297_v17, %v3298_v35  ;;  %5512 = vmatprep.mubr.bf16.mxu0 %v7359_v62  ;;  %v2960_v20 = vsel %vm8971_vm2, %v2955_v19, %v2959_v45  ;;  %v2054_v38 = vrot.slane %v2052_v53, 5  ;;  %v2068_v40 = vshll.u32 %v1684_v31, 16  ;;  %v2154_v60 = vld [vmem:[#allocation2 + $0x8] sm:$0x1]  ;;  %v8383_v31 = vld [vmem:[#allocation2 + $0xb4] sm:$0xff]  }
 0x1fc   : > { %v7455_v7 = vcombine.low %v3296_v55, %v3299_v6  ;;  %v2970_v49 = vsel %vm8971_vm2, %v2965_v4, %v2969_v50  ;;  %5513 = vmatmul.mubr.bf16.gmra.mrb[88].mxu0 %v8373_v8  ;;  %v2060_v34 = vrot.slane %v2058_v54, 5  ;;  %v2064_v18 = vrot.slane %v2062_v3, 4  ;;  %v2634_v50 = vld [vmem:[#allocation2 + $0xc8] sm:$0x1]  ;;  %v3532_v55 = vld [vmem:[#allocation2 + $0x18] sm:$0xf] }
 0x1fd   : > { %v2972_v47 = vshrl.u32 %v2629_v0, 16  ;;  %v7422_v13 = vcombine.low %v2960_v20, %v2970_v49  ;;  %v2055_v11 = vor.u32 %v2054_v38, %v2051_v36  ;;  %v2070_v57 = vrot.slane %v2068_v40, 5  ;;  %v3533_v40 = vld [vmem:[#allocation2 + $0x1c] sm:$0xf] }
 0x1fe   : > { %v2975_v23 = vshll.u32 %v2629_v0, 16  ;;  %v2065_v24 = vor.u32 %v2064_v18, %v2060_v34  ;;  %v2981_v25 = vshll.u32 %v2630_v9, 16  ;;  %v2985_v10 = vshrl.u32 %v2630_v9, 16 }
 0x1ff   : > { %v2974_v22 = vrot.slane %v2972_v47, 4  ;;  %5889 = vmatmul.mubr.bf16.gmra.mrb[52].mxu1 %v7422_v13  ;;  %v2056_v33 = vrot.slane %v2055_v11, 4  ;;  %v2991_v5 = vshll.u32 %v2631_v63, 16  ;;  %v7440_v29 = vrot.slane %v3144_v32, 9  ;;  %v2155_v47 = vld [vmem:[#allocation2 + $0xc] sm:$0xe] }
 0x200   : > { %v2977_v26 = vrot.slane %v2975_v23, 5  ;;  %5898 = vmatprep.mubr.bf16.mxu1 %v7455_v7  ;;  %v2066_v52 = vrot.slane %v2065_v24, 4  ;;  %v2983_v56 = vrot.slane %v2981_v25, 5  ;;  %v2987_v30 = vrot.slane %v2985_v10, 4  ;;  %v2157_v24 = vld [vmem:[#allocation2 + $0x14] sm:$0x1] }
 0x201   : > { %v3302_v39 = vrot.slane %v3145_v27, 5  ;;  %v2061_v51 = vsel %vm8971_vm2, %v2056_v33, %v2060_v34  ;;  %v2993_v44 = vrot.slane %v2991_v5, 5  ;;  %v3305_v41 = vrot.slane %v3146_v12, 5  ;;  %v3534_v27 = vld [vmem:[#allocation2 + $0x20] sm:$0x1] }
 0x202   : > { %v2978_v1 = vor.u32 %v2977_v26, %v2974_v22  ;;  %v2071_v43 = vsel %vm8971_vm2, %v2066_v52, %v2070_v57  ;;  %v2988_v45 = vor.u32 %v2987_v30, %v2983_v56  ;;  %v2996_v59 = vshrl.u32 %v2632_v16, 16  ;;  %v2156_v12 = vld [vmem:[#allocation2 + $0x10] sm:$0xf]  ;;  %v3535_v26 = vld [vmem:[#allocation2 + $0x24] sm:$0xf] }
 0x203   : > { %v3303_v46 = vsel %vm9083_vm13, %v7440_v29, %v3302_v39  ;;  %v3304_v48 = vrot.slane %v3302_v39, 4  ;;  %v7360_v42 = vcombine.low %v2061_v51, %v2071_v43  ;;  %v2999_v15 = vshll.u32 %v2632_v16, 16 }
 0x204   : > { %v2979_v35 = vrot.slane %v2978_v1, 4  ;;  %v2989_v17 = vrot.slane %v2988_v45, 4  ;;  %v3005_v19 = vshll.u32 %v2633_v28, 16  ;;  %v3009_v36 = vshrl.u32 %v2633_v28, 16  ;;  %v8394_v1 = vld [vmem:[#allocation2 + $0x18] sm:$0xff]  }
 0x205   : > { %v3306_v62 = vsel %vm9083_vm13, %v3304_v48, %v3305_v41  ;;  %5522 = vmatprep.mubr.bf16.mxu0 %v7360_v42  ;;  %v2998_v4 = vrot.slane %v2996_v59, 4  ;;  %v3001_v8 = vrot.slane %v2999_v15, 5  ;;  %v3015_v9 = vshll.u32 %v2634_v50, 16  ;;  %v2158_v42 = vld [vmem:[#allocation2 + $0x18] sm:$0xe] }
 0x206   : > { %v2984_v53 = vsel %vm8971_vm2, %v2979_v35, %v2983_v56  ;;  %v7456_v0 = vcombine.low %v3303_v46, %v3306_v62  ;;  %v2994_v6 = vsel %vm8971_vm2, %v2989_v17, %v2993_v44  ;;  %5523 = vmatmul.mubr.bf16.gmra.mrb[92].mxu0 %v8383_v31  ;;  %v3007_v54 = vrot.slane %v3005_v19, 5  ;;  %v3536_v44 = vld [vmem:[#allocation2 + $0x28] sm:$0xf]  ;;  %v3537_v46 = vld [vmem:[#allocation2 + $0x2c] sm:$0x1] }
 0x207   : > { %v3011_v3 = vrot.slane %v3009_v36, 4  ;;  %v7423_v32 = vcombine.low %v2984_v53, %v2994_v6  ;;  %5565 = vmatprep.mubr.bf16.mxu0 %v8387_v58  ;;  %v3002_v20 = vor.u32 %v3001_v8, %v2998_v4  ;;  %v7361_v7 = vrot.slane %v2152_v21, 9  ;;  %v2160_v19 = vld [vmem:[#allocation2 + $0x20] sm:$0x1]  ;;  %v3538_v8 = vld [vmem:[#allocation2 + $0x30] sm:$0xf] }
 0x208   : > { %v2253_v38 = vrot.slane %v2153_v61, 5  ;;  %v3017_v34 = vrot.slane %v3015_v9, 5  ;;  %v2256_v18 = vrot.slane %v2154_v60, 5  ;;  %v3581_v63 = vshrl.u32 %v3532_v55, 16  ;;  %v2159_v60 = vld [vmem:[#allocation2 + $0x1c] sm:$0xf] }
 0x209   : > { %v3012_v49 = vor.u32 %v3011_v3, %v3007_v54  ;;  %5899 = vmatmul.mubr.bf16.gmra.mrb[56].mxu1 %v7423_v32  ;;  %v3003_v13 = vrot.slane %v3002_v20, 4  ;;  %v3584_v23 = vshll.u32 %v3532_v55, 16  ;;  %v3590_v10 = vshll.u32 %v3533_v40, 16  ;;  %v3539_v32 = vld [vmem:[#allocation2 + $0x34] sm:$0xf] }
 0x20a   : > { %v2254_v11 = vsel %vm9083_vm13, %v7361_v7, %v2253_v38  ;;  %v2255_v57 = vrot.slane %v2253_v38, 4  ;;  %5908 = vmatprep.mubr.bf16.mxu1 %v7456_v0  ;;  %v3583_v25 = vrot.slane %v3581_v63, 4  ;;  %v3594_v33 = vshrl.u32 %v3533_v40, 16 }
 0x20b   : > { %v3013_v22 = vrot.slane %v3012_v49, 4  ;;  %v3008_v5 = vsel %vm8971_vm2, %v3003_v13, %v3007_v54  ;;  %v3586_v52 = vrot.slane %v3584_v23, 5  ;;  %v3600_v56 = vshll.u32 %v3534_v27, 16  ;;  %v8399_v27 = vld [vmem:[#allocation2 + $0x24] sm:$0xff]   ;;  %v3540_v49 = vld [vmem:[#allocation2 + $0x38] sm:$0x1] }
 0x20c   : > { %v2257_v29 = vsel %vm9083_vm13, %v2255_v57, %v2256_v18  ;;  %v3592_v16 = vrot.slane %v3590_v10, 5  ;;  %v3596_v51 = vrot.slane %v3594_v33, 4  ;;  %v7362_v45 = vrot.slane %v2155_v47, 9 }
 0x20d   : > { %v3018_v30 = vsel %vm8971_vm2, %v3013_v22, %v3017_v34  ;;  %v7377_v39 = vcombine.low %v2254_v11, %v2257_v29  ;;  %v3587_v28 = vor.u32 %v3586_v52, %v3583_v25  ;;  %v3602_v43 = vrot.slane %v3600_v56, 5  ;;  %v8395_v34 = vld [vmem:[%s10704_s4 + $0x400] ss:$8 sps:$4 sm:$0xff]   ;;  %v8398_v22 = vld [vmem:[#allocation2 + $0x18] sm:$0xff]  }
 0x20e   : > { %v7424_v41 = vcombine.low %v3008_v5, %v3018_v30  ;;  %v3597_v48 = vor.u32 %v3596_v51, %v3592_v16  ;;  %v2260_v50 = vrot.slane %v2156_v12, 5  ;;  %v2263_v21 = vrot.slane %v2157_v24, 5  ;;  %v8404_v24 = vld [vmem:[%s10704_s4 + $0x414] ss:$8 sps:$4 sm:$0xff]   ;;  %v2162_v5 = vld [vmem:[#allocation2 + $0x28] sm:$0xf] }
 0x20f   : > { %5566 = vmatmul.mubr.bf16.vlgmr.msra.gmra.mrb[32].mxu0 %v7377_v39  ;;  %v3605_v61 = vshrl.u32 %v3535_v26, 16  ;;  %v3588_v35 = vrot.slane %v3587_v28, 4  ;;  %v3608_v58 = vshll.u32 %v3535_v26, 16  ;;  %v3614_v59 = vshll.u32 %v3536_v44, 16  ;;  %v2161_v39 = vld [vmem:[#allocation2 + $0x24] sm:$0xe] }
 0x210   : > { %5575 = vmatprep.mubr.bf16.mxu0 %v8394_v1  ;;  %v3618_v15 = vshrl.u32 %v3536_v44, 16  ;;  %v3598_v55 = vrot.slane %v3597_v48, 4  ;;  %v2261_v17 = vsel %vm9083_vm13, %v7362_v45, %v2260_v50  ;;  %v2262_v31 = vrot.slane %v2260_v50, 4  ;;  %v8402_v28 = vld [vmem:[%s10704_s4 + $0x410] ss:$8 sps:$4 sm:$0xff]  }
 0x211   : > { %v3607_v62 = vrot.slane %v3605_v61, 4  ;;  %5909 = vmatmul.mubr.bf16.gmra.mrb[60].mxu1 %v7424_v41  ;;  %v3593_v36 = vsel %vm8971_vm2, %v3588_v35, %v3592_v16  ;;  %v3610_v53 = vrot.slane %v3608_v58, 5  ;;  %v3616_v0 = vrot.slane %v3614_v59, 5  ;;  %v3541_v16 = vld [vmem:[#allocation2 + $0x3c] sm:$0xf] }
 0x212   : > { %v3620_v4 = vrot.slane %v3618_v15, 4  ;;  %v3603_v6 = vsel %vm8971_vm2, %v3598_v55, %v3602_v43  ;;  %v2264_v54 = vsel %vm9083_vm13, %v2262_v31, %v2263_v21  ;;  %v3624_v3 = vshll.u32 %v3537_v46, 16  ;;  %v2163_v43 = vld [vmem:[#allocation2 + $0x2c] sm:$0x1]  ;;  %v3542_v45 = vld [vmem:[#allocation2 + $0x40] sm:$0xf] }
 0x213   : > { %v7363_v9 = vrot.slane %v2158_v42, 9  ;;  %v7473_v20 = vcombine.low %v3593_v36, %v3603_v6  ;;  %v7378_v7 = vcombine.low %v2261_v17, %v2264_v54  ;;  %v3611_v38 = vor.u32 %v3610_v53, %v3607_v62  ;;  %v3543_v35 = vld [vmem:[#allocation2 + $0x44] sm:$0x1]  ;;  %v8401_v15 = vld [vmem:[#allocation2 + $0x30] sm:$0xff]  }
 0x214   : > { %v3621_v40 = vor.u32 %v3620_v4, %v3616_v0  ;;  %v3626_v18 = vrot.slane %v3624_v3, 5  ;;  %v2267_v63 = vrot.slane %v2159_v60, 5  ;;  %v2270_v47 = vrot.slane %v2160_v19, 5  ;;  %v9752_v31 = vld [vmem:[#allocation2 + $0x30] sm:$0xe] }
 0x215   : > { %v3629_v13 = vshrl.u32 %v3538_v8, 16  ;;  %5951 = vmatprep.mubr.bf16.mxu1 %v7473_v20  ;;  %v3612_v11 = vrot.slane %v3611_v38, 4  ;;  %v3632_v23 = vshll.u32 %v3538_v8, 16  ;;  %v3638_v12 = vshll.u32 %v3539_v32, 16  ;;  %v9754_v62 = vld [vmem:[#allocation2 + $0x34] sm:$0xf] }
 0x216   : > { %v3622_v57 = vrot.slane %v3621_v40, 4  ;;  %v2268_v25 = vsel %vm9083_vm13, %v7363_v9, %v2267_v63  ;;  %v2269_v10 = vrot.slane %v2267_v63, 4  ;;  %v3642_v26 = vshrl.u32 %v3539_v32, 16  ;;  %v8411_v19 = vld [vmem:[%s10704_s4 + $0x424] ss:$8 sps:$4 sm:$0xff]  }
 0x217   : > { %5576 = vmatmul.mubr.bf16.gmra.mrb[36].mxu0 %v7378_v7  ;;  %v3631_v33 = vrot.slane %v3629_v13, 4  ;;  %v3617_v29 = vsel %vm8971_vm2, %v3612_v11, %v3616_v0  ;;  %v3634_v56 = vrot.slane %v3632_v23, 5  ;;  %v3640_v30 = vrot.slane %v3638_v12, 5  ;;  %v2166_v3 = vld [vmem:[#allocation2 + $0x38] sm:$0x1] }
 0x218   : > { %v3627_v52 = vsel %vm8971_vm2, %v3622_v57, %v3626_v18  ;;  %5585 = vmatprep.mubr.bf16.mxu0 %v8399_v27  ;;  %v2271_v1 = vsel %vm9083_vm13, %v2269_v10, %v2270_v47  ;;  %v3644_v44 = vrot.slane %v3642_v26, 4  ;;  %v3648_v41 = vshll.u32 %v3540_v49, 16  ;;  %v3544_v9 = vld [vmem:[#allocation2 + $0x48] sm:$0xf]  ;;  %v3545_v40 = vld [vmem:[#allocation2 + $0x4c] sm:$0xf] }
 0x219   : > { %v7474_v51 = vcombine.low %v3617_v29, %v3627_v52  ;;  %5952 = vmatmul.mubr.bf16.vlgmr.msra.gmra.mrb[0].mxu1 %v8398_v22  ;;  %v7379_v46 = vcombine.low %v2268_v25, %v2271_v1  ;;  %v3635_v48 = vor.u32 %v3634_v56, %v3631_v33  ;;  %v2274_v50 = vrot.slane %v2162_v5, 5  ;;  %v8409_v27 = vld [vmem:[%s10704_s4 + $0x420] ss:$8 sps:$4 sm:$0xff]   ;;  %v3546_v13 = vld [vmem:[#allocation2 + $0x50] sm:$0x1] }
 0x21a   : > { %6113 = vmatpush1.bf16.msra.mxu1 %v8395_v34  ;;  %v3645_v21 = vor.u32 %v3644_v44, %v3640_v30  ;;  %v3650_v61 = vrot.slane %v3648_v41, 5  ;;  %v7364_v42 = vrot.slane %v2161_v39, 9  ;;  %v3653_v58 = vshrl.u32 %v3541_v16, 16  ;;  %v8400_v49 = vld [vmem:[#allocation2 + $0x24] sm:$0xff]   ;;  %v8418_v11 = vld [vmem:[%s10704_s4 + $0x434] ss:$8 sps:$4 sm:$0xff]  }
 0x21b   : > { %5961 = vmatprep.mubr.bf16.mxu1 %v7474_v51  ;;  %v3636_v59 = vrot.slane %v3635_v48, 4  ;;  %6114 = vmatprep.subr.bf16.mxu1 %v8404_v24  ;;  %v2276_v60 = vrot.slane %v2274_v50, 4  ;;  %v2277_v55 = vrot.slane %v2163_v43, 5  ;;  %v3656_v17 = vshll.u32 %v3541_v16, 16  ;;  %v8416_v22 = vld [vmem:[%s10704_s4 + $0x430] ss:$8 sps:$4 sm:$0xff]  }
 0x21c   : > { %v3646_v36 = vrot.slane %v3645_v21, 4  ;;  %v3655_v53 = vrot.slane %v3653_v58, 4  ;;  %v3662_v0 = vshll.u32 %v3542_v45, 16  ;;  %v3666_v4 = vshrl.u32 %v3542_v45, 16  ;;  %v3547_v5 = vld [vmem:[#allocation2 + $0x54] sm:$0xf] }
 0x21d   : > { %v3641_v8 = vsel %vm8971_vm2, %v3636_v59, %v3640_v30  ;;  %v3658_v6 = vrot.slane %v3656_v17, 5  ;;  %v3672_v54 = vshll.u32 %v3543_v35, 16  ;;  %v2275_v20 = vsel %vm9083_vm13, %v7364_v42, %v2274_v50  ;;  %v8425_v29 = vld [vmem:[%s10704_s4 + $0x444] ss:$8 sps:$4 sm:$0xff]   ;;  %v9781_v16 = vld [vmem:[#allocation2 + $0x40] sm:$0xf] }
 0x21e   : > { %v3651_v32 = vsel %vm8971_vm2, %v3646_v36, %v3650_v61  ;;  %6115 = vmatpush1.bf16.msra.mxu1 %v8402_v28  ;;  %v3664_v7 = vrot.slane %v3662_v0, 5  ;;  %v3668_v38 = vrot.slane %v3666_v4, 4  ;;  %v2278_v18 = vsel %vm9083_vm13, %v2276_v60, %v2277_v55  ;;  %v8406_v48 = vld [vmem:[#allocation2 + $0x3c] sm:$0xff]   ;;  %v8405_v42 = vld [vmem:[#allocation2 + $0x30] sm:$0xff]  }
 0x21f   : > { %5586 = vmatmul.mubr.bf16.gmra.mrb[40].mxu0 %v7379_v46  ;;  %v7475_v34 = vcombine.low %v3641_v8, %v3651_v32  ;;  %v3659_v63 = vor.u32 %v3658_v6, %v3655_v53  ;;  %v3674_v47 = vrot.slane %v3672_v54, 5  ;;  %6116 = vmatprep.subr.bf16.mxu1 %v8411_v19  ;;  %v7365_v23 = vrot.slane %v9752_v31, 9  ;;  %v3548_v46 = vld [vmem:[#allocation2 + $0x58] sm:$0xf]  ;;  %v2167_v61 = vld [vmem:[#allocation2 + $0x3c] sm:$0xe] }
 0x220   : > { %5595 = vmatprep.mubr.bf16.mxu0 %v8401_v15  ;;  %v3669_v57 = vor.u32 %v3668_v38, %v3664_v7  ;;  %v2281_v12 = vrot.slane %v9754_v62, 5  ;;  %v3677_v24 = vshrl.u32 %v3544_v9, 16  ;;  %v3680_v10 = vshll.u32 %v3544_v9, 16  ;;  %v2169_v15 = vld [vmem:[#allocation2 + $0x44] sm:$0x1] }
 0x221   : > { %5962 = vmatmul.mubr.bf16.gmra.mrb[4].mxu1 %v8400_v49  ;;  %v3660_v25 = vrot.slane %v3659_v63, 4  ;;  %v3686_v33 = vshll.u32 %v3545_v40, 16  ;;  %v3690_v26 = vshrl.u32 %v3545_v40, 16  ;;  %v2284_v30 = vrot.slane %v2166_v3, 5  ;;  %v8423_v55 = vld [vmem:[%s10704_s4 + $0x440] ss:$8 sps:$4 sm:$0xff]  }
 0x222   : > { %5971 = vmatprep.mubr.bf16.mxu1 %v7475_v34  ;;  %v3670_v52 = vrot.slane %v3669_v57, 4  ;;  %v2283_v56 = vrot.slane %v2281_v12, 4  ;;  %v3679_v39 = vrot.slane %v3677_v24, 4  ;;  %6117 = vmatpush1.bf16.msra.mxu1 %v8409_v27  ;;  %v3682_v1 = vrot.slane %v3680_v10, 5  ;;  %v3549_v62 = vld [vmem:[#allocation2 + $0x5c] sm:$0x1] }
 0x223   : > { %v3665_v51 = vsel %vm8971_vm2, %v3660_v25, %v3664_v7  ;;  %v9785_v44 = vrot.slane %v3686_v33, 5  ;;  %v3692_v41 = vrot.slane %v3690_v26, 4  ;;  %6118 = vmatprep.subr.bf16.mxu1 %v8418_v11  ;;  %v7380_v28 = vcombine.low %v2275_v20, %v2278_v18  ;;  %v8432_v53 = vld [vmem:[%s10704_s4 + $0x454] ss:$8 sps:$4 sm:$0xff]   ;;  %v3550_v54 = vld [vmem:[#allocation2 + $0x60] sm:$0xf] }
 0x224   : > { %v3675_v43 = vsel %vm8971_vm2, %v3670_v52, %v3674_v47  ;;  %v3696_v45 = vshll.u32 %v3546_v13, 16  ;;  %v3683_v50 = vor.u32 %v3682_v1, %v3679_v39  ;;  %v2282_v58 = vsel %vm9083_vm13, %v7365_v23, %v2281_v12  ;;  %v3551_v32 = vld [vmem:[#allocation2 + $0x64] sm:$0xf]  ;;  %v8430_v38 = vld [vmem:[%s10704_s4 + $0x450] ss:$8 sps:$4 sm:$0xff]   ;;  %v8407_v57 = vld [vmem:[#allocation2 + $0x3c] sm:$0xff]  }
 0x225   : > { %v3693_v21 = vor.u32 %v3692_v41, %v9785_v44  ;;  %v7476_v35 = vcombine.low %v3665_v51, %v3675_v43  ;;  %v2285_v59 = vsel %vm9083_vm13, %v2283_v56, %v2284_v30  ;;  %v3701_v60 = vshrl.u32 %v3547_v5, 16  ;;  %v8439_v18 = vld [vmem:[%s10704_s4 + $0x464] ss:$8 sps:$4 sm:$0xff]   ;;  %v2170_v25 = vld [vmem:[#allocation2 + $0x48] sm:$0xe] }
 0x226   : > { %6119 = vmatpush1.bf16.msra.mxu1 %v8416_v22  ;;  %v3684_v17 = vrot.slane %v3683_v50, 4  ;;  %v2288_v31 = vrot.slane %v9781_v16, 5  ;;  %v3704_v19 = vshll.u32 %v3547_v5, 16  ;;  %v3710_v36 = vshll.u32 %v3548_v46, 16  ;;  %v8408_v23 = vld [vmem:[#allocation2 + $0x48] sm:$0xff]  }
 0x227   : > { %5596 = vmatmul.mubr.bf16.gmra.mrb[44].mxu0 %v7380_v28  ;;  %6120 = vmatprep.subr.bf16.mxu1 %v8425_v29  ;;  %v3694_v0 = vrot.slane %v3693_v21, 4  ;;  %v3698_v4 = vrot.slane %v3696_v45, 5  ;;  %v3703_v8 = vrot.slane %v3701_v60, 4  ;;  %v3714_v6 = vshrl.u32 %v3548_v46, 16  ;;  %v2171_v12 = vld [vmem:[#allocation2 + $0x4c] sm:$0xf] }
 0x228   : > { %5605 = vmatprep.mubr.bf16.mxu0 %v8406_v48  ;;  %v3706_v3 = vrot.slane %v3704_v19, 5  ;;  %v9801_v9 = vrot.slane %v3710_v36, 5  ;;  %v7366_v20 = vrot.slane %v2167_v61, 9  ;;  %v7381_v40 = vcombine.low %v2282_v58, %v2285_v59  ;;  %v8437_v26 = vld [vmem:[%s10704_s4 + $0x460] ss:$8 sps:$4 sm:$0xff]   ;;  %v8413_v19 = vld [vmem:[#allocation2 + $0x54] sm:$0xff]  }
 0x229   : > { %5972 = vmatmul.mubr.bf16.gmra.mrb[8].mxu1 %v8405_v42  ;;  %v3716_v7 = vrot.slane %v3714_v6, 4  ;;  %v3689_v27 = vsel %vm8971_vm2, %v3684_v17, %v9785_v44  ;;  %v2290_v49 = vrot.slane %v2288_v31, 4  ;;  %v2291_v34 = vrot.slane %v2169_v15, 5  ;;  %v2172_v56 = vld [vmem:[#allocation2 + $0x50] sm:$0x1] }
 0x22a   : > { %5981 = vmatprep.mubr.bf16.mxu1 %v7476_v35  ;;  %6121 = vmatpush1.bf16.msra.mxu1 %v8423_v55  ;;  %v3699_v63 = vsel %vm8971_vm2, %v3694_v0, %v3698_v4  ;;  %v3707_v47 = vor.u32 %v3706_v3, %v3703_v8  ;;  %v3720_v11 = vshll.u32 %v3549_v62, 16  ;;  %v3725_v24 = vshrl.u32 %v3550_v54, 16  ;;  %v3553_v30 = vld [vmem:[#allocation2 + $0x6c] sm:$0xf]  ;;  %v8446_v39 = vld [vmem:[%s10704_s4 + $0x474] ss:$8 sps:$4 sm:$0xff]  }
 0x22b   : > { %6122 = vmatprep.subr.bf16.mxu1 %v8432_v53  ;;  %v3717_v13 = vor.u32 %v3716_v7, %v9801_v9  ;;  %v3728_v22 = vshll.u32 %v3550_v54, 16  ;;  %v3734_v10 = vshll.u32 %v3551_v32, 16  ;;  %v3738_v33 = vshrl.u32 %v3551_v32, 16  ;;  %v3554_v41 = vld [vmem:[#allocation2 + $0x70] sm:$0xf] }
 0x22c   : > { %v7477_v5 = vcombine.low %v3689_v27, %v3699_v63  ;;  %v2289_v29 = vsel %vm9083_vm13, %v7366_v20, %v2288_v31  ;;  %v2292_v52 = vsel %vm9083_vm13, %v2290_v49, %v2291_v34  ;;  %v3708_v16 = vrot.slane %v3707_v47, 4  ;;  %v3552_v28 = vld [vmem:[#allocation2 + $0x68] sm:$0x1]  ;;  %v2174_v21 = vld [vmem:[#allocation2 + $0x58] sm:$0xf] }
 0x22d   : > { %v3718_v51 = vrot.slane %v3717_v13, 4  ;;  %v3722_v1 = vrot.slane %v3720_v11, 5  ;;  %v2295_v44 = vrot.slane %v2171_v12, 5  ;;  %v3727_v43 = vrot.slane %v3725_v24, 4  ;;  %v8444_v42 = vld [vmem:[%s10704_s4 + $0x470] ss:$8 sps:$4 sm:$0xff]  }
 0x22e   : > { %6123 = vmatpush1.bf16.msra.mxu1 %v8430_v38  ;;  %v3730_v45 = vrot.slane %v3728_v22, 5  ;;  %v9825_v46 = vrot.slane %v3734_v10, 5  ;;  %v3740_v48 = vrot.slane %v3738_v33, 4  ;;  %v7382_v50 = vcombine.low %v2289_v29, %v2292_v52  ;;  %v2173_v0 = vld [vmem:[#allocation2 + $0x54] sm:$0xe] }
 0x22f   : > { %5606 = vmatmul.mubr.bf16.gmra.mrb[48].mxu0 %v7381_v40  ;;  %6124 = vmatprep.subr.bf16.mxu1 %v8439_v18  ;;  %v3749_v61 = vshrl.u32 %v3553_v30, 16  ;;  %v7367_v35 = vrot.slane %v2170_v25, 9  ;;  %v3752_v58 = vshll.u32 %v3553_v30, 16  ;;  %v3758_v59 = vshll.u32 %v3554_v41, 16  ;;  %v2175_v8 = vld [vmem:[#allocation2 + $0x5c] sm:$0x1] }
 0x230   : > { %5615 = vmatprep.mubr.bf16.mxu0 %v8408_v23  ;;  %v3762_v15 = vshrl.u32 %v3554_v41, 16  ;;  %v3713_v60 = vsel %vm8971_vm2, %v3708_v16, %v9801_v9  ;;  %v2297_v55 = vrot.slane %v2295_v44, 4  ;;  %v2298_v17 = vrot.slane %v2172_v56, 5  ;;  %v8412_v9 = vld [vmem:[#allocation2 + $0x48] sm:$0xff]   ;;  %v3555_v7 = vld [vmem:[#allocation2 + $0x74] sm:$0x1] }
 0x231   : > { %5982 = vmatmul.mubr.bf16.gmra.mrb[12].mxu1 %v8407_v57  ;;  %v3744_v31 = vshll.u32 %v3552_v28, 16  ;;  %v3723_v62 = vsel %vm8971_vm2, %v3718_v51, %v3722_v1  ;;  %v3731_v36 = vor.u32 %v3730_v45, %v3727_v43  ;;  %v3741_v53 = vor.u32 %v3740_v48, %v9825_v46  ;;  %v3556_v34 = vld [vmem:[#allocation2 + $0x78] sm:$0xf]  ;;  %v3557_v18 = vld [vmem:[#allocation2 + $0x7c] sm:$0xf]  ;;  %v8415_v56 = vld [vmem:[#allocation2 + $0x60] sm:$0xff]  }
 0x232   : > { %5991 = vmatprep.mubr.bf16.mxu1 %v7477_v5  ;;  %6125 = vmatpush1.bf16.msra.mxu1 %v8437_v26  ;;  %v2302_v4 = vrot.slane %v2174_v21, 5  ;;  %v3751_v6 = vrot.slane %v3749_v61, 4  ;;  %v3754_v54 = vrot.slane %v3752_v58, 5  ;;  %v9836_v3 = vrot.slane %v3758_v59, 5  ;;  %v2177_v24 = vld [vmem:[#allocation2 + $0x64] sm:$0xf] }
 0x233   : > { %6126 = vmatprep.subr.bf16.mxu1 %v8446_v39  ;;  %v3764_v32 = vrot.slane %v3762_v15, 4  ;;  %v2296_v20 = vsel %vm9083_vm13, %v7367_v35, %v2295_v44  ;;  %v7478_v38 = vcombine.low %v3713_v60, %v3723_v62  ;;  %v2299_v40 = vsel %vm9083_vm13, %v2297_v55, %v2298_v17  ;;  %v8414_v5 = vld [vmem:[#allocation2 + $0x54] sm:$0xff]   ;;  %v2176_v44 = vld [vmem:[#allocation2 + $0x60] sm:$0xe]  ;;  %v2178_v28 = vld [vmem:[#allocation2 + $0x68] sm:$0x1] }
 0x234   : > { %v3746_v27 = vrot.slane %v3744_v31, 5  ;;  %v7368_v49 = vrot.slane %v2173_v0, 9  ;;  %v3732_v63 = vrot.slane %v3731_v36, 4  ;;  %v3742_v47 = vrot.slane %v3741_v53, 4  ;;  %v3558_v21 = vld [vmem:[#allocation2 + $0x80] sm:$0x1] }
 0x235   : > { %v2304_v13 = vrot.slane %v2302_v4, 4  ;;  %v2305_v11 = vrot.slane %v2175_v8, 5  ;;  %v3755_v57 = vor.u32 %v3754_v54, %v3751_v6  ;;  %v3765_v23 = vor.u32 %v3764_v32, %v9836_v3  ;;  %v3560_v35 = vld [vmem:[#allocation2 + $0x88] sm:$0xf]  ;;  %v8420_v8 = vld [vmem:[#allocation2 + $0x6c] sm:$0xff]   ;;  %v8419_v6 = vld [vmem:[#allocation2 + $0x60] sm:$0xff]  }
 0x236   : > { %6127 = vmatpush1.bf16.msra.mxu1 %v8444_v42  ;;  %v3768_v12 = vshll.u32 %v3555_v7, 16  ;;  %v3773_v22 = vshrl.u32 %v3556_v34, 16  ;;  %v3776_v25 = vshll.u32 %v3556_v34, 16  ;;  %v3782_v10 = vshll.u32 %v3557_v18, 16  ;;  %v3559_v42 = vld [vmem:[#allocation2 + $0x84] sm:$0xf] }
 0x237   : > { %5616 = vmatmul.mubr.bf16.gmra.mrb[52].mxu0 %v7382_v50  ;;  %v3786_v33 = vshrl.u32 %v3557_v18, 16  ;;  %v7383_v26 = vcombine.low %v2296_v20, %v2299_v40  ;;  %v3737_v29 = vsel %vm8971_vm2, %v3732_v63, %v9825_v46  ;;  %v3747_v52 = vsel %vm8971_vm2, %v3742_v47, %v3746_v27  ;;  %v2181_v27 = vld [vmem:[#allocation2 + $0x74] sm:$0x1]  ;;  %v3561_v47 = vld [vmem:[#allocation2 + $0x8c] sm:$0x1] }
 0x238   : > { %5625 = vmatprep.mubr.bf16.mxu0 %v8413_v19  ;;  %v2303_v30 = vsel %vm9083_vm13, %v7368_v49, %v2302_v4  ;;  %v2306_v39 = vsel %vm9083_vm13, %v2304_v13, %v2305_v11  ;;  %v3756_v16 = vrot.slane %v3755_v57, 4  ;;  %v3766_v51 = vrot.slane %v3765_v23, 4  ;;  %v2180_v19 = vld [vmem:[#allocation2 + $0x70] sm:$0xf]  ;;  %v3563_v57 = vld [vmem:[#allocation2 + $0x94] sm:$0xf] }
 0x239   : > { %5992 = vmatmul.mubr.bf16.gmra.mrb[16].mxu1 %v8412_v9  ;;  %v3770_v1 = vrot.slane %v3768_v12, 5  ;;  %v2309_v41 = vrot.slane %v2177_v24, 5  ;;  %v3775_v43 = vrot.slane %v3773_v22, 4  ;;  %v3778_v45 = vrot.slane %v3776_v25, 5  ;;  %v3562_v11 = vld [vmem:[#allocation2 + $0x90] sm:$0xf] }
 0x23a   : > { %6001 = vmatprep.mubr.bf16.mxu1 %v7478_v38  ;;  %v3784_v46 = vrot.slane %v3782_v10, 5  ;;  %v3788_v48 = vrot.slane %v3786_v33, 4  ;;  %v7479_v50 = vcombine.low %v3737_v29, %v3747_v52  ;;  %v7369_v61 = vrot.slane %v2176_v44, 9  ;;  %v2179_v38 = vld [vmem:[#allocation2 + $0x6c] sm:$0xe]  ;;  %v8422_v10 = vld [vmem:[#allocation2 + $0x78] sm:$0xff]  }
 0x23b   : > { %v7384_v58 = vcombine.low %v2303_v30, %v2306_v39  ;;  %v3761_v59 = vsel %vm8971_vm2, %v3756_v16, %v9836_v3  ;;  %v2311_v15 = vrot.slane %v2309_v41, 4  ;;  %v2312_v60 = vrot.slane %v2178_v28, 5  ;;  %v2183_v29 = vld [vmem:[#allocation2 + $0x7c] sm:$0xf]  ;;  %v8421_v16 = vld [vmem:[#allocation2 + $0x6c] sm:$0xff]  }
 0x23c   : > { %v3771_v55 = vsel %vm8971_vm2, %v3766_v51, %v3770_v1  ;;  %v3779_v17 = vor.u32 %v3778_v45, %v3775_v43  ;;  %v3789_v31 = vor.u32 %v3788_v48, %v3784_v46  ;;  %v3792_v62 = vshll.u32 %v3558_v21, 16  ;;  %v3565_v28 = vld [vmem:[#allocation2 + $0x9c] sm:$0xf]  ;;  %v3566_v43 = vld [vmem:[#allocation2 + $0xa0] sm:$0xf] }
 0x23d   : > { %v3797_v36 = vshrl.u32 %v3559_v42, 16  ;;  %v3800_v53 = vshll.u32 %v3559_v42, 16  ;;  %v3806_v0 = vshll.u32 %v3560_v35, 16  ;;  %v3810_v4 = vshrl.u32 %v3560_v35, 16 }
 0x23e   : > { %v7480_v54 = vcombine.low %v3761_v59, %v3771_v55  ;;  %v2310_v3 = vsel %vm9083_vm13, %v7369_v61, %v2309_v41  ;;  %v2313_v32 = vsel %vm9083_vm13, %v2311_v15, %v2312_v60  ;;  %v3780_v9 = vrot.slane %v3779_v17, 4  ;;  %v2182_v41 = vld [vmem:[#allocation2 + $0x78] sm:$0xe]  ;;  %v3564_v61 = vld [vmem:[#allocation2 + $0x98] sm:$0x1] }
 0x23f   : > { %5626 = vmatmul.mubr.bf16.gmra.mrb[56].mxu0 %v7383_v26  ;;  %v3790_v20 = vrot.slane %v3789_v31, 4  ;;  %v3794_v7 = vrot.slane %v3792_v62, 5  ;;  %v2316_v40 = vrot.slane %v2180_v19, 5  ;;  %v3799_v49 = vrot.slane %v3797_v36, 4  ;;  %v2186_v15 = vld [vmem:[#allocation2 + $0x88] sm:$0xf] }
 0x240   : > { %5635 = vmatprep.mubr.bf16.mxu0 %v8415_v56  ;;  %v3802_v34 = vrot.slane %v3800_v53, 5  ;;  %v9861_v18 = vrot.slane %v3806_v0, 5  ;;  %v3812_v63 = vrot.slane %v3810_v4, 4  ;;  %v7385_v13 = vcombine.low %v2310_v3, %v2313_v32  ;;  %v2185_v32 = vld [vmem:[#allocation2 + $0x84] sm:$0xe] }
 0x241   : > { %6002 = vmatmul.mubr.bf16.gmra.mrb[20].mxu1 %v8414_v5  ;;  %v3785_v23 = vsel %vm8971_vm2, %v3780_v9, %v3784_v46  ;;  %v7370_v12 = vrot.slane %v2179_v38, 9  ;;  %v2318_v24 = vrot.slane %v2316_v40, 4  ;;  %v2319_v22 = vrot.slane %v2181_v27, 5 }
 0x242   : > { %6011 = vmatprep.mubr.bf16.mxu1 %v7479_v50  ;;  %v3795_v25 = vsel %vm8971_vm2, %v3790_v20, %v3794_v7  ;;  %v3803_v33 = vor.u32 %v3802_v34, %v3799_v49  ;;  %v3813_v26 = vor.u32 %v3812_v63, %v9861_v18  ;;  %v3816_v5 = vshll.u32 %v3561_v47, 16  ;;  %v2184_v50 = vld [vmem:[#allocation2 + $0x80] sm:$0x1]  ;;  %v2187_v20 = vld [vmem:[#allocation2 + $0x8c] sm:$0x1]  ;;  %v8426_v49 = vld [vmem:[#allocation2 + $0x78] sm:$0xff]  }
 0x243   : > { %v3821_v52 = vshrl.u32 %v3562_v11, 16  ;;  %v3824_v56 = vshll.u32 %v3562_v11, 16  ;;  %v3830_v30 = vshll.u32 %v3563_v57, 16  ;;  %v3834_v39 = vshrl.u32 %v3563_v57, 16  ;;  %v3568_v57 = vld [vmem:[#allocation2 + $0xa8] sm:$0xf] }
 0x244   : > { %v7481_v51 = vcombine.low %v3785_v23, %v3795_v25  ;;  %v2317_v1 = vsel %vm9083_vm13, %v7370_v12, %v2316_v40  ;;  %v2320_v44 = vsel %vm9083_vm13, %v2318_v24, %v2319_v22  ;;  %v3804_v45 = vrot.slane %v3803_v33, 4  ;;  %v3569_v23 = vld [vmem:[#allocation2 + $0xac] sm:$0xf] }
 0x245   : > { %v3814_v46 = vrot.slane %v3813_v26, 4  ;;  %v3818_v48 = vrot.slane %v3816_v5, 5  ;;  %v2323_v21 = vrot.slane %v2183_v29, 5  ;;  %v3823_v42 = vrot.slane %v3821_v52, 4  ;;  %v2189_v5 = vld [vmem:[#allocation2 + $0x94] sm:$0xf] }
 0x246   : > { %v3826_v35 = vrot.slane %v3824_v56, 5  ;;  %v3836_v59 = vrot.slane %v3834_v39, 4  ;;  %v3845_v60 = vshrl.u32 %v3565_v28, 16  ;;  %v3848_v55 = vshll.u32 %v3565_v28, 16 }
 0x247   : > { %5636 = vmatmul.mubr.bf16.gmra.mrb[60].mxu0 %v7384_v58  ;;  %v9872_v58 = vrot.slane %v3830_v30, 5  ;;  %v3854_v17 = vshll.u32 %v3566_v43, 16  ;;  %v3858_v31 = vshrl.u32 %v3566_v43, 16  ;;  %v7386_v62 = vcombine.low %v2317_v1, %v2320_v44  ;;  %v8429_v44 = vld [vmem:[#allocation2 + $0x90] sm:$0xff]  }
 0x248   : > { %5645 = vmatprep.mubr.bf16.mxu0 %v8420_v8  ;;  %v7371_v19 = vrot.slane %v2182_v41, 9  ;;  %v3809_v36 = vsel %vm8971_vm2, %v3804_v45, %v9861_v18  ;;  %v2325_v53 = vrot.slane %v2323_v21, 4  ;;  %v2326_v0 = vrot.slane %v2184_v50, 5  ;;  %v3567_v18 = vld [vmem:[#allocation2 + $0xa4] sm:$0x1] }
 0x249   : > { %6012 = vmatmul.mubr.bf16.gmra.mrb[24].mxu1 %v8419_v6  ;;  %v3840_v4 = vshll.u32 %v3564_v61, 16  ;;  %v3819_v8 = vsel %vm8971_vm2, %v3814_v46, %v3818_v48  ;;  %v8427_v6 = vld [vmem:[#allocation2 + $0x84] sm:$0xff]   ;;  %v3837_v3 = vor.u32 %v3836_v59, %v9872_v58  ;;  %v2330_v9 = vrot.slane %v2186_v15, 5  ;;  %v2188_v48 = vld [vmem:[#allocation2 + $0x90] sm:$0xe] }
 0x24a   : > { %6021 = vmatprep.mubr.bf16.mxu1 %v7480_v54  ;;  %v3827_v54 = vor.u32 %v3826_v35, %v3823_v42  ;;  %v3847_v7 = vrot.slane %v3845_v60, 4  ;;  %v3850_v38 = vrot.slane %v3848_v55, 5  ;;  %v9880_v40 = vrot.slane %v3854_v17, 5  ;;  %v3570_v15 = vld [vmem:[#allocation2 + $0xb0] sm:$0x1] }
 0x24b   : > { %v3860_v27 = vrot.slane %v3858_v31, 4  ;;  %v2324_v34 = vsel %vm9083_vm13, %v7371_v19, %v2323_v21  ;;  %v7482_v63 = vcombine.low %v3809_v36, %v3819_v8  ;;  %v2327_v47 = vsel %vm9083_vm13, %v2325_v53, %v2326_v0  ;;  %v2190_v21 = vld [vmem:[#allocation2 + $0x98] sm:$0x1]  ;;  %v3571_v55 = vld [vmem:[#allocation2 + $0xb4] sm:$0xf] }
 0x24c   : > { %v7372_v11 = vrot.slane %v2185_v32, 9  ;;  %v3828_v12 = vrot.slane %v3827_v54, 4  ;;  %v3838_v24 = vrot.slane %v3837_v3, 4  ;;  %v2332_v22 = vrot.slane %v2330_v9, 4  ;;  %v3572_v17 = vld [vmem:[#allocation2 + $0xb8] sm:$0xf] }
 0x24d   : > { %v2333_v25 = vrot.slane %v2187_v20, 5  ;;  %v3861_v33 = vor.u32 %v3860_v27, %v9880_v40  ;;  %v3864_v26 = vshll.u32 %v3567_v18, 16  ;;  %v3869_v29 = vshrl.u32 %v3568_v57, 16  ;;  %v8434_v20 = vld [vmem:[#allocation2 + $0x9c] sm:$0xff]  }
 0x24e   : > { %v3872_v52 = vshll.u32 %v3568_v57, 16  ;;  %v3878_v56 = vshll.u32 %v3569_v23, 16  ;;  %v3882_v30 = vshrl.u32 %v3569_v23, 16  ;;  %v7387_v39 = vcombine.low %v2324_v34, %v2327_v47 }
 0x24f   : > { %5646 = vmatmul.mubr.bf16.gmra.mrb[64].mxu0 %v7385_v13  ;;  %v3842_v13 = vrot.slane %v3840_v4, 5  ;;  %v2331_v41 = vsel %vm9083_vm13, %v7372_v11, %v2330_v9  ;;  %v2334_v28 = vsel %vm9083_vm13, %v2332_v22, %v2333_v25  ;;  %v3862_v45 = vrot.slane %v3861_v33, 4  ;;  %v3574_v25 = vld [vmem:[#allocation2 + $0xc0] sm:$0xf] }
 0x250   : > { %5655 = vmatprep.mubr.bf16.mxu0 %v8422_v10  ;;  %v3851_v10 = vor.u32 %v3850_v38, %v3847_v7  ;;  %v3866_v46 = vrot.slane %v3864_v26, 5  ;;  %v2337_v50 = vrot.slane %v2189_v5, 5  ;;  %v3871_v61 = vrot.slane %v3869_v29, 4  ;;  %v8433_v7 = vld [vmem:[#allocation2 + $0x90] sm:$0xff]  }
 0x251   : > { %6022 = vmatmul.mubr.bf16.gmra.mrb[28].mxu1 %v8421_v16  ;;  %v8428_v16 = vld [vmem:[#allocation2 + $0x84] sm:$0xff]   ;;  %v3843_v1 = vsel %vm8971_vm2, %v3838_v24, %v3842_v13  ;;  %v3874_v42 = vrot.slane %v3872_v52, 5  ;;  %v3880_v35 = vrot.slane %v3878_v56, 5  ;;  %v7388_v60 = vcombine.low %v2331_v41, %v2334_v28  ;;  %v3573_v24 = vld [vmem:[#allocation2 + $0xbc] sm:$0x1] }
 0x252   : > { %6031 = vmatprep.mubr.bf16.mxu1 %v7481_v51  ;;  %v3833_v51 = vsel %vm8971_vm2, %v3828_v12, %v9872_v58  ;;  %v3852_v43 = vrot.slane %v3851_v10, 4  ;;  %v3884_v58 = vrot.slane %v3882_v30, 4  ;;  %v2339_v19 = vrot.slane %v2337_v50, 4  ;;  %v2193_v13 = vld [vmem:[#allocation2 + $0xa4] sm:$0x1]  ;;  %v8436_v56 = vld [vmem:[#allocation2 + $0xa8] sm:$0xff]  }
 0x253   : > { %v7483_v59 = vcombine.low %v3833_v51, %v3843_v1  ;;  %v2340_v36 = vrot.slane %v2190_v21, 5  ;;  %v3867_v53 = vsel %vm8971_vm2, %v3862_v45, %v3866_v46  ;;  %v3875_v0 = vor.u32 %v3874_v42, %v3871_v61  ;;  %v3575_v10 = vld [vmem:[#allocation2 + $0xc4] sm:$0xf]  ;;  %v2195_v51 = vld [vmem:[#allocation2 + $0xac] sm:$0xf] }
 0x254   : > { %v3857_v31 = vsel %vm8971_vm2, %v3852_v43, %v9880_v40  ;;  %v3885_v4 = vor.u32 %v3884_v58, %v3880_v35  ;;  %v3888_v8 = vshll.u32 %v3570_v15, 16  ;;  %v3893_v54 = vshrl.u32 %v3571_v55, 16  ;;  %v8435_v43 = vld [vmem:[#allocation2 + $0x9c] sm:$0xff]   ;;  %v3577_v21 = vld [vmem:[#allocation2 + $0xcc] sm:$0xf] }
 0x255   : > { %v3896_v3 = vshll.u32 %v3571_v55, 16  ;;  %v3902_v32 = vshll.u32 %v3572_v17, 16  ;;  %v3906_v9 = vshrl.u32 %v3572_v17, 16  ;;  %v7484_v38 = vcombine.low %v3857_v31, %v3867_v53  ;;  %v2196_v15 = vld [vmem:[#allocation2 + $0xb0] sm:$0x1] }
 0x256   : > { %v2341_v27 = vsel %vm9083_vm13, %v2339_v19, %v2340_v36  ;;  %v3886_v34 = vrot.slane %v3885_v4, 4  ;;  %v3890_v18 = vrot.slane %v3888_v8, 5  ;;  %v3895_v11 = vrot.slane %v3893_v54, 4  ;;  %v3576_v19 = vld [vmem:[#allocation2 + $0xc8] sm:$0x1] }
 0x257   : > { %5656 = vmatmul.mubr.bf16.gmra.mrb[68].mxu0 %v7386_v62  ;;  %v7373_v62 = vrot.slane %v2188_v48, 9  ;;  %v3898_v57 = vrot.slane %v3896_v3, 5  ;;  %v9905_v23 = vrot.slane %v3902_v32, 5  ;;  %v3908_v12 = vrot.slane %v3906_v9, 4  ;;  %v8441_v9 = vld [vmem:[#allocation2 + $0xb4] sm:$0xff]  }
 0x258   : > { %5665 = vmatprep.mubr.bf16.mxu0 %v8427_v6  ;;  %v2192_v6 = vld [vmem:[#allocation2 + $0xa0] sm:$0xf]  ;;  %v2347_v29 = vrot.slane %v2193_v13, 5  ;;  %v3891_v52 = vsel %vm8971_vm2, %v3886_v34, %v3890_v18  ;;  %v3917_v1 = vshrl.u32 %v3574_v25, 16  ;;  %v3926_v41 = vshll.u32 %v3575_v10, 16 }
 0x259   : > { %6032 = vmatmul.mubr.bf16.gmra.mrb[32].mxu1 %v8426_v49  ;;  %v2338_v40 = vsel %vm9083_vm13, %v7373_v62, %v2337_v50  ;;  %v3876_v49 = vrot.slane %v3875_v0, 4  ;;  %v2344_v47 = vrot.slane %v2192_v6, 5  ;;  %v3899_v30 = vor.u32 %v3898_v57, %v3895_v11  ;;  %v2194_v50 = vld [vmem:[#allocation2 + $0xa8] sm:$0xe]  ;;  %v3579_v57 = vld [vmem:[#allocation2 + $0xd4] sm:$0x1] }
 0x25a   : > { %6041 = vmatprep.mubr.bf16.mxu1 %v7482_v63  ;;  %v2191_v63 = vld [vmem:[#allocation2 + $0x9c] sm:$0xe]  ;;  %v7389_v22 = vcombine.low %v2338_v40, %v2341_v27  ;;  %v3930_v28 = vshrl.u32 %v3575_v10, 16  ;;  %v2351_v58 = vrot.slane %v2195_v51, 5  ;;  %v3928_v17 = vrot.slane %v3926_v41, 5  ;;  %v8440_v27 = vld [vmem:[#allocation2 + $0xa8] sm:$0xff]  }
 0x25b   : > { %v3881_v33 = vsel %vm8971_vm2, %v3876_v49, %v3880_v35  ;;  %v7374_v26 = vrot.slane %v2191_v63, 9  ;;  %v2346_v5 = vrot.slane %v2344_v47, 4  ;;  %v3900_v61 = vrot.slane %v3899_v30, 4  ;;  %v2198_v40 = vld [vmem:[#allocation2 + $0xb8] sm:$0xf] }
 0x25c   : > { %v7485_v45 = vcombine.low %v3881_v33, %v3891_v52  ;;  %v3932_v31 = vrot.slane %v3930_v28, 4  ;;  %v7375_v62 = vrot.slane %v2194_v50, 9  ;;  %v3941_v36 = vshrl.u32 %v3577_v21, 16  ;;  %v2199_v10 = vld [vmem:[#allocation2 + $0xbc] sm:$0x1] }
 0x25d   : > { %v2345_v46 = vsel %vm9083_vm13, %v7374_v26, %v2344_v47  ;;  %v2348_v48 = vsel %vm9083_vm13, %v2346_v5, %v2347_v29  ;;  %v3944_v53 = vshll.u32 %v3577_v21, 16  ;;  %v3905_v6 = vsel %vm8971_vm2, %v3900_v61, %v9905_v23 }
 0x25e   : > { %v7390_v8 = vcombine.low %v2345_v46, %v2348_v48  ;;  %v2353_v54 = vrot.slane %v2351_v58, 4  ;;  %v2354_v3 = vrot.slane %v2196_v15, 5  ;;  %v3943_v49 = vrot.slane %v3941_v36, 4  ;;  %v4046_v15 = vld [vmem:[#allocation2 + $0x20] sm:$0x1] }
 0x25f   : > { %5666 = vmatmul.mubr.bf16.gmra.mrb[72].mxu0 %v7387_v39  ;;  %v3909_v39 = vor.u32 %v3908_v12, %v9905_v23  ;;  %v3946_v34 = vrot.slane %v3944_v53, 5  ;;  %v2352_v13 = vsel %vm9083_vm13, %v7375_v62, %v2351_v58  ;;  %v3960_v5 = vshll.u32 %v3579_v57, 16  ;;  %v4047_v36 = vld [vmem:[#allocation2 + $0x24] sm:$0xe]  ;;  %v4049_v53 = vld [vmem:[#allocation2 + $0x2c] sm:$0x1] }
 0x260   : > { %5675 = vmatprep.mubr.bf16.mxu0 %v8429_v44  ;;  %v3920_v44 = vshll.u32 %v3574_v25, 16  ;;  %v2355_v11 = vsel %vm9083_vm13, %v2353_v54, %v2354_v3  ;;  %v2358_v25 = vrot.slane %v2198_v40, 5  ;;  %v2361_v51 = vrot.slane %v2199_v10, 5  ;;  %v4051_v3 = vld [vmem:[#allocation2 + $0x34] sm:$0xf] }
 0x261   : > { %6042 = vmatmul.mubr.bf16.gmra.mrb[36].mxu1 %v8428_v16  ;;  %v3912_v16 = vshll.u32 %v3573_v24, 16  ;;  %v3910_v42 = vrot.slane %v3909_v39, 4  ;;  %v3947_v33 = vor.u32 %v3946_v34, %v3943_v49  ;;  %v7391_v29 = vcombine.low %v2352_v13, %v2355_v11  ;;  %v8443_v39 = vld [vmem:[#allocation2 + $0xc0] sm:$0xff]   ;;  %v4053_v11 = vld [vmem:[#allocation2 + $0x3c] sm:$0xe] }
 0x262   : > { %6051 = vmatprep.mubr.bf16.mxu1 %v7483_v59  ;;  %v3578_v59 = vld [vmem:[#allocation2 + $0xd0] sm:$0xf]  ;;  %v3922_v55 = vrot.slane %v3920_v44, 5  ;;  %v3962_v28 = vrot.slane %v3960_v5, 5  ;;  %v4152_v54 = vrot.slane %v4049_v53, 5 }
 0x263   : > { %v3914_v35 = vrot.slane %v3912_v16, 5  ;;  %v3950_v0 = vshll.u32 %v3578_v59, 16  ;;  %v3954_v4 = vshrl.u32 %v3578_v59, 16  ;;  %v2360_v16 = vrot.slane %v2358_v25, 4  ;;  %v8448_v59 = vld [vmem:[#allocation2 + $0xcc] sm:$0xff]  }
 0x264   : > { %v3948_v44 = vrot.slane %v3947_v33, 4  ;;  %v4055_v57 = vld [vmem:[#allocation2 + $0x44] sm:$0x1]  ;;  %v4056_v5 = vld [vmem:[#allocation2 + $0x48] sm:$0xe] }
 0x265   : > { %v3915_v32 = vsel %vm8971_vm2, %v3910_v42, %v3914_v35  ;;  %v3952_v18 = vrot.slane %v3950_v0, 5  ;;  %v3956_v63 = vrot.slane %v3954_v4, 4  ;;  %v2362_v46 = vsel %vm9083_vm13, %v2360_v16, %v2361_v51  ;;  %v8447_v42 = vld [vmem:[#allocation2 + $0xc0] sm:$0xff]   ;;  %v4045_v35 = vld [vmem:[#allocation2 + $0x1c] sm:$0xf] }
 0x266   : > { %v7486_v47 = vcombine.low %v3905_v6, %v3915_v32  ;;  %v4142_v58 = vrot.slane %v4045_v35, 5  ;;  %v4060_v16 = vld [vmem:[#allocation2 + $0x58] sm:$0xf]  ;;  %v4062_v35 = vld [vmem:[#allocation2 + $0x60] sm:$0xe] }
 0x267   : > { %5676 = vmatmul.mubr.bf16.gmra.mrb[76].mxu0 %v7388_v60  ;;  %v3919_v60 = vrot.slane %v3917_v1, 4  ;;  %v3957_v26 = vor.u32 %v3956_v63, %v3952_v18  ;;  %v8442_v1 = vld [vmem:[#allocation2 + $0xb4] sm:$0xff]   ;;  %v3953_v48 = vsel %vm8971_vm2, %v3948_v44, %v3952_v18  ;;  %v4054_v18 = vld [vmem:[#allocation2 + $0x40] sm:$0xf]  ;;  %v4177_v44 = vrot.slane %v4060_v16, 5 }
 0x268   : > { %5685 = vmatprep.mubr.bf16.mxu0 %v8434_v20  ;;  %v4163_v13 = vrot.slane %v4054_v18, 5 }
 0x269   : > { %6052 = vmatmul.mubr.bf16.gmra.mrb[40].mxu1 %v8433_v7  ;;  %v3923_v20 = vor.u32 %v3922_v55, %v3919_v60  ;;  %v3933_v7 = vor.u32 %v3932_v31, %v3928_v17  ;;  %v3958_v41 = vrot.slane %v3957_v26, 4  ;;  %v4144_v60 = vrot.slane %v4142_v58, 4  ;;  %v4044_v55 = vld [vmem:[#allocation2 + $0x18] sm:$0xe] }
 0x26a   : > { %6061 = vmatprep.mubr.bf16.mxu1 %v7484_v38  ;;  %v3936_v38 = vshll.u32 %v3576_v19, 16  ;;  %v4145_v31 = vrot.slane %v4046_v15, 5  ;;  %v7489_v62 = vrot.slane %v4044_v55, 9  ;;  %v7495_v15 = vrot.slane %v4062_v35, 9 }
 0x26b   : > { %v3924_v23 = vrot.slane %v3923_v20, 4  ;;  %v3934_v12 = vrot.slane %v3933_v7, 4  ;;  %v3963_v50 = vsel %vm8971_vm2, %v3958_v41, %v3962_v28  ;;  %v4156_v20 = vrot.slane %v4051_v3, 5  ;;  %v4050_v7 = vld [vmem:[#allocation2 + $0x30] sm:$0xe] }
 0x26c   : > { %v3938_v24 = vrot.slane %v3936_v38, 5  ;;  %v7488_v61 = vcombine.low %v3953_v48, %v3963_v50  ;;  %v4146_v37 = vsel %vm9083_vm13, %v4144_v60, %v4145_v31  ;;  %v4143_v0 = vsel %vm9083_vm13, %v7489_v62, %v4142_v58  ;;  %v4052_v38 = vld [vmem:[#allocation2 + $0x38] sm:$0x1]  ;;  %v4059_v41 = vld [vmem:[#allocation2 + $0x54] sm:$0xe] }
 0x26d   : > { %v7505_v4 = vcombine.low %v4143_v0, %v4146_v37  ;;  %v4158_v49 = vrot.slane %v4156_v20, 4  ;;  %v4159_v34 = vrot.slane %v4052_v38, 5  ;;  %v4061_v28 = vld [vmem:[#allocation2 + $0x5c] sm:$0x1]  ;;  %v4063_v50 = vld [vmem:[#allocation2 + $0x64] sm:$0xf] }
 0x26e   : > { %v3939_v30 = vsel %vm8971_vm2, %v3934_v12, %v3938_v24  ;;  %v7492_v12 = vrot.slane %v4053_v11, 9  ;;  %v4165_v24 = vrot.slane %v4163_v13, 4  ;;  %v4180_v48 = vrot.slane %v4061_v28, 5  ;;  %v4064_v58 = vld [vmem:[#allocation2 + $0x68] sm:$0x1] }
 0x26f   : > { %5686 = vmatmul.mubr.bf16.gmra.mrb[80].mxu0 %v7389_v22  ;;  %v2197_v22 = vld [vmem:[#allocation2 + $0xb4] sm:$0xe]  ;;  %v4187_v55 = vrot.slane %v4064_v58, 5 }
 0x270   : > { %5695 = vmatprep.mubr.bf16.mxu0 %v8436_v56  ;;  %v7376_v52 = vrot.slane %v2197_v22, 9  ;;  %v3929_v56 = vsel %vm8971_vm2, %v3924_v23, %v3928_v17  ;;  %v4048_v17 = vld [vmem:[#allocation2 + $0x28] sm:$0xf]  ;;  %v4166_v22 = vrot.slane %v4055_v57, 5  ;;  %v4164_v10 = vsel %vm9083_vm13, %v7492_v12, %v4163_v13  ;;  %v4073_v13 = vld [vmem:[#allocation2 + $0x8c] sm:$0x1] }
 0x271   : > { %6062 = vmatmul.mubr.bf16.gmra.mrb[44].mxu1 %v8435_v43  ;;  %v7487_v43 = vcombine.low %v3929_v56, %v3939_v30  ;;  %v4149_v19 = vrot.slane %v4048_v17, 5  ;;  %v7493_v56 = vrot.slane %v4056_v5, 9  ;;  %v4066_v17 = vld [vmem:[#allocation2 + $0x70] sm:$0xf]  ;;  %v4208_v12 = vrot.slane %v4073_v13, 5 }
 0x272   : > { %6071 = vmatprep.mubr.bf16.mxu1 %v7485_v45  ;;  %v2359_v45 = vsel %vm9083_vm13, %v7376_v52, %v2358_v25  ;;  %v4057_v25 = vld [vmem:[#allocation2 + $0x4c] sm:$0xf]  ;;  %v4167_v33 = vsel %vm9083_vm13, %v4165_v24, %v4166_v22  ;;  %v4191_v37 = vrot.slane %v4066_v17, 5  ;;  %v4075_v24 = vld [vmem:[#allocation2 + $0x94] sm:$0xf] }
 0x273   : > { %v7392_v21 = vcombine.low %v2359_v45, %v2362_v46  ;;  %v4151_v6 = vrot.slane %v4149_v19, 4  ;;  %v4170_v26 = vrot.slane %v4057_v25, 5  ;;  %v7508_v52 = vcombine.low %v4164_v10, %v4167_v33  ;;  %v4074_v33 = vld [vmem:[#allocation2 + $0x90] sm:$0xe]  ;;  %v4080_v17 = vld [vmem:[#allocation2 + $0xa8] sm:$0xe] }
 0x274   : > { %v7494_v45 = vrot.slane %v4059_v41, 9  ;;  %v4179_v46 = vrot.slane %v4177_v44, 4  ;;  %v4212_v10 = vrot.slane %v4075_v24, 5 }
 0x275   : > { %v4172_v30 = vrot.slane %v4170_v26, 4  ;;  %v4171_v51 = vsel %vm9083_vm13, %v7493_v56, %v4170_v26  ;;  %v4076_v26 = vld [vmem:[#allocation2 + $0x98] sm:$0x1] }
 0x276   : > { %v4215_v56 = vrot.slane %v4076_v26, 5 }
 0x277   : > { %5696 = vmatmul.mubr.bf16.gmra.mrb[84].mxu0 %v7390_v8  ;;  %v7490_v8 = vrot.slane %v4047_v36, 9  ;;  %v4067_v36 = vld [vmem:[#allocation2 + $0x74] sm:$0x1] }
 0x278   : > { %5705 = vmatprep.mubr.bf16.mxu0 %v8441_v9  ;;  %v4153_v9 = vsel %vm9083_vm13, %v4151_v6, %v4152_v54  ;;  %v4069_v6 = vld [vmem:[#allocation2 + $0x7c] sm:$0xf] }
 0x279   : > { %6072 = vmatmul.mubr.bf16.gmra.mrb[48].mxu1 %v8440_v27  ;;  %v4150_v32 = vsel %vm9083_vm13, %v7490_v8, %v4149_v19  ;;  %v7491_v27 = vrot.slane %v4050_v7, 9  ;;  %v4065_v19 = vld [vmem:[#allocation2 + $0x6c] sm:$0xe]  ;;  %v4194_v8 = vrot.slane %v4067_v36, 5 }
 0x27a   : > { %6081 = vmatprep.mubr.bf16.mxu1 %v7486_v47  ;;  %v7506_v40 = vcombine.low %v4150_v32, %v4153_v9  ;;  %v4160_v47 = vsel %vm9083_vm13, %v4158_v49, %v4159_v34  ;;  %v7496_v0 = vrot.slane %v4065_v19, 9  ;;  %v4198_v32 = vrot.slane %v4069_v6, 5  ;;  %v4068_v9 = vld [vmem:[#allocation2 + $0x78] sm:$0xe]  ;;  %v4072_v49 = vld [vmem:[#allocation2 + $0x88] sm:$0xf] }
 0x27b   : > { %v4157_v63 = vsel %vm9083_vm13, %v7491_v27, %v4156_v20  ;;  %v4070_v20 = vld [vmem:[#allocation2 + $0x80] sm:$0x1]  ;;  %v7497_v38 = vrot.slane %v4068_v9, 9  ;;  %v4083_v9 = vld [vmem:[#allocation2 + $0xb4] sm:$0xe] }
 0x27c   : > { %v7507_v23 = vcombine.low %v4157_v63, %v4160_v47  ;;  %v4192_v54 = vsel %vm9083_vm13, %v7496_v0, %v4191_v37  ;;  %v4201_v27 = vrot.slane %v4070_v20, 5  ;;  %v4205_v63 = vrot.slane %v4072_v49, 5  ;;  %v4071_v47 = vld [vmem:[#allocation2 + $0x84] sm:$0xe]  ;;  %v4084_v0 = vld [vmem:[#allocation2 + $0xb8] sm:$0xf] }
 0x27d   : > { %v4199_v34 = vsel %vm9083_vm13, %v7497_v38, %v4198_v32  ;;  %v7498_v57 = vrot.slane %v4071_v47, 9  ;;  %v4085_v20 = vld [vmem:[#allocation2 + $0xbc] sm:$0x1]  ;;  %v7502_v38 = vrot.slane %v4083_v9, 9 }
 0x27f   : > { %5706 = vmatmul.mubr.bf16.gmra.mrb[88].mxu0 %v7391_v29  ;;  %v4058_v29 = vld [vmem:[#allocation2 + $0x50] sm:$0x1]  ;;  %v4206_v22 = vsel %vm9083_vm13, %v7498_v57, %v4205_v63 }
 0x280   : > { %5715 = vmatprep.mubr.bf16.mxu0 %v8443_v39  ;;  %v4173_v39 = vrot.slane %v4058_v29, 5  ;;  %v7499_v29 = vrot.slane %v4074_v33, 9 }
 0x281   : > { %6082 = vmatmul.mubr.bf16.gmra.mrb[52].mxu1 %v8442_v1 }
 0x282   : > { %6091 = vmatprep.mubr.bf16.mxu1 %v7487_v43  ;;  %v4174_v1 = vsel %vm9083_vm13, %v4172_v30, %v4173_v39  ;;  %v4078_v39 = vld [vmem:[#allocation2 + $0xa0] sm:$0xf] }
 0x283   : > { %v7509_v43 = vcombine.low %v4171_v51, %v4174_v1  ;;  %v4213_v1 = vsel %vm9083_vm13, %v7499_v29, %v4212_v10  ;;  %v4219_v28 = vrot.slane %v4078_v39, 5  ;;  %v4091_v39 = vld [vmem:[#allocation2 + $0xd4] sm:$0x1] }
 0x287   : > { %5716 = vmatmul.mubr.bf16.gmra.mrb[92].mxu0 %v7392_v21  ;;  %v4178_v21 = vsel %vm9083_vm13, %v7494_v45, %v4177_v44  ;;  %v4079_v45 = vld [vmem:[#allocation2 + $0xa4] sm:$0x1] }
 0x289   : > { %6092 = vmatmul.mubr.bf16.gmra.mrb[56].mxu1 %v8447_v42  ;;  %v4184_v42 = vrot.slane %v4063_v50, 5  ;;  %v4221_v50 = vrot.slane %v4219_v28, 4 }
 0x28a   : > { %6101 = vmatprep.mubr.bf16.mxu1 %v7488_v61  ;;  %v4181_v61 = vsel %vm9083_vm13, %v4179_v46, %v4180_v48 }
 0x28b   : > { %v4186_v60 = vrot.slane %v4184_v42, 4  ;;  %v4185_v31 = vsel %vm9083_vm13, %v7495_v15, %v4184_v42  ;;  %v4081_v42 = vld [vmem:[#allocation2 + $0xac] sm:$0xf] }
 0x28d   : > { %v4188_v62 = vsel %vm9083_vm13, %v4186_v60, %v4187_v55  ;;  %v4226_v55 = vrot.slane %v4081_v42, 5 }
 0x28e   : > { %v7511_v53 = vcombine.low %v4185_v31, %v4188_v62  ;;  %v4082_v31 = vld [vmem:[#allocation2 + $0xb0] sm:$0x1] }
 0x28f   : > { %v4228_v19 = vrot.slane %v4226_v55, 4  ;;  %v4229_v36 = vrot.slane %v4082_v31, 5 }
 0x291   : > { %6102 = vmatmul.mubr.bf16.gmra.mrb[60].mxu1 %v8448_v59  ;;  %v7510_v59 = vcombine.low %v4178_v21, %v4181_v61  ;;  %v4222_v21 = vrot.slane %v4079_v45, 5 }
 0x292   : > { %6144 = vmatprep.mubr.bf16.mxu1 %v10714_v2 }
 0x293   : > { %v4223_v60 = vsel %vm9083_vm13, %v4221_v50, %v4222_v21 }
 0x299   : > { %6145 = vmatmul.mubr.bf16.vlgmr.msra.gmra.mrb[0].mxu1 %v7505_v4  ;;  %v4193_v4 = vrot.slane %v4191_v37, 4  ;;  %v7501_v37 = vrot.slane %v4080_v17, 9 }
 0x29a   : > { %6154 = vmatprep.mubr.bf16.mxu1 %v10714_v2 }
 0x29b   : > { %v4195_v3 = vsel %vm9083_vm13, %v4193_v4, %v4194_v8 }
 0x29c   : > { %v7512_v7 = vcombine.low %v4192_v54, %v4195_v3  ;;  %v4227_v54 = vsel %vm9083_vm13, %v7501_v37, %v4226_v55  ;;  %v4230_v3 = vsel %vm9083_vm13, %v4228_v19, %v4229_v36  ;;  %v8449_v36 = vld [vmem:[%s10707_s7] sm:$0xff]  }
 0x2a1   : > { %6155 = vmatmul.mubr.bf16.gmra.mrb[4].mxu1 %v7506_v40  ;;  %v4200_v40 = vrot.slane %v4198_v32, 4  ;;  %v4233_v32 = vrot.slane %v4084_v0, 5  ;;  %v10715_v0 = vmov 0.0  }
 0x2a2   : > { %6164 = vmatprep.mubr.bf16.mxu1 %v10714_v2  ;;  %7823 = vmatprep.subr.bf16.mxu0 %v10715_v0 }
 0x2a3   : > { %v4202_v18 = vsel %vm9083_vm13, %v4200_v40, %v4201_v27  ;;  %v4235_v40 = vrot.slane %v4233_v32, 4  ;;  %v4236_v27 = vrot.slane %v4085_v20, 5  ;;  %v4234_v13 = vsel %vm9083_vm13, %v7502_v38, %v4233_v32  ;;  %7824 = vmatpush3.bf16.msra.mxu0 %v8449_v36 }
 0x2a4   : > { %v7513_v11 = vcombine.low %v4199_v34, %v4202_v18  ;;  %v4087_v34 = vld [vmem:[#allocation2 + $0xc4] sm:$0xf]  ;;  %7825 = vmatprep.subr.bf16.mxu0 %v10715_v0 }
 0x2a5   : > { %v4240_v57 = vrot.slane %v4087_v34, 5 }
 0x2a9   : > { %6165 = vmatmul.mubr.bf16.gmra.mrb[8].mxu1 %v7507_v23  ;;  %v4207_v23 = vrot.slane %v4205_v63, 4 }
 0x2aa   : > { %6174 = vmatprep.mubr.bf16.mxu1 %v10714_v2 }
 0x2ab   : > { %v4209_v25 = vsel %vm9083_vm13, %v4207_v23, %v4208_v12  ;;  %v4086_v23 = vld [vmem:[#allocation2 + $0xc0] sm:$0xe]  ;;  %v4088_v12 = vld [vmem:[#allocation2 + $0xc8] sm:$0x1] }
 0x2ac   : > { %v7514_v5 = vcombine.low %v4206_v22, %v4209_v25  ;;  %v4090_v22 = vld [vmem:[#allocation2 + $0xd0] sm:$0xf]  ;;  %v7503_v25 = vrot.slane %v4086_v23, 9  ;;  %v4243_v33 = vrot.slane %v4088_v12, 5 }
 0x2ad   : > { %v4247_v29 = vrot.slane %v4090_v22, 5  ;;  %v8451_v22 = vld [vmem:[%s10707_s7 + $0x10] sm:$0xff]  }
 0x2af   : > { %v4249_v45 = vrot.slane %v4247_v29, 4 }
 0x2b1   : > { %6175 = vmatmul.mubr.bf16.gmra.mrb[12].mxu1 %v7508_v52  ;;  %v4214_v52 = vrot.slane %v4212_v10, 4  ;;  %v4242_v10 = vrot.slane %v4240_v57, 4 }
 0x2b2   : > { %6184 = vmatprep.mubr.bf16.mxu1 %v10714_v2 }
 0x2b3   : > { %v4216_v44 = vsel %vm9083_vm13, %v4214_v52, %v4215_v56  ;;  %v4089_v56 = vld [vmem:[#allocation2 + $0xcc] sm:$0xe] }
 0x2b4   : > { %v7515_v46 = vcombine.low %v4213_v1, %v4216_v44  ;;  %v4241_v44 = vsel %vm9083_vm13, %v7503_v25, %v4240_v57 }
 0x2b9   : > { %6185 = vmatmul.mubr.bf16.gmra.mrb[16].mxu1 %v7509_v43  ;;  %v4077_v43 = vld [vmem:[#allocation2 + $0x9c] sm:$0xe] }
 0x2ba   : > { %6194 = vmatprep.mubr.bf16.mxu1 %v10714_v2  ;;  %v7500_v48 = vrot.slane %v4077_v43, 9  ;;  %v7504_v43 = vrot.slane %v4089_v56, 9 }
 0x2bc   : > { %v4220_v15 = vsel %vm9083_vm13, %v7500_v48, %v4219_v28  ;;  %v4244_v28 = vsel %vm9083_vm13, %v4242_v10, %v4243_v33  ;;  %v4248_v42 = vsel %vm9083_vm13, %v7504_v43, %v4247_v29  ;;  %v8452_v43 = vld [vmem:[%s10707_s7 + $0x18] sm:$0xff]  }
 0x2bd   : > { %v7516_v62 = vcombine.low %v4220_v15, %v4223_v60  ;;  %v7519_v48 = vcombine.low %v4241_v44, %v4244_v28 }
 0x2c1   : > { %6195 = vmatmul.mubr.bf16.gmra.mrb[20].mxu1 %v7510_v59 }
 0x2c2   : > { %6204 = vmatprep.mubr.bf16.mxu1 %v10714_v2 }
 0x2c9   : > { %6205 = vmatmul.mubr.bf16.gmra.mrb[24].mxu1 %v7511_v53 }
 0x2ca   : > { %6214 = vmatprep.mubr.bf16.mxu1 %v10714_v2 }
 0x2d1   : > { %6215 = vmatmul.mubr.bf16.gmra.mrb[28].mxu1 %v7512_v7  ;;  %v7517_v7 = vcombine.low %v4227_v54, %v4230_v3 }
 0x2d2   : > { %6224 = vmatprep.mubr.bf16.mxu1 %v10714_v2 }
 0x2d9   : > { %6225 = vmatmul.mubr.bf16.gmra.mrb[32].mxu1 %v7513_v11  ;;  %v4237_v11 = vsel %vm9083_vm13, %v4235_v40, %v4236_v27  ;;  %v8450_v40 = vld [vmem:[%s10707_s7 + $0x8] sm:$0xff]  }
 0x2da   : > { %6234 = vmatprep.mubr.bf16.mxu1 %v10714_v2  ;;  %v7518_v24 = vcombine.low %v4234_v13, %v4237_v11  ;;  %7826 = vmatpush3.bf16.msra.mxu0 %v8450_v40 }
 0x2db   : > { %7827 = vmatprep.subr.bf16.mxu0 %v10715_v0 }
 0x2de   : > { %7828 = vmatpush3.bf16.msra.mxu0 %v8451_v22  ;;  %v8453_v22 = vld [vmem:[%s10707_s7 + $0x20] sm:$0xff]  }
 0x2df   : > { %7829 = vmatprep.subr.bf16.mxu0 %v10715_v0 }
 0x2e1   : > { %6235 = vmatmul.mubr.bf16.gmra.mrb[36].mxu1 %v7514_v5 }
 0x2e2   : > { %v9987_v30 = vpop.f32.mrb[32].mxu0  ;;  %6244 = vmatprep.mubr.bf16.mxu1 %v10714_v2  ;;  %7830 = vmatpush3.bf16.msra.mxu0 %v8452_v43 }
 0x2e3   : > { %v9990_v16 = vpop.f32.mrb[33].mxu0  ;;  %7831 = vmatprep.subr.bf16.mxu0 %v10715_v0 }
 0x2e4   : > { %v9992_v51 = vpop.f32.mrb[34].mxu0 }
 0x2e5   : > { %v9998_v41 = vpop.f32.mrb[35].mxu0 }
 0x2e6   : > { %7832 = vmatpush3.bf16.msra.mxu0 %v8453_v22  ;;  %v8454_v22 = vld [vmem:[%s10707_s7 + $0x28] sm:$0xff]  }
 0x2e9   : > { %6245 = vmatmul.mubr.bf16.gmra.mrb[40].mxu1 %v7515_v46  ;;  %v4250_v46 = vrot.slane %v4091_v39, 5 }
 0x2ea   : > { %v10000_v61 = vpop.f32.mrb[36].mxu0  ;;  %6254 = vmatprep.mubr.bf16.mxu1 %v10714_v2 }
 0x2eb   : > { %v10002_v35 = vpop.f32.mrb[37].mxu0  ;;  %v4251_v15 = vsel %vm9083_vm13, %v4249_v45, %v4250_v46 }
 0x2ec   : > { %v10005_v58 = vpop.f32.mrb[38].mxu0  ;;  %v7520_v17 = vcombine.low %v4248_v42, %v4251_v15 }
 0x2ed   : > { %v10007_v59 = vpop.f32.mrb[39].mxu0 }
 0x2f1   : > { %6255 = vmatmul.mubr.bf16.gmra.mrb[44].mxu1 %v7516_v62 }
 0x2f2   : > { %v10013_v53 = vpop.f32.mrb[40].mxu0  ;;  %6264 = vmatprep.mubr.bf16.mxu1 %v10714_v2 }
 0x2f3   : > { %v10015_v4 = vpop.f32.mrb[41].mxu0 }
 0x2f4   : > { %v10018_v8 = vpop.f32.mrb[42].mxu0 }
 0x2f5   : > { %v10020_v6 = vpop.f32.mrb[43].mxu0 }
 0x2f9   : > { %6265 = vmatmul.mubr.bf16.gmra.mrb[48].mxu1 %v7517_v7 }
 0x2fa   : > { %v10026_v49 = vpop.f32.mrb[44].mxu0  ;;  %6274 = vmatprep.mubr.bf16.mxu1 %v10714_v2 }
 0x2fb   : > { %v10028_v18 = vpop.f32.mrb[45].mxu0 }
 0x2fc   : > { %v10031_v63 = vpop.f32.mrb[46].mxu0 }
 0x2fd   : > { %v10033_v47 = vpop.f32.mrb[47].mxu0 }
 0x301   : > { %6275 = vmatmul.mubr.bf16.gmra.mrb[52].mxu1 %v7518_v24 }
 0x302   : > { %v10039_v26 = vpop.f32.mrb[48].mxu0  ;;  %6284 = vmatprep.mubr.bf16.mxu1 %v10714_v2 }
 0x303   : > { %v10041_v5 = vpop.f32.mrb[49].mxu0 }
 0x304   : > { %v10044_v52 = vpop.f32.mrb[50].mxu0 }
 0x305   : > { %v10046_v1 = vpop.f32.mrb[51].mxu0 }
 0x309   : > { %6285 = vmatmul.mubr.bf16.gmra.mrb[56].mxu1 %v7519_v48 }
 0x30a   : > { %v10052_v50 = vpop.f32.mrb[52].mxu0  ;;  %6294 = vmatprep.mubr.bf16.mxu1 %v10714_v2 }
 0x30b   : > { %v10054_v21 = vpop.f32.mrb[53].mxu0 }
 0x30c   : > { %v10061_v60 = vpop.f32.mrb[54].mxu0 }
 0x30d   : > { %v10063_v55 = vpop.f32.mrb[55].mxu0 }
 0x311   : > { %6295 = vmatmul.mubr.bf16.gmra.mrb[60].mxu1 %v7520_v17 }
 0x312   : > { %v10065_v31 = vpop.f32.mrb[56].mxu0 }
 0x313   : > { %v10067_v62 = vpop.f32.mrb[57].mxu0 }
 0x314   : > { %v10069_v37 = vpop.f32.mrb[58].mxu0 }
 0x315   : > { %v10071_v19 = vpop.f32.mrb[59].mxu0 }
 0x31a   : > { %v10076_v14 = vpop.f32.mrb[60].mxu0 }
 0x31b   : > { %v10079_v54 = vpop.f32.mrb[61].mxu0 }
 0x31c   : > { %v10081_v3 = vpop.f32.mrb[62].mxu0 }
 0x31d   : > { %v10084_v32 = vpop.f32.mrb[63].mxu0 }
 0x322   : > { %v10086_v9 = vpop.f32.mrb[64].mxu0 }
 0x323   : > { %v10088_v20 = vpop.f32.mrb[65].mxu0 }
 0x324   : > { %v10090_v7 = vpop.f32.mrb[66].mxu0 }
 0x325   : > { %v10092_v38 = vpop.f32.mrb[67].mxu0 }
 0x32a   : > { %v10097_v27 = vpop.f32.mrb[68].mxu0 }
 0x32b   : > { %v10099_v34 = vpop.f32.mrb[69].mxu0 }
 0x32c   : > { %v10101_v13 = vpop.f32.mrb[70].mxu0 }
 0x32d   : > { %v10104_v11 = vpop.f32.mrb[71].mxu0 }
 0x332   : > { %v10106_v57 = vpop.f32.mrb[72].mxu0 }
 0x333   : > { %v10108_v23 = vpop.f32.mrb[73].mxu0 }
 0x334   : > { %v10110_v12 = vpop.f32.mrb[74].mxu0 }
 0x335   : > { %v10112_v24 = vpop.f32.mrb[75].mxu0 }
 0x33a   : > { %v10117_v25 = vpop.f32.mrb[76].mxu0 }
 0x33b   : > { %10737 = vst [vmem:[#allocation8_spill] sm:$0xff] %v10117_v25  ;;  %v10119_v10 = vpop.f32.mrb[77].mxu0 }
 0x33c   : > { %10738 = vst [vmem:[#allocation9_spill] sm:$0xff] %v10119_v10  ;;  %v10121_v33 = vpop.f32.mrb[78].mxu0 }
 0x33d   : > { %10739 = vst [vmem:[#allocation10_spill] sm:$0xff] %v10121_v33  ;;  %v10124_v29 = vpop.f32.mrb[79].mxu0 }
 0x33e   : > { %10740 = vst [vmem:[#allocation11_spill] sm:$0xff] %v10124_v29 }
 0x342   : > { %v10126_v56 = vpop.f32.mrb[80].mxu0 }
 0x343   : > { %10741 = vst [vmem:[#allocation12_spill] sm:$0xff] %v10126_v56  ;;  %v10128_v39 = vpop.f32.mrb[81].mxu0 }
 0x344   : > { %10742 = vst [vmem:[#allocation13_spill] sm:$0xff] %v10128_v39  ;;  %v10130_v44 = vpop.f32.mrb[82].mxu0 }
 0x345   : > { %10743 = vst [vmem:[#allocation14_spill] sm:$0xff] %v10130_v44  ;;  %v10132_v28 = vpop.f32.mrb[83].mxu0 }
 0x346   : > { %10744 = vst [vmem:[#allocation15_spill] sm:$0xff] %v10132_v28 }
 0x34a   : > { %v10137_v45 = vpop.f32.mrb[84].mxu0 }
 0x34b   : > { %10745 = vst [vmem:[#allocation16_spill] sm:$0xff] %v10137_v45  ;;  %v10139_v46 = vpop.f32.mrb[85].mxu0 }
 0x34c   : > { %10746 = vst [vmem:[#allocation17_spill] sm:$0xff] %v10139_v46  ;;  %v10141_v48 = vpop.f32.mrb[86].mxu0 }
 0x34d   : > { %10747 = vst [vmem:[#allocation18_spill] sm:$0xff] %v10141_v48  ;;  %v10144_v42 = vpop.f32.mrb[87].mxu0 }
 0x34e   : > { %10748 = vst [vmem:[#allocation19_spill] sm:$0xff] %v10144_v42  ;;  %v10756_v42 = vmov 0.0  }
 0x34f   : > { %7833 = vmatprep.subr.bf16.mxu0 %v10756_v42  ;;  %7839 = vmatprep.mubr.msk.bf16.mxu0 %vm8564_vm14, %v10756_v42 }
 0x350   : > { %7834 = vmatpush3.bf16.msra.mxu0 %v8454_v22 }
 0x351   : > { %7835 = vmatprep.subr.bf16.mxu0 %v10756_v42 }
 0x352   : > { %v10146_v15 = vpop.f32.mrb[88].mxu0 }
 0x353   : > { %10749 = vst [vmem:[#allocation20_spill] sm:$0xff] %v10146_v15  ;;  %v10148_v17 = vpop.f32.mrb[89].mxu0 }
 0x354   : > { %10750 = vst [vmem:[#allocation21_spill] sm:$0xff] %v10148_v17  ;;  %v10150_v36 = vpop.f32.mrb[90].mxu0  ;;  %v6307_v17 = vlaneseq }
 0x355   : > { %10751 = vst [vmem:[#allocation22_spill] sm:$0xff] %v10150_v36  ;;  %v10152_v40 = vpop.f32.mrb[91].mxu0 }
 0x356   : > { %10752 = vst [vmem:[#allocation23_spill] sm:$0xff] %v10152_v40  ;;  %v6308_v48 = vshrl.u32 %v6307_v17, 7  ;;  %v6305_v40 = vld [vmem:[%s10705_s5] sm:$0x3] }
 0x358   : > { %v10166_v36 = vsub.s32 0, %v6308_v48  ;;  %v10171_v46 = vsub.s32 1, %v6308_v48 }
 0x35a   : > { %v10157_v2 = vpop.f32.mrb[92].mxu0  ;;  %10758 = vst [vmem:[#allocation28_spill] sm:$0xff] %v10166_v36  ;;  %10759 = vst [vmem:[#allocation29_spill] sm:$0xff] %v10171_v46 }
 0x35b   : > { %10753 = vst [vmem:[#allocation24_spill] sm:$0xff] %v10157_v2  ;;  %v10159_v43 = vpop.f32.mrb[93].mxu0 }
 0x35c   : > { %10754 = vst [vmem:[#allocation25_spill] sm:$0xff] %v10159_v43  ;;  %v10161_v0 = vpop.f32.mrb[94].mxu0  ;;  %v10184_v43 = vrot.slane %v6305_v40, %v10171_v46 }
 0x35d   : > { %10755 = vst [vmem:[#allocation26_spill] sm:$0xff] %v10161_v0  ;;  %v10164_v15 = vpop.f32.mrb[95].mxu0  ;;  %v6381_v0 = vld [vmem:[%s10706_s6] sm:$0x3] }
 0x35e   : > { %10757 = vst [vmem:[#allocation27_spill] sm:$0xff] %v10164_v15  ;;  %v10180_v15 = vrot.slane %v6305_v40, %v10166_v36  ;;  %v10188_v2 = vrot.slane %v6381_v0, %v10166_v36  ;;  %v10192_v44 = vrot.slane %v6381_v0, %v10171_v46 }
 0x36c   : > { %v6146_v17 = vpop.f32.mrb[0].mxu1 }
 0x36d   : > { %v7863_v48 = vadd.f32 %v6146_v17, %v9987_v30  ;;  %v6148_v45 = vpop.f32.mrb[1].mxu1 }
 0x36e   : > { %v7864_v28 = vadd.f32 %v6148_v45, %v9990_v16  ;;  %v6150_v22 = vpop.f32.mrb[2].mxu1 }
 0x36f   : > { %v6317_v39 = vmul.f32 %v7863_v48, %v10180_v15  ;;  %v7865_v56 = vadd.f32 %v6150_v22, %v9992_v51  ;;  %v6152_v29 = vpop.f32.mrb[3].mxu1 }
 0x370   : > { %v6318_v40 = vmul.f32 %v7864_v28, %v10184_v43  ;;  %v7866_v33 = vadd.f32 %v6152_v29, %v9998_v41 }
 0x371   : > { %v6393_v30 = vadd.f32 %v10188_v2, %v6317_v39  ;;  %v6319_v17 = vmul.f32 %v7865_v56, %v10180_v15 }
 0x372   : > { %v6394_v36 = vadd.f32 %v10192_v44, %v6318_v40  ;;  %v6320_v16 = vmul.f32 %v7866_v33, %v10184_v43 }
 0x373   : > { %v6395_v0 = vadd.f32 %v10188_v2, %v6319_v17  ;;  %v6457_v46 = vmax.f32 %v6393_v30, 0.0 }
 0x374   : > { %v6396_v45 = vadd.f32 %v10192_v44, %v6320_v16  ;;  %v6156_v48 = vpop.f32.mrb[4].mxu1  ;;  %v6458_v10 = vmax.f32 %v6394_v36, 0.0 }
 0x375   : > { %v6459_v51 = vmax.f32 %v6395_v0, 0.0  ;;  %v7867_v22 = vadd.f32 %v6156_v48, %v10000_v61  ;;  %v6158_v28 = vpop.f32.mrb[5].mxu1  ;;  %v8455_v0 = vld [vmem:[%s10707_s7 + $0x30] sm:$0xff]  }
 0x376   : > { %v6460_v41 = vmax.f32 %v6396_v45, 0.0  ;;  %v7868_v29 = vadd.f32 %v6158_v28, %v10002_v35  ;;  %v6160_v39 = vpop.f32.mrb[6].mxu1  ;;  %7836 = vmatpush3.bf16.msra.mxu0 %v8455_v0  ;;  %v8456_v28 = vld [vmem:[%s10707_s7 + $0x38] sm:$0xff]  }
 0x377   : > { %v10206_v56 = vpack.c.bf16 %v6459_v51, %v6457_v46  ;;  %v6321_v40 = vmul.f32 %v7867_v22, %v10180_v15  ;;  %v7869_v33 = vadd.f32 %v6160_v39, %v10005_v58  ;;  %v6162_v17 = vpop.f32.mrb[7].mxu1  ;;  %7837 = vmatprep.subr.bf16.mxu0 %v10756_v42 }
 0x378   : > { %v10210_v25 = vpack.c.bf16 %v6460_v41, %v6458_v10  ;;  %v6322_v30 = vmul.f32 %v7868_v29, %v10184_v43  ;;  %v7870_v16 = vadd.f32 %v6162_v17, %v10007_v59 }
 0x379   : > { %10760 = vst [vmem:[#allocation30_spill] sm:$0xff] %v10206_v56  ;;  %v6397_v61 = vadd.f32 %v10188_v2, %v6321_v40  ;;  %v6323_v36 = vmul.f32 %v7869_v33, %v10180_v15  ;;  %v6553_v58 = vunpack.c.l.bf16 %v10206_v56  ;;  %v6554_v59 = vunpack.c.h.bf16 %v10206_v56 }
 0x37a   : > { %10761 = vst [vmem:[#allocation31_spill] sm:$0xff] %v10210_v25  ;;  %v6398_v35 = vadd.f32 %v10192_v44, %v6322_v30  ;;  %v6324_v46 = vmul.f32 %v7870_v16, %v10184_v43  ;;  %v6585_v10 = vunpack.c.l.bf16 %v10210_v25  ;;  %v6586_v48 = vunpack.c.h.bf16 %v10210_v25  ;;  %7838 = vmatpush3.bf16.msra.mxu0 %v8456_v28 }
 0x37b   : > { %v6399_v45 = vadd.f32 %v10188_v2, %v6323_v36  ;;  %v6461_v41 = vmax.f32 %v6397_v61, 0.0 }
 0x37c   : > { %v6400_v51 = vadd.f32 %v10192_v44, %v6324_v46  ;;  %v6166_v22 = vpop.f32.mrb[8].mxu1  ;;  %v6462_v33 = vmax.f32 %v6398_v35, 0.0  ;;  %v6617_v36 = vadd.f32 %v6585_v10, %v6553_v58  ;;  %v6618_v61 = vadd.f32 %v6586_v48, %v6554_v59 }
 0x37d   : > { %v6463_v29 = vmax.f32 %v6399_v45, 0.0  ;;  %v7871_v39 = vadd.f32 %v6166_v22, %v10013_v53  ;;  %v6168_v40 = vpop.f32.mrb[9].mxu1 }
 0x37e   : > { %v6464_v17 = vmax.f32 %v6400_v51, 0.0  ;;  %v7872_v30 = vadd.f32 %v6168_v40, %v10015_v4  ;;  %v6170_v16 = vpop.f32.mrb[10].mxu1  ;;  %v6649_v48 = vadd.f32 %v6618_v61, %v6617_v36 }
 0x37f   : > { %v10235_v46 = vpack.c.bf16 %v6463_v29, %v6461_v41  ;;  %v6325_v0 = vmul.f32 %v7871_v39, %v10180_v15  ;;  %v7873_v25 = vadd.f32 %v6170_v16, %v10018_v8  ;;  %v6172_v56 = vpop.f32.mrb[11].mxu1 }
 0x380   : > { %v10239_v45 = vpack.c.bf16 %v6464_v17, %v6462_v33  ;;  %v6326_v53 = vmul.f32 %v7872_v30, %v10184_v43  ;;  %v7874_v22 = vadd.f32 %v6172_v56, %v10020_v6 }
 0x381   : > { %v6555_v35 = vunpack.c.l.bf16 %v10235_v46  ;;  %v6401_v4 = vadd.f32 %v10188_v2, %v6325_v0  ;;  %v6327_v58 = vmul.f32 %v7873_v25, %v10180_v15  ;;  %v6556_v56 = vunpack.c.h.bf16 %v10235_v46 }
 0x382   : > { %v6587_v10 = vunpack.c.l.bf16 %v10239_v45  ;;  %v6402_v51 = vadd.f32 %v10192_v44, %v6326_v53  ;;  %v6328_v8 = vmul.f32 %v7874_v22, %v10184_v43  ;;  %v6588_v33 = vunpack.c.h.bf16 %v10239_v45 }
 0x383   : > { %v6403_v59 = vadd.f32 %v10188_v2, %v6327_v58  ;;  %v6465_v28 = vmax.f32 %v6401_v4, 0.0 }
 0x384   : > { %v6619_v41 = vadd.f32 %v6587_v10, %v6555_v35  ;;  %v6404_v29 = vadd.f32 %v10192_v44, %v6328_v8  ;;  %v6176_v6 = vpop.f32.mrb[12].mxu1  ;;  %v6466_v17 = vmax.f32 %v6402_v51, 0.0  ;;  %v6620_v8 = vadd.f32 %v6588_v33, %v6556_v56 }
 0x385   : > { %v6467_v39 = vmax.f32 %v6403_v59, 0.0  ;;  %v7875_v40 = vadd.f32 %v6176_v6, %v10026_v49  ;;  %v6178_v25 = vpop.f32.mrb[13].mxu1 }
 0x386   : > { %v6468_v30 = vmax.f32 %v6404_v29, 0.0  ;;  %v7876_v16 = vadd.f32 %v6178_v25, %v10028_v18  ;;  %v6180_v0 = vpop.f32.mrb[14].mxu1  ;;  %v6650_v35 = vadd.f32 %v6649_v48, %v6619_v41  ;;  %v8459_v48 = vld [vmem:[%s10709_s9 + $0x4] ss:$8 sps:$4 sm:$0xff]  }
 0x387   : > { %v10255_v53 = vpack.c.bf16 %v6467_v39, %v6465_v28  ;;  %v6329_v36 = vmul.f32 %v7875_v40, %v10180_v15  ;;  %v7877_v61 = vadd.f32 %v6180_v0, %v10031_v63  ;;  %v6182_v22 = vpop.f32.mrb[15].mxu1  ;;  %6904 = vmatprep.subr.bf16.mxu0 %v8459_v48 }
 0x388   : > { %v10259_v4 = vpack.c.bf16 %v6468_v30, %v6466_v17  ;;  %v6330_v49 = vmul.f32 %v7876_v16, %v10184_v43  ;;  %v7878_v58 = vadd.f32 %v6182_v22, %v10033_v47  ;;  %v6651_v47 = vadd.f32 %v6650_v35, %v6620_v8 }
 0x389   : > { %v6557_v10 = vunpack.c.l.bf16 %v10255_v53  ;;  %v6405_v51 = vadd.f32 %v10188_v2, %v6329_v36  ;;  %v6331_v18 = vmul.f32 %v7877_v61, %v10180_v15  ;;  %v6558_v56 = vunpack.c.h.bf16 %v10255_v53 }
 0x38a   : > { %v6589_v59 = vunpack.c.l.bf16 %v10259_v4  ;;  %v6406_v29 = vadd.f32 %v10192_v44, %v6330_v49  ;;  %v6332_v63 = vmul.f32 %v7878_v58, %v10184_v43  ;;  %v6590_v30 = vunpack.c.h.bf16 %v10259_v4 }
 0x38b   : > { %v6407_v41 = vadd.f32 %v10188_v2, %v6331_v18  ;;  %v6469_v40 = vmax.f32 %v6405_v51, 0.0 }
 0x38c   : > { %v6621_v6 = vadd.f32 %v6589_v59, %v6557_v10  ;;  %v6408_v28 = vadd.f32 %v10192_v44, %v6332_v63  ;;  %v6186_v39 = vpop.f32.mrb[16].mxu1  ;;  %v6470_v16 = vmax.f32 %v6406_v29, 0.0  ;;  %v6622_v29 = vadd.f32 %v6590_v30, %v6558_v56 }
 0x38d   : > { %v6471_v25 = vmax.f32 %v6407_v41, 0.0  ;;  %v7879_v33 = vadd.f32 %v6186_v39, %v10039_v26  ;;  %v6188_v17 = vpop.f32.mrb[17].mxu1 }
 0x38e   : > { %v6472_v0 = vmax.f32 %v6408_v28, 0.0  ;;  %v7880_v36 = vadd.f32 %v6188_v17, %v10041_v5  ;;  %v6190_v61 = vpop.f32.mrb[18].mxu1  ;;  %v6652_v10 = vadd.f32 %v6651_v47, %v6621_v6 }
 0x38f   : > { %v10278_v22 = vpack.c.bf16 %v6471_v25, %v6469_v40  ;;  %v6333_v35 = vmul.f32 %v7879_v33, %v10180_v15  ;;  %v7881_v49 = vadd.f32 %v6190_v61, %v10044_v52  ;;  %v6192_v58 = vpop.f32.mrb[19].mxu1 }
 0x390   : > { %v10282_v51 = vpack.c.bf16 %v6472_v0, %v6470_v16  ;;  %v6334_v26 = vmul.f32 %v7880_v36, %v10184_v43  ;;  %v7882_v18 = vadd.f32 %v6192_v58, %v10046_v1  ;;  %v6653_v47 = vadd.f32 %v6652_v10, %v6622_v29 }
 0x391   : > { %v6559_v8 = vunpack.c.l.bf16 %v10278_v22  ;;  %v6409_v59 = vadd.f32 %v10188_v2, %v6333_v35  ;;  %v6335_v5 = vmul.f32 %v7881_v49, %v10180_v15  ;;  %v6560_v39 = vunpack.c.h.bf16 %v10278_v22 }
 0x392   : > { %v6591_v63 = vunpack.c.l.bf16 %v10282_v51  ;;  %v6410_v48 = vadd.f32 %v10192_v44, %v6334_v26  ;;  %v6336_v52 = vmul.f32 %v7882_v18, %v10184_v43  ;;  %v6592_v17 = vunpack.c.h.bf16 %v10282_v51 }
 0x393   : > { %v6411_v41 = vadd.f32 %v10188_v2, %v6335_v5  ;;  %v6473_v40 = vmax.f32 %v6409_v59, 0.0 }
 0x394   : > { %v6623_v6 = vadd.f32 %v6591_v63, %v6559_v8  ;;  %v6412_v28 = vadd.f32 %v10192_v44, %v6336_v52  ;;  %v6196_v1 = vpop.f32.mrb[20].mxu1  ;;  %v6474_v30 = vmax.f32 %v6410_v48, 0.0  ;;  %v6624_v5 = vadd.f32 %v6592_v17, %v6560_v39 }
 0x395   : > { %v6475_v25 = vmax.f32 %v6411_v41, 0.0  ;;  %v7883_v33 = vadd.f32 %v6196_v1, %v10052_v50  ;;  %v6198_v56 = vpop.f32.mrb[21].mxu1 }
 0x396   : > { %v6476_v16 = vmax.f32 %v6412_v28, 0.0  ;;  %v7884_v0 = vadd.f32 %v6198_v56, %v10054_v21  ;;  %v6200_v36 = vpop.f32.mrb[22].mxu1  ;;  %v6654_v10 = vadd.f32 %v6653_v47, %v6623_v6 }
 0x397   : > { %v10298_v61 = vpack.c.bf16 %v6475_v25, %v6473_v40  ;;  %v6337_v35 = vmul.f32 %v7883_v33, %v10180_v15  ;;  %v7885_v49 = vadd.f32 %v6200_v36, %v10061_v60  ;;  %v6202_v58 = vpop.f32.mrb[23].mxu1 }
 0x398   : > { %v10302_v26 = vpack.c.bf16 %v6476_v16, %v6474_v30  ;;  %v6338_v50 = vmul.f32 %v7884_v0, %v10184_v43  ;;  %v7886_v18 = vadd.f32 %v6202_v58, %v10063_v55  ;;  %v6655_v52 = vadd.f32 %v6654_v10, %v6624_v5 }
 0x399   : > { %v6561_v8 = vunpack.c.l.bf16 %v10298_v61  ;;  %v6413_v59 = vadd.f32 %v10188_v2, %v6337_v35  ;;  %v6339_v21 = vmul.f32 %v7885_v49, %v10180_v15  ;;  %v6562_v6 = vunpack.c.h.bf16 %v10298_v61 }
 0x39a   : > { %v6593_v29 = vunpack.c.l.bf16 %v10302_v26  ;;  %v6414_v63 = vadd.f32 %v10192_v44, %v6338_v50  ;;  %v6340_v60 = vmul.f32 %v7886_v18, %v10184_v43  ;;  %v6594_v25 = vunpack.c.h.bf16 %v10302_v26 }
 0x39b   : > { %v6415_v48 = vadd.f32 %v10188_v2, %v6339_v21  ;;  %v6477_v28 = vmax.f32 %v6413_v59, 0.0 }
 0x39c   : > { %v6625_v41 = vadd.f32 %v6593_v29, %v6561_v8  ;;  %v6416_v47 = vadd.f32 %v10192_v44, %v6340_v60  ;;  %v6206_v55 = vpop.f32.mrb[24].mxu1  ;;  %v6478_v33 = vmax.f32 %v6414_v63, 0.0  ;;  %v6626_v8 = vadd.f32 %v6594_v25, %v6562_v6 }
 0x39d   : > { %v6479_v1 = vmax.f32 %v6415_v48, 0.0  ;;  %v7887_v40 = vadd.f32 %v6206_v55, %v10065_v31  ;;  %v6208_v39 = vpop.f32.mrb[25].mxu1 }
 0x39e   : > { %v6480_v56 = vmax.f32 %v6416_v47, 0.0  ;;  %v7888_v17 = vadd.f32 %v6208_v39, %v10067_v62  ;;  %v6210_v30 = vpop.f32.mrb[26].mxu1  ;;  %v6656_v49 = vadd.f32 %v6655_v52, %v6625_v41 }
 0x39f   : > { %v10318_v16 = vpack.c.bf16 %v6479_v1, %v6477_v28  ;;  %v6341_v0 = vmul.f32 %v7887_v40, %v10180_v15  ;;  %v7889_v36 = vadd.f32 %v6210_v30, %v10069_v37  ;;  %v6212_v35 = vpop.f32.mrb[27].mxu1 }
 0x3a0   : > { %v10322_v58 = vpack.c.bf16 %v6480_v56, %v6478_v33  ;;  %v6342_v31 = vmul.f32 %v7888_v17, %v10184_v43  ;;  %v7890_v10 = vadd.f32 %v6212_v35, %v10071_v19  ;;  %v6657_v29 = vadd.f32 %v6656_v49, %v6626_v8 }
 0x3a1   : > { %v6563_v50 = vunpack.c.l.bf16 %v10318_v16  ;;  %v6417_v18 = vadd.f32 %v10188_v2, %v6341_v0  ;;  %v6343_v62 = vmul.f32 %v7889_v36, %v10180_v15  ;;  %v6564_v48 = vunpack.c.h.bf16 %v10318_v16 }
 0x3a2   : > { %v6595_v59 = vunpack.c.l.bf16 %v10322_v58  ;;  %v6418_v21 = vadd.f32 %v10192_v44, %v6342_v31  ;;  %v6344_v37 = vmul.f32 %v7890_v10, %v10184_v43  ;;  %v6596_v6 = vunpack.c.h.bf16 %v10322_v58 }
 0x3a3   : > { %v6419_v5 = vadd.f32 %v10188_v2, %v6343_v62  ;;  %v6481_v52 = vmax.f32 %v6417_v18, 0.0 }
 0x3a4   : > { %v6627_v63 = vadd.f32 %v6595_v59, %v6563_v50  ;;  %v6420_v60 = vadd.f32 %v10192_v44, %v6344_v37  ;;  %v6216_v19 = vpop.f32.mrb[28].mxu1  ;;  %v6482_v28 = vmax.f32 %v6418_v21, 0.0  ;;  %v6628_v31 = vadd.f32 %v6596_v6, %v6564_v48 }
 0x3a5   : > { %v6483_v41 = vmax.f32 %v6419_v5, 0.0  ;;  %v7891_v47 = vadd.f32 %v6216_v19, %v10076_v14  ;;  %v6218_v55 = vpop.f32.mrb[29].mxu1 }
 0x3a6   : > { %v6484_v1 = vmax.f32 %v6420_v60, 0.0  ;;  %v7892_v40 = vadd.f32 %v6218_v55, %v10079_v54  ;;  %v6220_v39 = vpop.f32.mrb[30].mxu1  ;;  %v6658_v30 = vadd.f32 %v6657_v29, %v6627_v63 }
 0x3a7   : > { %v10338_v25 = vpack.c.bf16 %v6483_v41, %v6481_v52  ;;  %v6345_v33 = vmul.f32 %v7891_v47, %v10180_v15  ;;  %v7893_v56 = vadd.f32 %v6220_v39, %v10081_v3  ;;  %v6222_v17 = vpop.f32.mrb[31].mxu1 }
 0x3a8   : > { %v10342_v0 = vpack.c.bf16 %v6484_v1, %v6482_v28  ;;  %v6346_v14 = vmul.f32 %v7892_v40, %v10184_v43  ;;  %v7894_v36 = vadd.f32 %v6222_v17, %v10084_v32  ;;  %v6659_v62 = vadd.f32 %v6658_v30, %v6628_v31 }
 0x3a9   : > { %v6565_v35 = vunpack.c.l.bf16 %v10338_v25  ;;  %v6421_v49 = vadd.f32 %v10188_v2, %v6345_v33  ;;  %v6347_v54 = vmul.f32 %v7893_v56, %v10180_v15  ;;  %v6566_v21 = vunpack.c.h.bf16 %v10338_v25 }
 0x3aa   : > { %v6597_v10 = vunpack.c.l.bf16 %v10342_v0  ;;  %v6422_v50 = vadd.f32 %v10192_v44, %v6346_v14  ;;  %v6348_v3 = vmul.f32 %v7894_v36, %v10184_v43  ;;  %v6598_v60 = vunpack.c.h.bf16 %v10342_v0 }
 0x3ab   : > { %v6423_v18 = vadd.f32 %v10188_v2, %v6347_v54  ;;  %v6485_v37 = vmax.f32 %v6421_v49, 0.0 }
 0x3ac   : > { %v6629_v8 = vadd.f32 %v6597_v10, %v6565_v35  ;;  %v6424_v59 = vadd.f32 %v10192_v44, %v6348_v3  ;;  %v6226_v32 = vpop.f32.mrb[32].mxu1  ;;  %v6486_v19 = vmax.f32 %v6422_v50, 0.0  ;;  %v6630_v17 = vadd.f32 %v6598_v60, %v6566_v21 }
 0x3ad   : > { %v6487_v5 = vmax.f32 %v6423_v18, 0.0  ;;  %v7895_v29 = vadd.f32 %v6226_v32, %v10086_v9  ;;  %v6228_v63 = vpop.f32.mrb[33].mxu1 }
 0x3ae   : > { %v6488_v48 = vmax.f32 %v6424_v59, 0.0  ;;  %v7896_v52 = vadd.f32 %v6228_v63, %v10088_v20  ;;  %v6230_v41 = vpop.f32.mrb[34].mxu1  ;;  %v6660_v1 = vadd.f32 %v6659_v62, %v6629_v8 }
 0x3af   : > { %v10358_v47 = vpack.c.bf16 %v6487_v5, %v6485_v37  ;;  %v6349_v55 = vmul.f32 %v7895_v29, %v10180_v15  ;;  %v7897_v6 = vadd.f32 %v6230_v41, %v10090_v7  ;;  %v6232_v28 = vpop.f32.mrb[35].mxu1 }
 0x3b0   : > { %v10362_v40 = vpack.c.bf16 %v6488_v48, %v6486_v19  ;;  %v6350_v9 = vmul.f32 %v7896_v52, %v10184_v43  ;;  %v7898_v39 = vadd.f32 %v6232_v28, %v10092_v38  ;;  %v6661_v35 = vadd.f32 %v6660_v1, %v6630_v17 }
 0x3b1   : > { %v6567_v33 = vunpack.c.l.bf16 %v10358_v47  ;;  %v6425_v56 = vadd.f32 %v10188_v2, %v6349_v55  ;;  %v6351_v20 = vmul.f32 %v7897_v6, %v10180_v15  ;;  %v6568_v31 = vunpack.c.h.bf16 %v10358_v47 }
 0x3b2   : > { %v6599_v30 = vunpack.c.l.bf16 %v10362_v40  ;;  %v6426_v14 = vadd.f32 %v10192_v44, %v6350_v9  ;;  %v6352_v7 = vmul.f32 %v7898_v39, %v10184_v43  ;;  %v6600_v62 = vunpack.c.h.bf16 %v10362_v40 }
 0x3b3   : > { %v6427_v36 = vadd.f32 %v10188_v2, %v6351_v20  ;;  %v6489_v10 = vmax.f32 %v6425_v56, 0.0 }
 0x3b4   : > { %v6631_v49 = vadd.f32 %v6599_v30, %v6567_v33  ;;  %v6428_v54 = vadd.f32 %v10192_v44, %v6352_v7  ;;  %v6236_v38 = vpop.f32.mrb[36].mxu1  ;;  %v6490_v8 = vmax.f32 %v6426_v14, 0.0  ;;  %v6632_v55 = vadd.f32 %v6600_v62, %v6568_v31 }
 0x3b5   : > { %v6491_v50 = vmax.f32 %v6427_v36, 0.0  ;;  %v7899_v3 = vadd.f32 %v6236_v38, %v10097_v27  ;;  %v6238_v18 = vpop.f32.mrb[37].mxu1 }
 0x3b6   : > { %v6492_v59 = vmax.f32 %v6428_v54, 0.0  ;;  %v7900_v32 = vadd.f32 %v6238_v18, %v10099_v34  ;;  %v6240_v21 = vpop.f32.mrb[38].mxu1  ;;  %v6662_v60 = vadd.f32 %v6661_v35, %v6631_v49 }
 0x3b7   : > { %v10378_v37 = vpack.c.bf16 %v6491_v50, %v6489_v10  ;;  %v6353_v5 = vmul.f32 %v7899_v3, %v10180_v15  ;;  %v7901_v29 = vadd.f32 %v6240_v21, %v10101_v13  ;;  %v6242_v63 = vpop.f32.mrb[39].mxu1 }
 0x3b8   : > { %v10382_v19 = vpack.c.bf16 %v6492_v59, %v6490_v8  ;;  %v6354_v27 = vmul.f32 %v7900_v32, %v10184_v43  ;;  %v7902_v48 = vadd.f32 %v6242_v63, %v10104_v11  ;;  %v6663_v9 = vadd.f32 %v6662_v60, %v6632_v55 }
 0x3b9   : > { %v6569_v52 = vunpack.c.l.bf16 %v10378_v37  ;;  %v6429_v41 = vadd.f32 %v10188_v2, %v6353_v5  ;;  %v6355_v34 = vmul.f32 %v7901_v29, %v10180_v15  ;;  %v6570_v56 = vunpack.c.h.bf16 %v10378_v37 }
 0x3ba   : > { %v6601_v6 = vunpack.c.l.bf16 %v10382_v19  ;;  %v6430_v28 = vadd.f32 %v10192_v44, %v6354_v27  ;;  %v6356_v13 = vmul.f32 %v7902_v48, %v10184_v43  ;;  %v6602_v7 = vunpack.c.h.bf16 %v10382_v19 }
 0x3bb   : > { %v6431_v1 = vadd.f32 %v10188_v2, %v6355_v34  ;;  %v6493_v20 = vmax.f32 %v6429_v41, 0.0  ;;  %v10762_v34 = vld [vmem:[#allocation8_spill] sm:$0xff] }
 0x3bc   : > { %v6633_v39 = vadd.f32 %v6601_v6, %v6569_v52  ;;  %v6432_v33 = vadd.f32 %v10192_v44, %v6356_v13  ;;  %v6246_v11 = vpop.f32.mrb[40].mxu1  ;;  %v6494_v36 = vmax.f32 %v6430_v28, 0.0  ;;  %v6634_v32 = vadd.f32 %v6602_v7, %v6570_v56 }
 0x3bd   : > { %v6495_v17 = vmax.f32 %v6431_v1, 0.0  ;;  %v7903_v30 = vadd.f32 %v6246_v11, %v10106_v57  ;;  %v6248_v14 = vpop.f32.mrb[41].mxu1 }
 0x3be   : > { %v6496_v35 = vmax.f32 %v6432_v33, 0.0  ;;  %v7904_v49 = vadd.f32 %v6248_v14, %v10108_v23  ;;  %v6250_v54 = vpop.f32.mrb[42].mxu1  ;;  %v6664_v3 = vadd.f32 %v6663_v9, %v6633_v39  ;;  %v10763_v9 = vld [vmem:[#allocation9_spill] sm:$0xff] }
 0x3bf   : > { %v10398_v38 = vpack.c.bf16 %v6495_v17, %v6493_v20  ;;  %v6357_v31 = vmul.f32 %v7903_v30, %v10180_v15  ;;  %v7905_v10 = vadd.f32 %v6250_v54, %v10110_v12  ;;  %v6252_v50 = vpop.f32.mrb[43].mxu1  ;;  %v10764_v20 = vld [vmem:[#allocation10_spill] sm:$0xff] }
 0x3c0   : > { %v10402_v18 = vpack.c.bf16 %v6496_v35, %v6494_v36  ;;  %v6358_v57 = vmul.f32 %v7904_v49, %v10184_v43  ;;  %v7906_v62 = vadd.f32 %v6252_v50, %v10112_v24  ;;  %v6665_v63 = vadd.f32 %v6664_v3, %v6634_v32  ;;  %v10765_v35 = vld [vmem:[#allocation11_spill] sm:$0xff] }
 0x3c1   : > { %v6571_v8 = vunpack.c.l.bf16 %v10398_v38  ;;  %v6433_v59 = vadd.f32 %v10188_v2, %v6357_v31  ;;  %v6359_v23 = vmul.f32 %v7905_v10, %v10180_v15  ;;  %v6572_v48 = vunpack.c.h.bf16 %v10398_v38 }
 0x3c2   : > { %v6603_v21 = vunpack.c.l.bf16 %v10402_v18  ;;  %v6434_v5 = vadd.f32 %v10192_v44, %v6358_v57  ;;  %v6360_v12 = vmul.f32 %v7906_v62, %v10184_v43  ;;  %v6604_v28 = vunpack.c.h.bf16 %v10402_v18 }
 0x3c3   : > { %v6435_v29 = vadd.f32 %v10188_v2, %v6359_v23  ;;  %v6497_v52 = vmax.f32 %v6433_v59, 0.0 }
 0x3c4   : > { %v6635_v60 = vadd.f32 %v6603_v21, %v6571_v8  ;;  %v6436_v27 = vadd.f32 %v10192_v44, %v6360_v12  ;;  %v6256_v24 = vpop.f32.mrb[44].mxu1  ;;  %v6498_v13 = vmax.f32 %v6434_v5, 0.0  ;;  %v6636_v50 = vadd.f32 %v6604_v28, %v6572_v48 }
 0x3c5   : > { %v6499_v41 = vmax.f32 %v6435_v29, 0.0  ;;  %v7907_v55 = vadd.f32 %v6256_v24, %v10762_v34  ;;  %v6258_v6 = vpop.f32.mrb[45].mxu1 }
 0x3c6   : > { %v6500_v1 = vmax.f32 %v6436_v27, 0.0  ;;  %v7908_v39 = vadd.f32 %v6258_v6, %v10763_v9  ;;  %v6260_v33 = vpop.f32.mrb[46].mxu1  ;;  %v6666_v14 = vadd.f32 %v6665_v63, %v6635_v60  ;;  %v10766_v63 = vld [vmem:[#allocation12_spill] sm:$0xff] }
 0x3c7   : > { %v10418_v11 = vpack.c.bf16 %v6499_v41, %v6497_v52  ;;  %v6361_v56 = vmul.f32 %v7907_v55, %v10180_v15  ;;  %v7909_v17 = vadd.f32 %v6260_v33, %v10764_v20  ;;  %v6262_v30 = vpop.f32.mrb[47].mxu1  ;;  %v10767_v41 = vld [vmem:[#allocation13_spill] sm:$0xff]  ;;  %v10769_v20 = vld [vmem:[#allocation15_spill] sm:$0xff] }
 0x3c8   : > { %v10422_v7 = vpack.c.bf16 %v6500_v1, %v6498_v13  ;;  %v6362_v36 = vmul.f32 %v7908_v39, %v10184_v43  ;;  %v7910_v49 = vadd.f32 %v6262_v30, %v10765_v35  ;;  %v6667_v59 = vadd.f32 %v6666_v14, %v6636_v50  ;;  %v10768_v13 = vld [vmem:[#allocation14_spill] sm:$0xff] }
 0x3c9   : > { %v6573_v54 = vunpack.c.l.bf16 %v10418_v11  ;;  %v6437_v31 = vadd.f32 %v10188_v2, %v6361_v56  ;;  %v6363_v10 = vmul.f32 %v7909_v17, %v10180_v15  ;;  %v6574_v5 = vunpack.c.h.bf16 %v10418_v11 }
 0x3ca   : > { %v6605_v3 = vunpack.c.l.bf16 %v10422_v7  ;;  %v6438_v57 = vadd.f32 %v10192_v44, %v6362_v36  ;;  %v6364_v62 = vmul.f32 %v7910_v49, %v10184_v43  ;;  %v6606_v24 = vunpack.c.h.bf16 %v10422_v7 }
 0x3cb   : > { %v6439_v8 = vadd.f32 %v10188_v2, %v6363_v10  ;;  %v6501_v12 = vmax.f32 %v6437_v31, 0.0 }
 0x3cc   : > { %v6637_v23 = vadd.f32 %v6605_v3, %v6573_v54  ;;  %v6440_v32 = vadd.f32 %v10192_v44, %v6364_v62  ;;  %v6266_v21 = vpop.f32.mrb[48].mxu1  ;;  %v6502_v48 = vmax.f32 %v6438_v57, 0.0  ;;  %v6638_v35 = vadd.f32 %v6606_v24, %v6574_v5 }
 0x3cd   : > { %v6503_v29 = vmax.f32 %v6439_v8, 0.0  ;;  %v7911_v60 = vadd.f32 %v6266_v21, %v10766_v63  ;;  %v6268_v27 = vpop.f32.mrb[49].mxu1 }
 0x3ce   : > { %v6504_v52 = vmax.f32 %v6440_v32, 0.0  ;;  %v7912_v34 = vadd.f32 %v6268_v27, %v10767_v41  ;;  %v6270_v55 = vpop.f32.mrb[50].mxu1  ;;  %v6668_v39 = vadd.f32 %v6667_v59, %v6637_v23  ;;  %v10770_v32 = vld [vmem:[#allocation16_spill] sm:$0xff]  ;;  %v10772_v41 = vld [vmem:[#allocation18_spill] sm:$0xff] }
 0x3cf   : > { %v10438_v6 = vpack.c.bf16 %v6503_v29, %v6501_v12  ;;  %v6365_v28 = vmul.f32 %v7911_v60, %v10180_v15  ;;  %v7913_v1 = vadd.f32 %v6270_v55, %v10768_v13  ;;  %v6272_v9 = vpop.f32.mrb[51].mxu1  ;;  %v10771_v60 = vld [vmem:[#allocation17_spill] sm:$0xff] }
 0x3d0   : > { %v10442_v33 = vpack.c.bf16 %v6504_v52, %v6502_v48  ;;  %v6366_v56 = vmul.f32 %v7912_v34, %v10184_v43  ;;  %v7914_v17 = vadd.f32 %v6272_v9, %v10769_v20  ;;  %v6669_v50 = vadd.f32 %v6668_v39, %v6638_v35  ;;  %v10773_v9 = vld [vmem:[#allocation19_spill] sm:$0xff] }
 0x3d1   : > { %v6575_v30 = vunpack.c.l.bf16 %v10438_v6  ;;  %v6441_v14 = vadd.f32 %v10188_v2, %v6365_v28  ;;  %v6367_v36 = vmul.f32 %v7913_v1, %v10180_v15  ;;  %v6576_v8 = vunpack.c.h.bf16 %v10438_v6 }
 0x3d2   : > { %v6607_v49 = vunpack.c.l.bf16 %v10442_v33  ;;  %v6442_v54 = vadd.f32 %v10192_v44, %v6366_v56  ;;  %v6368_v31 = vmul.f32 %v7914_v17, %v10184_v43  ;;  %v6608_v12 = vunpack.c.h.bf16 %v10442_v33 }
 0x3d3   : > { %v6443_v10 = vadd.f32 %v10188_v2, %v6367_v36  ;;  %v6505_v59 = vmax.f32 %v6441_v14, 0.0 }
 0x3d4   : > { %v6639_v3 = vadd.f32 %v6607_v49, %v6575_v30  ;;  %v6444_v57 = vadd.f32 %v10192_v44, %v6368_v31  ;;  %v6276_v62 = vpop.f32.mrb[52].mxu1  ;;  %v6506_v29 = vmax.f32 %v6442_v54, 0.0  ;;  %v6640_v30 = vadd.f32 %v6608_v12, %v6576_v8  ;;  %v10775_v12 = vld [vmem:[#allocation21_spill] sm:$0xff] }
 0x3d5   : > { %v6507_v23 = vmax.f32 %v6443_v10, 0.0  ;;  %v7915_v21 = vadd.f32 %v6276_v62, %v10770_v32  ;;  %v6278_v5 = vpop.f32.mrb[53].mxu1 }
 0x3d6   : > { %v6508_v63 = vmax.f32 %v6444_v57, 0.0  ;;  %v7916_v27 = vadd.f32 %v6278_v5, %v10771_v60  ;;  %v6280_v24 = vpop.f32.mrb[54].mxu1  ;;  %v6670_v28 = vadd.f32 %v6669_v50, %v6639_v3 }
 0x3d7   : > { %v10458_v48 = vpack.c.bf16 %v6507_v23, %v6505_v59  ;;  %v6369_v52 = vmul.f32 %v7915_v21, %v10180_v15  ;;  %v7917_v34 = vadd.f32 %v6280_v24, %v10772_v41  ;;  %v6282_v55 = vpop.f32.mrb[55].mxu1  ;;  %v10774_v59 = vld [vmem:[#allocation20_spill] sm:$0xff]  ;;  %v10776_v24 = vld [vmem:[#allocation22_spill] sm:$0xff] }
 0x3d8   : > { %v10462_v13 = vpack.c.bf16 %v6508_v63, %v6506_v29  ;;  %v6370_v1 = vmul.f32 %v7916_v27, %v10184_v43  ;;  %v7918_v39 = vadd.f32 %v6282_v55, %v10773_v9  ;;  %v6671_v54 = vadd.f32 %v6670_v28, %v6640_v30 }
 0x3d9   : > { %v6577_v56 = vunpack.c.l.bf16 %v10458_v48  ;;  %v6445_v20 = vadd.f32 %v10188_v2, %v6369_v52  ;;  %v6371_v17 = vmul.f32 %v7917_v34, %v10180_v15  ;;  %v6578_v3 = vunpack.c.h.bf16 %v10458_v48 }
 0x3da   : > { %v6609_v14 = vunpack.c.l.bf16 %v10462_v13  ;;  %v6446_v36 = vadd.f32 %v10192_v44, %v6370_v1  ;;  %v6372_v35 = vmul.f32 %v7918_v39, %v10184_v43  ;;  %v6610_v32 = vunpack.c.h.bf16 %v10462_v13  ;;  %v10777_v1 = vld [vmem:[#allocation23_spill] sm:$0xff] }
 0x3db   : > { %v6447_v49 = vadd.f32 %v10188_v2, %v6371_v17  ;;  %v6509_v57 = vmax.f32 %v6445_v20, 0.0 }
 0x3dc   : > { %v6641_v31 = vadd.f32 %v6609_v14, %v6577_v56  ;;  %v6448_v10 = vadd.f32 %v10192_v44, %v6372_v35  ;;  %v6286_v50 = vpop.f32.mrb[56].mxu1  ;;  %v6510_v21 = vmax.f32 %v6446_v36, 0.0  ;;  %v6642_v17 = vadd.f32 %v6610_v32, %v6578_v3 }
 0x3dd   : > { %v6511_v62 = vmax.f32 %v6447_v49, 0.0  ;;  %v7919_v23 = vadd.f32 %v6286_v50, %v10774_v59  ;;  %v6288_v8 = vpop.f32.mrb[57].mxu1 }
 0x3de   : > { %v6512_v5 = vmax.f32 %v6448_v10, 0.0  ;;  %v7920_v29 = vadd.f32 %v6288_v8, %v10775_v12  ;;  %v6290_v63 = vpop.f32.mrb[58].mxu1  ;;  %v6672_v34 = vadd.f32 %v6671_v54, %v6641_v31 }
 0x3df   : > { %v10478_v60 = vpack.c.bf16 %v6511_v62, %v6509_v57  ;;  %v6373_v27 = vmul.f32 %v7919_v23, %v10180_v15  ;;  %v7921_v52 = vadd.f32 %v6290_v63, %v10776_v24  ;;  %v6292_v41 = vpop.f32.mrb[59].mxu1  ;;  %v10778_v62 = vld [vmem:[#allocation24_spill] sm:$0xff]  ;;  %v10780_v24 = vld [vmem:[#allocation26_spill] sm:$0xff] }
 0x3e0   : > { %v10482_v55 = vpack.c.bf16 %v6512_v5, %v6510_v21  ;;  %v6374_v28 = vmul.f32 %v7920_v29, %v10184_v43  ;;  %v7922_v9 = vadd.f32 %v6292_v41, %v10777_v1  ;;  %v6673_v49 = vadd.f32 %v6672_v34, %v6642_v17  ;;  %v10779_v21 = vld [vmem:[#allocation25_spill] sm:$0xff]  ;;  %v10781_v1 = vld [vmem:[#allocation27_spill] sm:$0xff] }
 0x3e1   : > { %v6579_v39 = vunpack.c.l.bf16 %v10478_v60  ;;  %v6449_v56 = vadd.f32 %v10188_v2, %v6373_v27  ;;  %v6375_v20 = vmul.f32 %v7921_v52, %v10180_v15  ;;  %v6580_v3 = vunpack.c.h.bf16 %v10478_v60 }
 0x3e2   : > { %v6611_v30 = vunpack.c.l.bf16 %v10482_v55  ;;  %v6450_v14 = vadd.f32 %v10192_v44, %v6374_v28  ;;  %v6376_v36 = vmul.f32 %v7922_v9, %v10184_v43  ;;  %v6612_v29 = vunpack.c.h.bf16 %v10482_v55 }
 0x3e3   : > { %v6451_v35 = vadd.f32 %v10188_v2, %v6375_v20  ;;  %v6513_v50 = vmax.f32 %v6449_v56, 0.0 }
 0x3e4   : > { %v6452_v54 = vadd.f32 %v10192_v44, %v6376_v36  ;;  %v6296_v31 = vpop.f32.mrb[60].mxu1  ;;  %v6643_v10 = vadd.f32 %v6611_v30, %v6579_v39  ;;  %v6514_v8 = vmax.f32 %v6450_v14, 0.0 }
 0x3e5   : > { %v6515_v57 = vmax.f32 %v6451_v35, 0.0  ;;  %v7923_v59 = vadd.f32 %v6296_v31, %v10778_v62  ;;  %v6298_v23 = vpop.f32.mrb[61].mxu1  ;;  %v6644_v35 = vadd.f32 %v6612_v29, %v6580_v3 }
 0x3e6   : > { %v6516_v32 = vmax.f32 %v6452_v54, 0.0  ;;  %v7924_v5 = vadd.f32 %v6298_v23, %v10779_v21  ;;  %v6300_v12 = vpop.f32.mrb[62].mxu1  ;;  %v6674_v39 = vadd.f32 %v6673_v49, %v6643_v10 }
 0x3e7   : > { %v10498_v63 = vpack.c.bf16 %v6515_v57, %v6513_v50  ;;  %v6377_v27 = vmul.f32 %v7923_v59, %v10180_v15  ;;  %v7925_v52 = vadd.f32 %v6300_v12, %v10780_v24  ;;  %v6302_v41 = vpop.f32.mrb[63].mxu1 }
 0x3e8   : > { %v10502_v34 = vpack.c.bf16 %v6516_v32, %v6514_v8  ;;  %v6378_v28 = vmul.f32 %v7924_v5, %v10184_v43  ;;  %v7926_v9 = vadd.f32 %v6302_v41, %v10781_v1  ;;  %v6675_v57 = vadd.f32 %v6674_v39, %v6644_v35 }
 0x3e9   : > { %v6581_v56 = vunpack.c.l.bf16 %v10498_v63  ;;  %v6453_v20 = vadd.f32 %v10188_v2, %v6377_v27  ;;  %v6379_v17 = vmul.f32 %v7925_v52, %v10180_v15  ;;  %v6582_v62 = vunpack.c.h.bf16 %v10498_v63 }
 0x3ea   : > { %v6613_v30 = vunpack.c.l.bf16 %v10502_v34  ;;  %v6454_v14 = vadd.f32 %v10192_v44, %v6378_v28  ;;  %v6380_v36 = vmul.f32 %v7926_v9, %v10184_v43  ;;  %v6614_v59 = vunpack.c.h.bf16 %v10502_v34 }
 0x3eb   : > { %v6455_v54 = vadd.f32 %v10188_v2, %v6379_v17  ;;  %v6517_v49 = vmax.f32 %v6453_v20, 0.0  ;;  %v8457_v17 = vld [vmem:[%s10709_s9] ss:$8 sps:$4 sm:$0xff]   ;;  %v10782_v35 = vmov 0  }
 0x3ec   : > { %v6645_v31 = vadd.f32 %v6613_v30, %v6581_v56  ;;  %v6456_v50 = vadd.f32 %v10192_v44, %v6380_v36  ;;  %v6518_v15 = vmax.f32 %v6454_v14, 0.0  ;;  %v6646_v2 = vadd.f32 %v6614_v59, %v6582_v62  ;;  %v8462_v14 = vld [vmem:[%s10709_s9 + $0x14] ss:$8 sps:$4 sm:$0xff]   ;;  %v8460_v36 = vld [vmem:[%s10709_s9 + $0x10] ss:$8 sps:$4 sm:$0xff]  }
 0x3ed   : > { %v6519_v10 = vmax.f32 %v6455_v54, 0.0  ;;  %v8465_v54 = vld [vmem:[%s10709_s9 + $0x24] ss:$8 sps:$4 sm:$0xff]   ;;  %v8474_v62 = vld [vmem:[%s10709_s9 + $0x54] ss:$8 sps:$4 sm:$0xff]  }
 0x3ee   : > { %v6520_v23 = vmax.f32 %v6456_v50, 0.0  ;;  %v6676_v32 = vadd.f32 %v6675_v57, %v6645_v31  ;;  %v8463_v31 = vld [vmem:[%s10709_s9 + $0x20] ss:$8 sps:$4 sm:$0xff]   ;;  %v8468_v50 = vld [vmem:[%s10709_s9 + $0x34] ss:$8 sps:$4 sm:$0xff]  }
 0x3ef   : > { %v10516_v8 = vpack.c.bf16 %v6519_v10, %v6517_v49  ;;  %v8466_v57 = vld [vmem:[%s10709_s9 + $0x30] ss:$8 sps:$4 sm:$0xff]   ;;  %v8471_v49 = vld [vmem:[%s10709_s9 + $0x44] ss:$8 sps:$4 sm:$0xff]   ;;  %v8469_v10 = vld [vmem:[%s10709_s9 + $0x40] ss:$8 sps:$4 sm:$0xff]  }
 0x3f0   : > { %v10518_v21 = vpack.c.bf16 %v6520_v23, %v6518_v15  ;;  %v6677_v12 = vadd.f32 %v6676_v32, %v6646_v2  ;;  %v8472_v59 = vld [vmem:[%s10709_s9 + $0x50] ss:$8 sps:$4 sm:$0xff]   ;;  %v8477_v15 = vld [vmem:[%s10709_s9 + $0x64] ss:$8 sps:$4 sm:$0xff]   ;;  %v8475_v23 = vld [vmem:[%s10709_s9 + $0x60] ss:$8 sps:$4 sm:$0xff]  }
 0x3f1   : > { %v6583_v43 = vunpack.c.l.bf16 %v10516_v8  ;;  %v6584_v3 = vunpack.c.h.bf16 %v10516_v8  ;;  %v8478_v32 = vld [vmem:[%s10709_s9 + $0x70] ss:$8 sps:$4 sm:$0xff]   ;;  %v6705_v2 = vld [vmem:[%s10708_s8] sm:$0x1] }
 0x3f2   : > { %v6615_v44 = vunpack.c.l.bf16 %v10518_v21  ;;  %v6616_v5 = vunpack.c.h.bf16 %v10518_v21 }
 0x3f4   : > { %v6647_v29 = vadd.f32 %v6615_v44, %v6583_v43  ;;  %v6648_v27 = vadd.f32 %v6616_v5, %v6584_v3  ;;  %v8480_v43 = vld [vmem:[%s10709_s9 + $0x74] ss:$8 sps:$4 sm:$0xff]  }
 0x3f6   : > { %v6678_v24 = vadd.f32 %v6677_v12, %v6647_v29 }
 0x3f8   : > { %v6679_v52 = vadd.f32 %v6678_v24, %v6648_v27 }
 0x3fa   : > { %v6680_v41 = vrot.slane %v6679_v52, 4 }
 0x3fc   : > { %v6681_v28 = vadd.f32 %v6680_v41, %v6679_v52  ;;  %v8481_v52 = vld [vmem:[%s10711_s11] sm:$0xff]   ;;  %v8482_v41 = vld [vmem:[%s10711_s11 + $0x8] sm:$0xff]  }
 0x3fe   : > { %v6682_v1 = vrot.slane %v6681_v28, 2 }
 0x400   : > { %v6683_v9 = vadd.f32 %v6682_v1, %v6681_v28  ;;  %v8483_v28 = vld [vmem:[%s10711_s11 + $0x10] sm:$0xff]   ;;  %v8484_v1 = vld [vmem:[%s10711_s11 + $0x18] sm:$0xff]  }
 0x402   : > { %v6684_v39 = vrot.slane %v6683_v9, 1 }
 0x404   : > { %v6685_v56 = vadd.f32 %v6684_v39, %v6683_v9  ;;  %v8485_v9 = vld [vmem:[%s10711_s11 + $0x20] sm:$0xff]   ;;  %v8486_v39 = vld [vmem:[%s10711_s11 + $0x28] sm:$0xff]  }
 0x406   : > { %v6687_v20 = vmul.f32 0.00390625, %v6685_v56  ;;  %v8487_v56 = vld [vmem:[%s10711_s11 + $0x30] sm:$0xff]  }
 0x408   : > { %v6688_v30 = vpack.c.bf16 %v6687_v20, %v6687_v20  ;;  %v8488_v20 = vld [vmem:[%s10711_s11 + $0x38] sm:$0xff]  }
 0x40a   : > { %7840 = vmatmul.mubr.bf16.vlgmr.msra.gmra.mrb[96].mxu0 %v6688_v30  ;;  %v10783_v30 = vld [vmem:[#allocation28_spill] sm:$0xff] }
 0x40b   : > { %6905 = vmatpush1.bf16.msra.mxu0 %v8457_v17  ;;  %6936 = vmatprep.mubr.bf16.mxu0 %v10782_v35  ;;  %v6812_v17 = vld [vmem:[%s10710_s10] sm:$0x3] }
 0x40c   : > { %6906 = vmatprep.subr.bf16.mxu0 %v8462_v14  ;;  %v6897_v14 = vrot.slane %v6812_v17, %v10783_v30 }
 0x40f   : > { %6907 = vmatpush1.bf16.msra.mxu0 %v8460_v36  ;;  %v10784_v36 = vld [vmem:[#allocation29_spill] sm:$0xff] }
 0x410   : > { %6908 = vmatprep.subr.bf16.mxu0 %v8465_v54  ;;  %v6901_v35 = vrot.slane %v6812_v17, %v10784_v36 }
 0x413   : > { %6909 = vmatpush1.bf16.msra.mxu0 %v8463_v31 }
 0x414   : > { %6910 = vmatprep.subr.bf16.mxu0 %v8468_v50 }
 0x417   : > { %6911 = vmatpush1.bf16.msra.mxu0 %v8466_v57 }
 0x418   : > { %6912 = vmatprep.subr.bf16.mxu0 %v8471_v49 }
 0x41b   : > { %6913 = vmatpush1.bf16.msra.mxu0 %v8469_v10 }
 0x41c   : > { %6914 = vmatprep.subr.bf16.mxu0 %v8474_v62 }
 0x41f   : > { %6915 = vmatpush1.bf16.msra.mxu0 %v8472_v59 }
 0x420   : > { %6916 = vmatprep.subr.bf16.mxu0 %v8477_v15 }
 0x423   : > { %6917 = vmatpush1.bf16.msra.mxu0 %v8475_v23 }
 0x424   : > { %6918 = vmatprep.subr.bf16.mxu0 %v8480_v43 }
 0x427   : > { %6919 = vmatpush1.bf16.msra.mxu0 %v8478_v32 }
 0x428   : > { %7843 = vmatprep.subr.bf16.mxu0 %v10756_v42 }
 0x4dd   : > { %v6788_v3 = vpop.f32.mrb[96].mxu0 }
 0x4de   : > { %v6789_v44 = vadd.f32 %v6788_v3, %v6705_v2  ;;  %v7841_v5 = vpop.f32.mrb[97].mxu0 }
 0x4df   : > { %v6791_v12 = vpop.f32.mrb[98].mxu0 }
 0x4e0   : > { %v6794_v29 = vmax.f32 %v6789_v44, 0.0  ;;  %v7842_v27 = vpop.f32.mrb[99].mxu0 }
 0x4e2   : > { %v6795_v24 = vpack.c.bf16 %v6794_v29, %v6794_v29 }
 0x4e4   : > { %6937 = vmatmul.mubr.bf16.vlgmr.msra.gmra.mrb[100].mxu0 %v6795_v24 }
 0x4e5   : > { %7859 = vmatprep.mubr.msk.bf16.mxu0 %vm8564_vm14, %v10756_v42  ;;  %7844 = vmatpush3.bf16.msra.mxu0 %v8481_v52 }
 0x4e6   : > { %7845 = vmatprep.subr.bf16.mxu0 %v10756_v42 }
 0x4e9   : > { %7846 = vmatpush3.bf16.msra.mxu0 %v8482_v41 }
 0x4ea   : > { %7847 = vmatprep.subr.bf16.mxu0 %v10756_v42 }
 0x4ed   : > { %7848 = vmatpush3.bf16.msra.mxu0 %v8483_v28  ;;  %v10785_v28 = vld [vmem:[#allocation30_spill] sm:$0xff] }
 0x4ee   : > { %7849 = vmatprep.subr.bf16.mxu0 %v10756_v42 }
 0x4f1   : > { %7850 = vmatpush3.bf16.msra.mxu0 %v8484_v1 }
 0x4f2   : > { %7851 = vmatprep.subr.bf16.mxu0 %v10756_v42 }
 0x4f5   : > { %7852 = vmatpush3.bf16.msra.mxu0 %v8485_v9 }
 0x4f6   : > { %7853 = vmatprep.subr.bf16.mxu0 %v10756_v42 }
 0x4f9   : > { %7854 = vmatpush3.bf16.msra.mxu0 %v8486_v39 }
 0x4fa   : > { %7855 = vmatprep.subr.bf16.mxu0 %v10756_v42 }
 0x4fd   : > { %7856 = vmatpush3.bf16.msra.mxu0 %v8487_v56 }
 0x4fe   : > { %7857 = vmatprep.subr.bf16.mxu0 %v10756_v42 }
 0x501   : > { %7858 = vmatpush3.bf16.msra.mxu0 %v8488_v20 }
 0x5b7   : > { %v6938_v54 = vpop.f32.mrb[100].mxu0 }
 0x5b8   : > { %v6939_v31 = vadd.f32 %v6938_v54, %v6897_v14  ;;  %v6940_v50 = vpop.f32.mrb[101].mxu0 }
 0x5b9   : > { %v6941_v57 = vadd.f32 %v6940_v50, %v6901_v35  ;;  %v6942_v49 = vpop.f32.mrb[102].mxu0 }
 0x5ba   : > { %v6943_v10 = vpop.f32.mrb[103].mxu0 }
 0x5bb   : > { %v6945_v62 = vmax.f32 %v6939_v31, %v6941_v57 }
 0x5bd   : > { %v6946_v59 = vsub.f32 %v6939_v31, %v6945_v62  ;;  %v6949_v15 = vsub.f32 %v6941_v57, %v6945_v62  ;;  %v10786_v31 = vld [vmem:[#allocation31_spill] sm:$0xff] }
 0x5bf   : > { %v6947_v23 = vmul.f32 1.442695, %v6946_v59  ;;  %v6950_v42 = vmul.f32 1.442695, %v6949_v15 }
 0x5c1   : > { %8489 = vpow2.f32 %v6947_v23 }
 0x5c2   : > { %8491 = vpow2.f32 %v6950_v42 }
 0x5cb   : > { %v8490_v32 = vpop.eup %8489 }
 0x5cc   : > { %v8492_v43 = vpop.eup %8491 }
 0x5cd   : > { %v6952_v2 = vadd.f32 %v8492_v43, %v8490_v32 }
 0x5cf   : > { %8493 = vrcp.f32 %v6952_v2 }
 0x5d9   : > { %v8494_v3 = vpop.eup %8493 }
 0x5da   : > { %v6954_v44 = vmul.f32 %v8494_v3, %v8490_v32  ;;  %v6956_v5 = vmul.f32 %v8494_v3, %v8492_v43 }
 0x5dc   : > { %v6955_v12 = vpack.c.bf16 %v6954_v44, %v6954_v44  ;;  %v6957_v29 = vpack.c.bf16 %v6956_v5, %v6956_v5 }
 0x5de   : > { %v6959_v27 = vpack.i.b16 %v6955_v12, %v6955_v12  ;;  %v6982_v24 = vpack.i.b16 %v6957_v29, %v6957_v29 }
 0x5e0   : > { %v6964_v52 = vrot.slane %v6959_v27, %v10783_v30  ;;  %v6987_v41 = vrot.slane %v6982_v24, %v10783_v30 }
 0x5e2   : > { %v6965_v1 = vmul.bf16 %v6964_v52, %v10785_v28  ;;  %v6966_v9 = vmul.bf16 %v6964_v52, %v10235_v46  ;;  %v6967_v39 = vmul.bf16 %v6964_v52, %v10255_v53  ;;  %v6968_v56 = vmul.bf16 %v6964_v52, %v10278_v22 }
 0x5e3   : > { %v6969_v20 = vmul.bf16 %v6964_v52, %v10298_v61  ;;  %v6970_v17 = vmul.bf16 %v6964_v52, %v10318_v16  ;;  %v6971_v14 = vmul.bf16 %v6964_v52, %v10338_v25  ;;  %v6972_v36 = vmul.bf16 %v6964_v52, %v10358_v47 }
 0x5e4   : > { %v6973_v35 = vmul.bf16 %v6964_v52, %v10378_v37  ;;  %v6974_v30 = vmul.bf16 %v6964_v52, %v10398_v38  ;;  %v6975_v54 = vmul.bf16 %v6964_v52, %v10418_v11  ;;  %v6976_v46 = vmul.bf16 %v6964_v52, %v10438_v6 }
 0x5e5   : > { %v6977_v53 = vmul.bf16 %v6964_v52, %v10458_v48  ;;  %v6978_v22 = vmul.bf16 %v6964_v52, %v10478_v60  ;;  %v6979_v61 = vmul.bf16 %v6964_v52, %v10498_v63  ;;  %v6980_v16 = vmul.bf16 %v6964_v52, %v10516_v8 }
 0x5e6   : > { %v6988_v25 = vmul.bf16 %v6987_v41, %v10786_v31  ;;  %v6989_v47 = vmul.bf16 %v6987_v41, %v10239_v45  ;;  %v6990_v37 = vmul.bf16 %v6987_v41, %v10259_v4  ;;  %v6991_v38 = vmul.bf16 %v6987_v41, %v10282_v51 }
 0x5e7   : > { %v6992_v11 = vmul.bf16 %v6987_v41, %v10302_v26  ;;  %v6993_v6 = vmul.bf16 %v6987_v41, %v10322_v58  ;;  %v6994_v48 = vmul.bf16 %v6987_v41, %v10342_v0  ;;  %v6995_v60 = vmul.bf16 %v6987_v41, %v10362_v40 }
 0x5e8   : > { %v6996_v63 = vmul.bf16 %v6987_v41, %v10382_v19  ;;  %v6997_v8 = vmul.bf16 %v6987_v41, %v10402_v18  ;;  %v6998_v50 = vmul.bf16 %v6987_v41, %v10422_v7  ;;  %v6999_v45 = vmul.bf16 %v6987_v41, %v10442_v33 }
 0x5e9   : > { %v7000_v4 = vmul.bf16 %v6987_v41, %v10462_v13  ;;  %v7001_v51 = vmul.bf16 %v6987_v41, %v10482_v55  ;;  %v7002_v26 = vmul.bf16 %v6987_v41, %v10502_v34  ;;  %v7003_v58 = vmul.bf16 %v6987_v41, %v10518_v21 }
 0x5ea   : > { %v7004_v57 = vadd.bf16 %v6988_v25, %v6965_v1  ;;  %v7005_v0 = vadd.bf16 %v6989_v47, %v6966_v9  ;;  %v7006_v49 = vadd.bf16 %v6990_v37, %v6967_v39  ;;  %v7007_v40 = vadd.bf16 %v6991_v38, %v6968_v56 }
 0x5eb   : > { %v7008_v10 = vadd.bf16 %v6992_v11, %v6969_v20  ;;  %v7009_v19 = vadd.bf16 %v6993_v6, %v6970_v17  ;;  %v7010_v62 = vadd.bf16 %v6994_v48, %v6971_v14  ;;  %v7011_v18 = vadd.bf16 %v6995_v60, %v6972_v36 }
 0x5ec   : > { %v7012_v59 = vadd.bf16 %v6996_v63, %v6973_v35  ;;  %v7013_v7 = vadd.bf16 %v6997_v8, %v6974_v30  ;;  %v7014_v15 = vadd.bf16 %v6998_v50, %v6975_v54  ;;  %v7015_v33 = vadd.bf16 %v6999_v45, %v6976_v46 }
 0x5ed   : > { %v7016_v23 = vadd.bf16 %v7000_v4, %v6977_v53  ;;  %v7017_v13 = vadd.bf16 %v7001_v51, %v6978_v22  ;;  %v7018_v42 = vadd.bf16 %v7002_v26, %v6979_v61  ;;  %v10646_v55 = vadd.bf16 %v7003_v58, %v6980_v16 }
 0x5ee   : > { %v7020_v34 = vunpack.c.l.bf16 %v7004_v57  ;;  %v7021_v32 = vunpack.c.h.bf16 %v7004_v57  ;;  %v7022_v21 = vunpack.c.l.bf16 %v7005_v0  ;;  %v7023_v2 = vunpack.c.h.bf16 %v7005_v0 }
 0x5ef   : > { %v7024_v44 = vunpack.c.l.bf16 %v7006_v49  ;;  %v7025_v12 = vunpack.c.h.bf16 %v7006_v49  ;;  %v7026_v27 = vunpack.c.l.bf16 %v7007_v40  ;;  %v7027_v52 = vunpack.c.h.bf16 %v7007_v40 }
 0x5f0   : > { %v7052_v43 = vadd.f32 %v7021_v32, %v7020_v34  ;;  %v7028_v28 = vunpack.c.l.bf16 %v7008_v10  ;;  %v7029_v9 = vunpack.c.h.bf16 %v7008_v10  ;;  %v7030_v56 = vunpack.c.l.bf16 %v7009_v19 }
 0x5f1   : > { %v7031_v17 = vunpack.c.h.bf16 %v7009_v19  ;;  %v7032_v36 = vunpack.c.l.bf16 %v7010_v62  ;;  %v7033_v30 = vunpack.c.h.bf16 %v7010_v62  ;;  %v7034_v46 = vunpack.c.l.bf16 %v7011_v18 }
 0x5f2   : > { %v7053_v3 = vadd.f32 %v7052_v43, %v7022_v21  ;;  %v7035_v22 = vunpack.c.h.bf16 %v7011_v18  ;;  %v7036_v16 = vunpack.c.l.bf16 %v7012_v59  ;;  %v7037_v25 = vunpack.c.h.bf16 %v7012_v59 }
 0x5f3   : > { %v7038_v37 = vunpack.c.l.bf16 %v7013_v7  ;;  %v7039_v11 = vunpack.c.h.bf16 %v7013_v7  ;;  %v7040_v48 = vunpack.c.l.bf16 %v7014_v15  ;;  %v7041_v63 = vunpack.c.h.bf16 %v7014_v15 }
 0x5f4   : > { %v7054_v5 = vadd.f32 %v7053_v3, %v7023_v2  ;;  %v7042_v50 = vunpack.c.l.bf16 %v7015_v33  ;;  %v7043_v4 = vunpack.c.h.bf16 %v7015_v33  ;;  %v7044_v26 = vunpack.c.l.bf16 %v7016_v23 }
 0x5f5   : > { %v7045_v57 = vunpack.c.h.bf16 %v7016_v23  ;;  %v7046_v49 = vunpack.c.l.bf16 %v7017_v13  ;;  %v7047_v10 = vunpack.c.h.bf16 %v7017_v13  ;;  %v7048_v62 = vunpack.c.l.bf16 %v7018_v42 }
 0x5f6   : > { %v7055_v29 = vadd.f32 %v7054_v5, %v7024_v44  ;;  %v7049_v59 = vunpack.c.h.bf16 %v7018_v42  ;;  %v7050_v15 = vunpack.c.l.bf16 %v10646_v55  ;;  %v7051_v33 = vunpack.c.h.bf16 %v10646_v55  ;;  %v7107_v42 = vld [vmem:[%s10712_s12] sm:$0x1] }
 0x5f8   : > { %v7056_v24 = vadd.f32 %v7055_v29, %v7025_v12 }
 0x5fa   : > { %v7057_v41 = vadd.f32 %v7056_v24, %v7026_v27 }
 0x5fc   : > { %v7058_v1 = vadd.f32 %v7057_v41, %v7027_v52 }
 0x5fe   : > { %v7059_v39 = vadd.f32 %v7058_v1, %v7028_v28 }
 0x600   : > { %v7060_v20 = vadd.f32 %v7059_v39, %v7029_v9 }
 0x602   : > { %v7061_v14 = vadd.f32 %v7060_v20, %v7030_v56 }
 0x604   : > { %v7062_v35 = vadd.f32 %v7061_v14, %v7031_v17 }
 0x606   : > { %v7063_v54 = vadd.f32 %v7062_v35, %v7032_v36 }
 0x608   : > { %v7064_v53 = vadd.f32 %v7063_v54, %v7033_v30 }
 0x60a   : > { %v7065_v61 = vadd.f32 %v7064_v53, %v7034_v46 }
 0x60c   : > { %v7066_v31 = vadd.f32 %v7065_v61, %v7035_v22 }
 0x60e   : > { %v7067_v47 = vadd.f32 %v7066_v31, %v7036_v16 }
 0x610   : > { %v7068_v38 = vadd.f32 %v7067_v47, %v7037_v25 }
 0x612   : > { %v7069_v6 = vadd.f32 %v7068_v38, %v7038_v37 }
 0x614   : > { %v7070_v60 = vadd.f32 %v7069_v6, %v7039_v11 }
 0x616   : > { %v7071_v8 = vadd.f32 %v7070_v60, %v7040_v48 }
 0x618   : > { %v7072_v45 = vadd.f32 %v7071_v8, %v7041_v63 }
 0x61a   : > { %v7073_v51 = vadd.f32 %v7072_v45, %v7042_v50 }
 0x61c   : > { %v7074_v58 = vadd.f32 %v7073_v51, %v7043_v4 }
 0x61e   : > { %v7075_v0 = vadd.f32 %v7074_v58, %v7044_v26 }
 0x620   : > { %v7076_v40 = vadd.f32 %v7075_v0, %v7045_v57 }
 0x622   : > { %v7077_v19 = vadd.f32 %v7076_v40, %v7046_v49 }
 0x624   : > { %v7078_v18 = vadd.f32 %v7077_v19, %v7047_v10 }
 0x626   : > { %v7079_v7 = vadd.f32 %v7078_v18, %v7048_v62 }
 0x628   : > { %v7080_v34 = vadd.f32 %v7079_v7, %v7049_v59 }
 0x62a   : > { %v7081_v32 = vadd.f32 %v7080_v34, %v7050_v15 }
 0x62c   : > { %v7082_v21 = vadd.f32 %v7081_v32, %v7051_v33 }
 0x62e   : > { %v7083_v43 = vrot.slane %v7082_v21, 4 }
 0x630   : > { %v7084_v23 = vadd.f32 %v7083_v43, %v7082_v21 }
 0x632   : > { %v7085_v2 = vrot.slane %v7084_v23, 2 }
 0x634   : > { %v7086_v3 = vadd.f32 %v7085_v2, %v7084_v23 }
 0x636   : > { %v7087_v44 = vrot.slane %v7086_v3, 1 }
 0x638   : > { %v7088_v13 = vadd.f32 %v7087_v44, %v7086_v3 }
 0x63a   : > { %v7089_v5 = vmul.f32 0.00390625, %v7088_v13 }
 0x63c   : > { %v7090_v12 = vpack.c.bf16 %v7089_v5, %v7089_v5 }
 0x63e   : > { %7860 = vmatmul.mubr.bf16.vlgmr.msra.gmra.mrb[104].mxu0 %v7090_v12 }
 0x711   : > { %v7190_v55 = vpop.f32.mrb[104].mxu0 }
 0x712   : > { %v7191_v29 = vadd.f32 %v7190_v55, %v7107_v42  ;;  %v7861_v27 = vpop.f32.mrb[105].mxu0 }
 0x713   : > { %v7193_v24 = vpop.f32.mrb[106].mxu0 }
 0x714   : > { %7196 = vst [vmem:[%s432_s0] sm:$0x1] %v7191_v29  ;;  %v7862_v52 = vpop.f32.mrb[107].mxu0 }
 0x715   : > { %8511 = shalt.err (!%p8508_p3)
}
 0x716   : > { %s8512_s21 = scalar_lea.hbm %s10658_s17, 16  ;;  %s8516_s16 = scalar_lea.hbm %s10713_s13, 32 }
 0x717   : > { %p8513_p4 = scmp.ne.s32.totalorder %s10658_s17, %s8512_s21  ;;  %p8517_p9 = scmp.lt.u32.totalorder %s10658_s17, %s10713_s13 }
 0x718   : > { %p8518_p10 = scmp.lt.u32.totalorder %s8516_s16, %s8512_s21  ;;  %p8520_p12 = scmp.lt.u32.totalorder %s8512_s21, %s10658_s17 }
 0x719   : > { %p8514_p7 = pnand %p8513_p4, %p8674_p5 }
 0x71a   : > { %p8519_p11 = por %p8518_p10, %p8517_p9 }
 0x71b   : > { %p8515_p8 = pneg %p8514_p7 }
 0x71c   : > { %p8521_p13 = por %p8520_p12, %p8519_p11 }
 0x71e   : > { %p8522_p0 = pnand %p8521_p13, %p8515_p8 }
 0x720   : > { %8525 = shalt.err (!%p8522_p0)
}
 0x721   : > { %8119 = dma.vmem_to_hbm [thread:$0]  (%p8674_p5), %s10660_s15, 16, %s10658_s17, %s7198_s20  }
 0x722 PF: > { %p8125_p1 = scmp.ge.s32.totalorder %s8560_s28, 2  ;;  %s7222_s29 = sand.u32 1, %s8548_s25  }
 0x723   : > { %s7223_s24 = scalar_lea.sflag [#allocation5], %s7222_s29 }
 0x724   : > { %p8122_p2 = pnand %p8125_p1, %p8678_p6 }
 0x726   : > { %8543 = dma.done.wait (!%p8122_p2), %s7223_s24, 16  }
 0x727   : > { %8545 = vsyncadd (!%p8122_p2), %s7223_s24, 4294967280  ;;  %s10787_s21 = sld [smem:[#allocation7_spill]]  ;;  %p23_p3 = scmp.ge.s32.totalorder %s8661_s14, 4  }
 0x728   : > { %s10788_s25 = smov %s8552_s26  ;;  %s10789_s26 = smov %s8556_s27 }
 0x729   : > { %s10791_s28 = smov %s8661_s14  ;;  %25 = sbr.rel (!%p23_p3) target bundleno = 5 (0x5), region = 109 }
 0x72d   : > { %s10790_s27 = smov %s10787_s21 }
 0x730   :  { %7227 = vsyncpa [#allocation5], 1 }
 0x731   :  { %7229 = vsyncpa [#allocation5 + $0x1], 1 }

</bundles_post_ra>
